<compile_context>
chip_gen: v5e
topology: v5e:2x2
jax: 0.10.0
libtpu: 0.0.40
codegen_flags: <defaults>
</compile_context>

<pallas_src>
import functools

import jax
import jax.numpy as jnp
from jax.experimental import pallas as pl
from jax.experimental.pallas import tpu as pltpu


def block_kernel(x_ref, w_ref, b_ref, cmask_ref, o_ref, pad_ref, *,
                 H, W, C, K, PAD, BT):
    """Processes BT images per grid step in a lane-dense (C, H*W) layout.

    x_ref     : (BT, C, H*W)      input slab (spatial dim dense on lanes)
    w_ref     : (4, C, K*K*C)     im2col weights, tap-major / channel-minor
                                  (res_scale already folded into layer 3)
    b_ref     : (4, C, 1)         biases (res_scale folded into layer 3)
    cmask_ref : (K, H*W)          0/1 column-validity mask per horizontal tap
    o_ref     : (BT, C, H*W)      output slab (lane-dense, unmasked stores)
    pad_ref   : (C, H*W + 2*PAD)  flat zero-apron scratch: a spatial shift by
                                  d = sy*W + sx is the static lane slice
                                  pad_ref[:, PAD+d : PAD+d+H*W]
    """
    HW = H * W
    p = K // 2

    # Zero the scratch once per grid step; only the interior [PAD:PAD+HW] is
    # ever rewritten, so the zero apron survives all layers / batch items.
    pad_ref[...] = jnp.zeros_like(pad_ref)

    cmask = cmask_ref[...]                                   # (K, HW)

    for n in range(BT):                                      # static, small
        act = x_ref[n]                                       # (C, HW) f32
        for layer in range(4):
            # Stage current activation into the zero-apron scratch.
            # PAD is a multiple of 128 -> lane-aligned, unmasked store.
            pad_ref[:, PAD:PAD + HW] = act

            # im2col: K*K shifted copies stacked along sublanes.
            parts = []
            for ky in range(K):
                for kx in range(K):
                    d = (ky - p) * W + (kx - p)
                    t = pad_ref[:, PAD + d:PAD + d + HW]     # (C, HW)
                    if kx != p:                              # kill column wrap
                        t = t * cmask[kx:kx + 1, :]
                    parts.append(t)
            patches = jnp.concatenate(parts, axis=0)         # (K*K*C, HW)

            # Single MXU matmul per layer: (C, K*K*C) x (K*K*C, HW).
            out = jnp.dot(w_ref[layer], patches,
                          preferred_element_type=jnp.float32)
            out = out + b_ref[layer]                         # (C,1) lane bcast
            if layer == 0:                                   # ReLU after conv0
                out = jnp.maximum(out, 0.0)
            act = out                                        # stays flat

        o_ref[n] = act.astype(o_ref.dtype)                   # lane-dense store


def block_forward(x_nchw, weights, biases, res_scale=1.0):
    """weights: (4, Cout, Cin, K, K) PyTorch OIHW per layer; biases: (4, Cout)."""
    N, C, H, W = x_nchw.shape
    K = weights.shape[-1]
    p = K // 2
    HW = H * W

    # ---- wrapper-side (free XLA) parameter / layout prep --------------------
    w = weights.astype(jnp.float32)
    b = biases.astype(jnp.float32)
    # Fold res_scale into the last conv layer (removes a (C, HW) multiply).
    w = w.at[3].multiply(res_scale)
    b = b.at[3].multiply(res_scale)
    # OIHW -> (layer, Cout, ky, kx, Cin) -> (layer, Cout, K*K*Cin).
    w_im2col = jnp.transpose(w, (0, 1, 3, 4, 2)).reshape(4, C, K * K * C)
    b2 = b.reshape(4, C, 1)

    # Lane-dense activations: NCHW -> (N, C, H*W) (contiguous, free reshape).
    x = x_nchw.reshape(N, C, HW).astype(jnp.float32)

    # Column-validity masks for each horizontal tap offset sx = kx - p.
    col = jnp.arange(HW, dtype=jnp.int32) % W
    cmask = jnp.stack(
        [((col + (kx - p) >= 0) & (col + (kx - p) < W)).astype(jnp.float32)
         for kx in range(K)], axis=0)                        # (K, HW)

    # Flat zero-apron width, rounded up to a lane-aligned multiple of 128.
    PAD = ((p * (W + 1) + 127) // 128) * 128

    # Batch tile: a few images per grid step to amortize per-step overhead.
    bt = min(N, 8)
    while N % bt:
        bt -= 1

    kernel = functools.partial(block_kernel, H=H, W=W, C=C, K=K,
                               PAD=PAD, BT=bt)

    out = pl.pallas_call(
        kernel,
        out_shape=jax.ShapeDtypeStruct((N, C, HW), jnp.float32),
        grid_spec=pltpu.PrefetchScalarGridSpec(
            num_scalar_prefetch=0,
            grid=(N // bt,),
            in_specs=[
                pl.BlockSpec((bt, C, HW), lambda n: (n, 0, 0)),
                pl.BlockSpec((4, C, K * K * C), lambda n: (0, 0, 0)),
                pl.BlockSpec((4, C, 1), lambda n: (0, 0, 0)),
                pl.BlockSpec((K, HW), lambda n: (0, 0)),
            ],
            out_specs=pl.BlockSpec((bt, C, HW), lambda n: (n, 0, 0)),
            scratch_shapes=[pltpu.VMEM((C, HW + 2 * PAD), jnp.float32)],
        ),
        compiler_params=pltpu.CompilerParams(
            # Batch iterations are independent -> megacore-shardable (v7x).
            dimension_semantics=("parallel",),
            vmem_limit_bytes=48 * 1024 * 1024,
        ),
    )(x, w_im2col, b2, cmask)

    return out.reshape(N, C, H, W).astype(x_nchw.dtype)


def block_forward_ref(x_nchw, weights, biases, res_scale=1.0):
    """Pure-JAX reference (NCHW / OIHW, same-padding convs)."""
    y = x_nchw
    for i in range(4):
        y = jax.lax.conv_general_dilated(
            y, weights[i], window_strides=(1, 1), padding="SAME",
            dimension_numbers=("NCHW", "OIHW", "NCHW"),
            precision=jax.lax.Precision.HIGHEST)
        y = y + biases[i][None, :, None, None]
        if i == 0:
            y = jnp.maximum(y, 0.0)
    return y * res_scale


if __name__ == "__main__":
    # Small shapes consistent with the module: Block(conv, n_feat, kernel_size)
    N, C, H, W, K = 2, 8, 16, 16, 3
    res_scale = 0.5

    key = jax.random.PRNGKey(0)
    kx, kw, kb = jax.random.split(key, 3)

    x = jax.random.normal(kx, (N, C, H, W), dtype=jnp.float32)
    # deterministic synthetic parameters (4 conv layers, n_feat -> n_feat)
    weights = 0.1 * jax.random.normal(kw, (4, C, C, K, K), dtype=jnp.float32)
    biases = 0.05 * jax.random.normal(kb, (4, C), dtype=jnp.float32)

    out = block_forward(x, weights, biases, res_scale)
    out = jax.block_until_ready(out)

    ref = block_forward_ref(x, weights, biases, res_scale)
    assert out.shape == (N, C, H, W)
    assert jnp.allclose(out, ref, atol=2e-3, rtol=2e-3), (
        float(jnp.max(jnp.abs(out - ref))))

    print("KERNEL_OK")
</pallas_src>

<mosaic_0001>
module attributes {stable_mosaic.version = 11 : i64} {
  func.func @block_kernel(%arg0: i32, %arg1: memref<2x8x256xf32, #tpu.memory_space<vmem>>, %arg2: memref<4x8x72xf32, #tpu.memory_space<vmem>>, %arg3: memref<4x8x1xf32, #tpu.memory_space<vmem>>, %arg4: memref<3x256xf32, #tpu.memory_space<vmem>>, %arg5: memref<2x8x256xf32, #tpu.memory_space<vmem>>, %arg6: memref<8x512xf32, #tpu.memory_space<vmem>>) attributes {dimension_semantics = [#tpu.dimension_semantics<parallel>], iteration_bounds = array<i64: 1>, scalar_prefetch = 0 : i64, scratch_operands = 1 : i64, tpu.core_type = #tpu.core_type<tc>, window_params = [{transform_indices = @transform_0, window_bounds = array<i64: 2, 8, 256>}, {pipeline_mode = #tpu.pipeline_mode<synchronous>, transform_indices = @transform_1, window_bounds = array<i64: 4, 8, 72>}, {pipeline_mode = #tpu.pipeline_mode<synchronous>, transform_indices = @transform_2, window_bounds = array<i64: 4, 8, 1>}, {pipeline_mode = #tpu.pipeline_mode<synchronous>, transform_indices = @transform_3, window_bounds = array<i64: 3, 256>}, {transform_indices = @transform_4, window_bounds = array<i64: 2, 8, 256>}]} {
    %cst = arith.constant 0.000000e+00 : f32
    %0 = vector.broadcast %cst : f32 to vector<8x512xf32>
    %c0 = arith.constant 0 : index
    %c0_0 = arith.constant 0 : index
    %1 = vector.load %arg6[%c0, %c0_0] : memref<8x512xf32, #tpu.memory_space<vmem>>, vector<8x512xf32>
    tpu.vector_store %arg6[%c0, %c0_0], %0 {strides = array<i32>} : memref<8x512xf32, #tpu.memory_space<vmem>>, vector<8x512xf32>,
    %c0_1 = arith.constant 0 : index
    %c0_2 = arith.constant 0 : index
    %2 = vector.load %arg4[%c0_1, %c0_2] : memref<3x256xf32, #tpu.memory_space<vmem>>, vector<3x256xf32>
    %c0_3 = arith.constant 0 : index
    %c0_4 = arith.constant 0 : index
    %c0_5 = arith.constant 0 : index
    %3 = vector.load %arg1[%c0_3, %c0_4, %c0_5] : memref<2x8x256xf32, #tpu.memory_space<vmem>>, vector<1x8x256xf32>
    %4 = vector.shape_cast %3 : vector<1x8x256xf32> to vector<8x256xf32>
    %c0_6 = arith.constant 0 : index
    %c128 = arith.constant 128 : index
    %5 = vector.load %arg6[%c0_6, %c128] : memref<8x512xf32, #tpu.memory_space<vmem>>, vector<8x256xf32>
    tpu.vector_store %arg6[%c0_6, %c128], %4 {strides = array<i32>} : memref<8x512xf32, #tpu.memory_space<vmem>>, vector<8x256xf32>,
    %c0_7 = arith.constant 0 : index
    %c111 = arith.constant 111 : index
    %6 = vector.load %arg6[%c0_7, %c111] : memref<8x512xf32, #tpu.memory_space<vmem>>, vector<8x256xf32>
    %7 = vector.extract_strided_slice %2 {offsets = [0, 0], sizes = [1, 256], strides = [1, 1]} : vector<3x256xf32> to vector<1x256xf32>
    %8 = vector.broadcast %7 : vector<1x256xf32> to vector<8x256xf32>
    %9 = arith.mulf %6, %8 : vector<8x256xf32>
    %c0_8 = arith.constant 0 : index
    %c112 = arith.constant 112 : index
    %10 = vector.load %arg6[%c0_8, %c112] : memref<8x512xf32, #tpu.memory_space<vmem>>, vector<8x256xf32>
    %c0_9 = arith.constant 0 : index
    %c113 = arith.constant 113 : index
    %11 = vector.load %arg6[%c0_9, %c113] : memref<8x512xf32, #tpu.memory_space<vmem>>, vector<8x256xf32>
    %12 = vector.extract_strided_slice %2 {offsets = [2, 0], sizes = [1, 256], strides = [1, 1]} : vector<3x256xf32> to vector<1x256xf32>
    %13 = vector.broadcast %12 : vector<1x256xf32> to vector<8x256xf32>
    %14 = arith.mulf %11, %13 : vector<8x256xf32>
    %c0_10 = arith.constant 0 : index
    %c127 = arith.constant 127 : index
    %15 = vector.load %arg6[%c0_10, %c127] : memref<8x512xf32, #tpu.memory_space<vmem>>, vector<8x256xf32>
    %16 = vector.extract_strided_slice %2 {offsets = [0, 0], sizes = [1, 256], strides = [1, 1]} : vector<3x256xf32> to vector<1x256xf32>
    %17 = vector.broadcast %16 : vector<1x256xf32> to vector<8x256xf32>
    %18 = arith.mulf %15, %17 : vector<8x256xf32>
    %c0_11 = arith.constant 0 : index
    %c128_12 = arith.constant 128 : index
    %19 = vector.load %arg6[%c0_11, %c128_12] : memref<8x512xf32, #tpu.memory_space<vmem>>, vector<8x256xf32>
    %c0_13 = arith.constant 0 : index
    %c129 = arith.constant 129 : index
    %20 = vector.load %arg6[%c0_13, %c129] : memref<8x512xf32, #tpu.memory_space<vmem>>, vector<8x256xf32>
    %21 = vector.extract_strided_slice %2 {offsets = [2, 0], sizes = [1, 256], strides = [1, 1]} : vector<3x256xf32> to vector<1x256xf32>
    %22 = vector.broadcast %21 : vector<1x256xf32> to vector<8x256xf32>
    %23 = arith.mulf %20, %22 : vector<8x256xf32>
    %c0_14 = arith.constant 0 : index
    %c143 = arith.constant 143 : index
    %24 = vector.load %arg6[%c0_14, %c143] : memref<8x512xf32, #tpu.memory_space<vmem>>, vector<8x256xf32>
    %25 = vector.extract_strided_slice %2 {offsets = [0, 0], sizes = [1, 256], strides = [1, 1]} : vector<3x256xf32> to vector<1x256xf32>
    %26 = vector.broadcast %25 : vector<1x256xf32> to vector<8x256xf32>
    %27 = arith.mulf %24, %26 : vector<8x256xf32>
    %c0_15 = arith.constant 0 : index
    %c144 = arith.constant 144 : index
    %28 = vector.load %arg6[%c0_15, %c144] : memref<8x512xf32, #tpu.memory_space<vmem>>, vector<8x256xf32>
    %c0_16 = arith.constant 0 : index
    %c145 = arith.constant 145 : index
    %29 = vector.load %arg6[%c0_16, %c145] : memref<8x512xf32, #tpu.memory_space<vmem>>, vector<8x256xf32>
    %30 = vector.extract_strided_slice %2 {offsets = [2, 0], sizes = [1, 256], strides = [1, 1]} : vector<3x256xf32> to vector<1x256xf32>
    %31 = vector.broadcast %30 : vector<1x256xf32> to vector<8x256xf32>
    %32 = arith.mulf %29, %31 : vector<8x256xf32>
    %33 = tpu.concatenate %9, %10, %14, %18, %19, %23, %27, %28, %32 in 0 : vector<8x256xf32>, vector<8x256xf32>, vector<8x256xf32>, vector<8x256xf32>, vector<8x256xf32>, vector<8x256xf32>, vector<8x256xf32>, vector<8x256xf32>, vector<8x256xf32> -> vector<72x256xf32>
    %c0_17 = arith.constant 0 : index
    %c0_18 = arith.constant 0 : index
    %c0_19 = arith.constant 0 : index
    %34 = vector.load %arg2[%c0_17, %c0_18, %c0_19] : memref<4x8x72xf32, #tpu.memory_space<vmem>>, vector<1x8x72xf32>
    %35 = vector.shape_cast %34 : vector<1x8x72xf32> to vector<8x72xf32>
    %cst_20 = arith.constant dense<0.000000e+00> : vector<8x256xf32>
    %36 = tpu.matmul %35, %33, %cst_20 {dimension_numbers = #tpu.dot_dimension_numbers<[1], [0], [0], [1], [0, 0, 1, 1], [], []>} : vector<8x72xf32>, vector<72x256xf32>, vector<8x256xf32> -> vector<8x256xf32>
    %c0_21 = arith.constant 0 : index
    %c0_22 = arith.constant 0 : index
    %c0_23 = arith.constant 0 : index
    %37 = vector.load %arg3[%c0_21, %c0_22, %c0_23] : memref<4x8x1xf32, #tpu.memory_space<vmem>>, vector<1x8x1xf32>
    %38 = vector.shape_cast %37 : vector<1x8x1xf32> to vector<8x1xf32>
    %39 = vector.broadcast %38 : vector<8x1xf32> to vector<8x256xf32>
    %40 = arith.addf %36, %39 : vector<8x256xf32>
    %cst_24 = arith.constant 0.000000e+00 : f32
    %41 = vector.broadcast %cst_24 : f32 to vector<8x256xf32>
    %42 = arith.maximumf %40, %41 : vector<8x256xf32>
    %c0_25 = arith.constant 0 : index
    %c128_26 = arith.constant 128 : index
    %43 = vector.load %arg6[%c0_25, %c128_26] : memref<8x512xf32, #tpu.memory_space<vmem>>, vector<8x256xf32>
    tpu.vector_store %arg6[%c0_25, %c128_26], %42 {strides = array<i32>} : memref<8x512xf32, #tpu.memory_space<vmem>>, vector<8x256xf32>,
    %c0_27 = arith.constant 0 : index
    %c111_28 = arith.constant 111 : index
    %44 = vector.load %arg6[%c0_27, %c111_28] : memref<8x512xf32, #tpu.memory_space<vmem>>, vector<8x256xf32>
    %45 = vector.extract_strided_slice %2 {offsets = [0, 0], sizes = [1, 256], strides = [1, 1]} : vector<3x256xf32> to vector<1x256xf32>
    %46 = vector.broadcast %45 : vector<1x256xf32> to vector<8x256xf32>
    %47 = arith.mulf %44, %46 : vector<8x256xf32>
    %c0_29 = arith.constant 0 : index
    %c112_30 = arith.constant 112 : index
    %48 = vector.load %arg6[%c0_29, %c112_30] : memref<8x512xf32, #tpu.memory_space<vmem>>, vector<8x256xf32>
    %c0_31 = arith.constant 0 : index
    %c113_32 = arith.constant 113 : index
    %49 = vector.load %arg6[%c0_31, %c113_32] : memref<8x512xf32, #tpu.memory_space<vmem>>, vector<8x256xf32>
    %50 = vector.extract_strided_slice %2 {offsets = [2, 0], sizes = [1, 256], strides = [1, 1]} : vector<3x256xf32> to vector<1x256xf32>
    %51 = vector.broadcast %50 : vector<1x256xf32> to vector<8x256xf32>
    %52 = arith.mulf %49, %51 : vector<8x256xf32>
    %c0_33 = arith.constant 0 : index
    %c127_34 = arith.constant 127 : index
    %53 = vector.load %arg6[%c0_33, %c127_34] : memref<8x512xf32, #tpu.memory_space<vmem>>, vector<8x256xf32>
    %54 = vector.extract_strided_slice %2 {offsets = [0, 0], sizes = [1, 256], strides = [1, 1]} : vector<3x256xf32> to vector<1x256xf32>
    %55 = vector.broadcast %54 : vector<1x256xf32> to vector<8x256xf32>
    %56 = arith.mulf %53, %55 : vector<8x256xf32>
    %c0_35 = arith.constant 0 : index
    %c128_36 = arith.constant 128 : index
    %57 = vector.load %arg6[%c0_35, %c128_36] : memref<8x512xf32, #tpu.memory_space<vmem>>, vector<8x256xf32>
    %c0_37 = arith.constant 0 : index
    %c129_38 = arith.constant 129 : index
    %58 = vector.load %arg6[%c0_37, %c129_38] : memref<8x512xf32, #tpu.memory_space<vmem>>, vector<8x256xf32>
    %59 = vector.extract_strided_slice %2 {offsets = [2, 0], sizes = [1, 256], strides = [1, 1]} : vector<3x256xf32> to vector<1x256xf32>
    %60 = vector.broadcast %59 : vector<1x256xf32> to vector<8x256xf32>
    %61 = arith.mulf %58, %60 : vector<8x256xf32>
    %c0_39 = arith.constant 0 : index
    %c143_40 = arith.constant 143 : index
    %62 = vector.load %arg6[%c0_39, %c143_40] : memref<8x512xf32, #tpu.memory_space<vmem>>, vector<8x256xf32>
    %63 = vector.extract_strided_slice %2 {offsets = [0, 0], sizes = [1, 256], strides = [1, 1]} : vector<3x256xf32> to vector<1x256xf32>
    %64 = vector.broadcast %63 : vector<1x256xf32> to vector<8x256xf32>
    %65 = arith.mulf %62, %64 : vector<8x256xf32>
    %c0_41 = arith.constant 0 : index
    %c144_42 = arith.constant 144 : index
    %66 = vector.load %arg6[%c0_41, %c144_42] : memref<8x512xf32, #tpu.memory_space<vmem>>, vector<8x256xf32>
    %c0_43 = arith.constant 0 : index
    %c145_44 = arith.constant 145 : index
    %67 = vector.load %arg6[%c0_43, %c145_44] : memref<8x512xf32, #tpu.memory_space<vmem>>, vector<8x256xf32>
    %68 = vector.extract_strided_slice %2 {offsets = [2, 0], sizes = [1, 256], strides = [1, 1]} : vector<3x256xf32> to vector<1x256xf32>
    %69 = vector.broadcast %68 : vector<1x256xf32> to vector<8x256xf32>
    %70 = arith.mulf %67, %69 : vector<8x256xf32>
    %71 = tpu.concatenate %47, %48, %52, %56, %57, %61, %65, %66, %70 in 0 : vector<8x256xf32>, vector<8x256xf32>, vector<8x256xf32>, vector<8x256xf32>, vector<8x256xf32>, vector<8x256xf32>, vector<8x256xf32>, vector<8x256xf32>, vector<8x256xf32> -> vector<72x256xf32>
    %c1 = arith.constant 1 : index
    %c0_45 = arith.constant 0 : index
    %c0_46 = arith.constant 0 : index
    %72 = vector.load %arg2[%c1, %c0_45, %c0_46] : memref<4x8x72xf32, #tpu.memory_space<vmem>>, vector<1x8x72xf32>
    %73 = vector.shape_cast %72 : vector<1x8x72xf32> to vector<8x72xf32>
    %cst_47 = arith.constant dense<0.000000e+00> : vector<8x256xf32>
    %74 = tpu.matmul %73, %71, %cst_47 {dimension_numbers = #tpu.dot_dimension_numbers<[1], [0], [0], [1], [0, 0, 1, 1], [], []>} : vector<8x72xf32>, vector<72x256xf32>, vector<8x256xf32> -> vector<8x256xf32>
    %c1_48 = arith.constant 1 : index
    %c0_49 = arith.constant 0 : index
    %c0_50 = arith.constant 0 : index
    %75 = vector.load %arg3[%c1_48, %c0_49, %c0_50] : memref<4x8x1xf32, #tpu.memory_space<vmem>>, vector<1x8x1xf32>
    %76 = vector.shape_cast %75 : vector<1x8x1xf32> to vector<8x1xf32>
    %77 = vector.broadcast %76 : vector<8x1xf32> to vector<8x256xf32>
    %78 = arith.addf %74, %77 : vector<8x256xf32>
    %c0_51 = arith.constant 0 : index
    %c128_52 = arith.constant 128 : index
    %79 = vector.load %arg6[%c0_51, %c128_52] : memref<8x512xf32, #tpu.memory_space<vmem>>, vector<8x256xf32>
    tpu.vector_store %arg6[%c0_51, %c128_52], %78 {strides = array<i32>} : memref<8x512xf32, #tpu.memory_space<vmem>>, vector<8x256xf32>,
    %c0_53 = arith.constant 0 : index
    %c111_54 = arith.constant 111 : index
    %80 = vector.load %arg6[%c0_53, %c111_54] : memref<8x512xf32, #tpu.memory_space<vmem>>, vector<8x256xf32>
    %81 = vector.extract_strided_slice %2 {offsets = [0, 0], sizes = [1, 256], strides = [1, 1]} : vector<3x256xf32> to vector<1x256xf32>
    %82 = vector.broadcast %81 : vector<1x256xf32> to vector<8x256xf32>
    %83 = arith.mulf %80, %82 : vector<8x256xf32>
    %c0_55 = arith.constant 0 : index
    %c112_56 = arith.constant 112 : index
    %84 = vector.load %arg6[%c0_55, %c112_56] : memref<8x512xf32, #tpu.memory_space<vmem>>, vector<8x256xf32>
    %c0_57 = arith.constant 0 : index
    %c113_58 = arith.constant 113 : index
    %85 = vector.load %arg6[%c0_57, %c113_58] : memref<8x512xf32, #tpu.memory_space<vmem>>, vector<8x256xf32>
    %86 = vector.extract_strided_slice %2 {offsets = [2, 0], sizes = [1, 256], strides = [1, 1]} : vector<3x256xf32> to vector<1x256xf32>
    %87 = vector.broadcast %86 : vector<1x256xf32> to vector<8x256xf32>
    %88 = arith.mulf %85, %87 : vector<8x256xf32>
    %c0_59 = arith.constant 0 : index
    %c127_60 = arith.constant 127 : index
    %89 = vector.load %arg6[%c0_59, %c127_60] : memref<8x512xf32, #tpu.memory_space<vmem>>, vector<8x256xf32>
    %90 = vector.extract_strided_slice %2 {offsets = [0, 0], sizes = [1, 256], strides = [1, 1]} : vector<3x256xf32> to vector<1x256xf32>
    %91 = vector.broadcast %90 : vector<1x256xf32> to vector<8x256xf32>
    %92 = arith.mulf %89, %91 : vector<8x256xf32>
    %c0_61 = arith.constant 0 : index
    %c128_62 = arith.constant 128 : index
    %93 = vector.load %arg6[%c0_61, %c128_62] : memref<8x512xf32, #tpu.memory_space<vmem>>, vector<8x256xf32>
    %c0_63 = arith.constant 0 : index
    %c129_64 = arith.constant 129 : index
    %94 = vector.load %arg6[%c0_63, %c129_64] : memref<8x512xf32, #tpu.memory_space<vmem>>, vector<8x256xf32>
    %95 = vector.extract_strided_slice %2 {offsets = [2, 0], sizes = [1, 256], strides = [1, 1]} : vector<3x256xf32> to vector<1x256xf32>
    %96 = vector.broadcast %95 : vector<1x256xf32> to vector<8x256xf32>
    %97 = arith.mulf %94, %96 : vector<8x256xf32>
    %c0_65 = arith.constant 0 : index
    %c143_66 = arith.constant 143 : index
    %98 = vector.load %arg6[%c0_65, %c143_66] : memref<8x512xf32, #tpu.memory_space<vmem>>, vector<8x256xf32>
    %99 = vector.extract_strided_slice %2 {offsets = [0, 0], sizes = [1, 256], strides = [1, 1]} : vector<3x256xf32> to vector<1x256xf32>
    %100 = vector.broadcast %99 : vector<1x256xf32> to vector<8x256xf32>
    %101 = arith.mulf %98, %100 : vector<8x256xf32>
    %c0_67 = arith.constant 0 : index
    %c144_68 = arith.constant 144 : index
    %102 = vector.load %arg6[%c0_67, %c144_68] : memref<8x512xf32, #tpu.memory_space<vmem>>, vector<8x256xf32>
    %c0_69 = arith.constant 0 : index
    %c145_70 = arith.constant 145 : index
    %103 = vector.load %arg6[%c0_69, %c145_70] : memref<8x512xf32, #tpu.memory_space<vmem>>, vector<8x256xf32>
    %104 = vector.extract_strided_slice %2 {offsets = [2, 0], sizes = [1, 256], strides = [1, 1]} : vector<3x256xf32> to vector<1x256xf32>
    %105 = vector.broadcast %104 : vector<1x256xf32> to vector<8x256xf32>
    %106 = arith.mulf %103, %105 : vector<8x256xf32>
    %107 = tpu.concatenate %83, %84, %88, %92, %93, %97, %101, %102, %106 in 0 : vector<8x256xf32>, vector<8x256xf32>, vector<8x256xf32>, vector<8x256xf32>, vector<8x256xf32>, vector<8x256xf32>, vector<8x256xf32>, vector<8x256xf32>, vector<8x256xf32> -> vector<72x256xf32>
    %c2 = arith.constant 2 : index
    %c0_71 = arith.constant 0 : index
    %c0_72 = arith.constant 0 : index
    %108 = vector.load %arg2[%c2, %c0_71, %c0_72] : memref<4x8x72xf32, #tpu.memory_space<vmem>>, vector<1x8x72xf32>
    %109 = vector.shape_cast %108 : vector<1x8x72xf32> to vector<8x72xf32>
    %cst_73 = arith.constant dense<0.000000e+00> : vector<8x256xf32>
    %110 = tpu.matmul %109, %107, %cst_73 {dimension_numbers = #tpu.dot_dimension_numbers<[1], [0], [0], [1], [0, 0, 1, 1], [], []>} : vector<8x72xf32>, vector<72x256xf32>, vector<8x256xf32> -> vector<8x256xf32>
    %c2_74 = arith.constant 2 : index
    %c0_75 = arith.constant 0 : index
    %c0_76 = arith.constant 0 : index
    %111 = vector.load %arg3[%c2_74, %c0_75, %c0_76] : memref<4x8x1xf32, #tpu.memory_space<vmem>>, vector<1x8x1xf32>
    %112 = vector.shape_cast %111 : vector<1x8x1xf32> to vector<8x1xf32>
    %113 = vector.broadcast %112 : vector<8x1xf32> to vector<8x256xf32>
    %114 = arith.addf %110, %113 : vector<8x256xf32>
    %c0_77 = arith.constant 0 : index
    %c128_78 = arith.constant 128 : index
    %115 = vector.load %arg6[%c0_77, %c128_78] : memref<8x512xf32, #tpu.memory_space<vmem>>, vector<8x256xf32>
    tpu.vector_store %arg6[%c0_77, %c128_78], %114 {strides = array<i32>} : memref<8x512xf32, #tpu.memory_space<vmem>>, vector<8x256xf32>,
    %c0_79 = arith.constant 0 : index
    %c111_80 = arith.constant 111 : index
    %116 = vector.load %arg6[%c0_79, %c111_80] : memref<8x512xf32, #tpu.memory_space<vmem>>, vector<8x256xf32>
    %117 = vector.extract_strided_slice %2 {offsets = [0, 0], sizes = [1, 256], strides = [1, 1]} : vector<3x256xf32> to vector<1x256xf32>
    %118 = vector.broadcast %117 : vector<1x256xf32> to vector<8x256xf32>
    %119 = arith.mulf %116, %118 : vector<8x256xf32>
    %c0_81 = arith.constant 0 : index
    %c112_82 = arith.constant 112 : index
    %120 = vector.load %arg6[%c0_81, %c112_82] : memref<8x512xf32, #tpu.memory_space<vmem>>, vector<8x256xf32>
    %c0_83 = arith.constant 0 : index
    %c113_84 = arith.constant 113 : index
    %121 = vector.load %arg6[%c0_83, %c113_84] : memref<8x512xf32, #tpu.memory_space<vmem>>, vector<8x256xf32>
    %122 = vector.extract_strided_slice %2 {offsets = [2, 0], sizes = [1, 256], strides = [1, 1]} : vector<3x256xf32> to vector<1x256xf32>
    %123 = vector.broadcast %122 : vector<1x256xf32> to vector<8x256xf32>
    %124 = arith.mulf %121, %123 : vector<8x256xf32>
    %c0_85 = arith.constant 0 : index
    %c127_86 = arith.constant 127 : index
    %125 = vector.load %arg6[%c0_85, %c127_86] : memref<8x512xf32, #tpu.memory_space<vmem>>, vector<8x256xf32>
    %126 = vector.extract_strided_slice %2 {offsets = [0, 0], sizes = [1, 256], strides = [1, 1]} : vector<3x256xf32> to vector<1x256xf32>
    %127 = vector.broadcast %126 : vector<1x256xf32> to vector<8x256xf32>
    %128 = arith.mulf %125, %127 : vector<8x256xf32>
    %c0_87 = arith.constant 0 : index
    %c128_88 = arith.constant 128 : index
    %129 = vector.load %arg6[%c0_87, %c128_88] : memref<8x512xf32, #tpu.memory_space<vmem>>, vector<8x256xf32>
    %c0_89 = arith.constant 0 : index
    %c129_90 = arith.constant 129 : index
    %130 = vector.load %arg6[%c0_89, %c129_90] : memref<8x512xf32, #tpu.memory_space<vmem>>, vector<8x256xf32>
    %131 = vector.extract_strided_slice %2 {offsets = [2, 0], sizes = [1, 256], strides = [1, 1]} : vector<3x256xf32> to vector<1x256xf32>
    %132 = vector.broadcast %131 : vector<1x256xf32> to vector<8x256xf32>
    %133 = arith.mulf %130, %132 : vector<8x256xf32>
    %c0_91 = arith.constant 0 : index
    %c143_92 = arith.constant 143 : index
    %134 = vector.load %arg6[%c0_91, %c143_92] : memref<8x512xf32, #tpu.memory_space<vmem>>, vector<8x256xf32>
    %135 = vector.extract_strided_slice %2 {offsets = [0, 0], sizes = [1, 256], strides = [1, 1]} : vector<3x256xf32> to vector<1x256xf32>
    %136 = vector.broadcast %135 : vector<1x256xf32> to vector<8x256xf32>
    %137 = arith.mulf %134, %136 : vector<8x256xf32>
    %c0_93 = arith.constant 0 : index
    %c144_94 = arith.constant 144 : index
    %138 = vector.load %arg6[%c0_93, %c144_94] : memref<8x512xf32, #tpu.memory_space<vmem>>, vector<8x256xf32>
    %c0_95 = arith.constant 0 : index
    %c145_96 = arith.constant 145 : index
    %139 = vector.load %arg6[%c0_95, %c145_96] : memref<8x512xf32, #tpu.memory_space<vmem>>, vector<8x256xf32>
    %140 = vector.extract_strided_slice %2 {offsets = [2, 0], sizes = [1, 256], strides = [1, 1]} : vector<3x256xf32> to vector<1x256xf32>
    %141 = vector.broadcast %140 : vector<1x256xf32> to vector<8x256xf32>
    %142 = arith.mulf %139, %141 : vector<8x256xf32>
    %143 = tpu.concatenate %119, %120, %124, %128, %129, %133, %137, %138, %142 in 0 : vector<8x256xf32>, vector<8x256xf32>, vector<8x256xf32>, vector<8x256xf32>, vector<8x256xf32>, vector<8x256xf32>, vector<8x256xf32>, vector<8x256xf32>, vector<8x256xf32> -> vector<72x256xf32>
    %c3 = arith.constant 3 : index
    %c0_97 = arith.constant 0 : index
    %c0_98 = arith.constant 0 : index
    %144 = vector.load %arg2[%c3, %c0_97, %c0_98] : memref<4x8x72xf32, #tpu.memory_space<vmem>>, vector<1x8x72xf32>
    %145 = vector.shape_cast %144 : vector<1x8x72xf32> to vector<8x72xf32>
    %cst_99 = arith.constant dense<0.000000e+00> : vector<8x256xf32>
    %146 = tpu.matmul %145, %143, %cst_99 {dimension_numbers = #tpu.dot_dimension_numbers<[1], [0], [0], [1], [0, 0, 1, 1], [], []>} : vector<8x72xf32>, vector<72x256xf32>, vector<8x256xf32> -> vector<8x256xf32>
    %c3_100 = arith.constant 3 : index
    %c0_101 = arith.constant 0 : index
    %c0_102 = arith.constant 0 : index
    %147 = vector.load %arg3[%c3_100, %c0_101, %c0_102] : memref<4x8x1xf32, #tpu.memory_space<vmem>>, vector<1x8x1xf32>
    %148 = vector.shape_cast %147 : vector<1x8x1xf32> to vector<8x1xf32>
    %149 = vector.broadcast %148 : vector<8x1xf32> to vector<8x256xf32>
    %150 = arith.addf %146, %149 : vector<8x256xf32>
    %c0_103 = arith.constant 0 : index
    %c0_104 = arith.constant 0 : index
    %c0_105 = arith.constant 0 : index
    %151 = vector.load %arg5[%c0_103, %c0_104, %c0_105] : memref<2x8x256xf32, #tpu.memory_space<vmem>>, vector<1x8x256xf32>
    %152 = vector.shape_cast %151 : vector<1x8x256xf32> to vector<8x256xf32>
    %153 = vector.shape_cast %150 : vector<8x256xf32> to vector<1x8x256xf32>
    tpu.vector_store %arg5[%c0_103, %c0_104, %c0_105], %153 {strides = array<i32>} : memref<2x8x256xf32, #tpu.memory_space<vmem>>, vector<1x8x256xf32>,
    %c1_106 = arith.constant 1 : index
    %c0_107 = arith.constant 0 : index
    %c0_108 = arith.constant 0 : index
    %154 = vector.load %arg1[%c1_106, %c0_107, %c0_108] : memref<2x8x256xf32, #tpu.memory_space<vmem>>, vector<1x8x256xf32>
    %155 = vector.shape_cast %154 : vector<1x8x256xf32> to vector<8x256xf32>
    %c0_109 = arith.constant 0 : index
    %c128_110 = arith.constant 128 : index
    %156 = vector.load %arg6[%c0_109, %c128_110] : memref<8x512xf32, #tpu.memory_space<vmem>>, vector<8x256xf32>
    tpu.vector_store %arg6[%c0_109, %c128_110], %155 {strides = array<i32>} : memref<8x512xf32, #tpu.memory_space<vmem>>, vector<8x256xf32>,
    %c0_111 = arith.constant 0 : index
    %c111_112 = arith.constant 111 : index
    %157 = vector.load %arg6[%c0_111, %c111_112] : memref<8x512xf32, #tpu.memory_space<vmem>>, vector<8x256xf32>
    %158 = vector.extract_strided_slice %2 {offsets = [0, 0], sizes = [1, 256], strides = [1, 1]} : vector<3x256xf32> to vector<1x256xf32>
    %159 = vector.broadcast %158 : vector<1x256xf32> to vector<8x256xf32>
    %160 = arith.mulf %157, %159 : vector<8x256xf32>
    %c0_113 = arith.constant 0 : index
    %c112_114 = arith.constant 112 : index
    %161 = vector.load %arg6[%c0_113, %c112_114] : memref<8x512xf32, #tpu.memory_space<vmem>>, vector<8x256xf32>
    %c0_115 = arith.constant 0 : index
    %c113_116 = arith.constant 113 : index
    %162 = vector.load %arg6[%c0_115, %c113_116] : memref<8x512xf32, #tpu.memory_space<vmem>>, vector<8x256xf32>
    %163 = vector.extract_strided_slice %2 {offsets = [2, 0], sizes = [1, 256], strides = [1, 1]} : vector<3x256xf32> to vector<1x256xf32>
    %164 = vector.broadcast %163 : vector<1x256xf32> to vector<8x256xf32>
    %165 = arith.mulf %162, %164 : vector<8x256xf32>
    %c0_117 = arith.constant 0 : index
    %c127_118 = arith.constant 127 : index
    %166 = vector.load %arg6[%c0_117, %c127_118] : memref<8x512xf32, #tpu.memory_space<vmem>>, vector<8x256xf32>
    %167 = vector.extract_strided_slice %2 {offsets = [0, 0], sizes = [1, 256], strides = [1, 1]} : vector<3x256xf32> to vector<1x256xf32>
    %168 = vector.broadcast %167 : vector<1x256xf32> to vector<8x256xf32>
    %169 = arith.mulf %166, %168 : vector<8x256xf32>
    %c0_119 = arith.constant 0 : index
    %c128_120 = arith.constant 128 : index
    %170 = vector.load %arg6[%c0_119, %c128_120] : memref<8x512xf32, #tpu.memory_space<vmem>>, vector<8x256xf32>
    %c0_121 = arith.constant 0 : index
    %c129_122 = arith.constant 129 : index
    %171 = vector.load %arg6[%c0_121, %c129_122] : memref<8x512xf32, #tpu.memory_space<vmem>>, vector<8x256xf32>
    %172 = vector.extract_strided_slice %2 {offsets = [2, 0], sizes = [1, 256], strides = [1, 1]} : vector<3x256xf32> to vector<1x256xf32>
    %173 = vector.broadcast %172 : vector<1x256xf32> to vector<8x256xf32>
    %174 = arith.mulf %171, %173 : vector<8x256xf32>
    %c0_123 = arith.constant 0 : index
    %c143_124 = arith.constant 143 : index
    %175 = vector.load %arg6[%c0_123, %c143_124] : memref<8x512xf32, #tpu.memory_space<vmem>>, vector<8x256xf32>
    %176 = vector.extract_strided_slice %2 {offsets = [0, 0], sizes = [1, 256], strides = [1, 1]} : vector<3x256xf32> to vector<1x256xf32>
    %177 = vector.broadcast %176 : vector<1x256xf32> to vector<8x256xf32>
    %178 = arith.mulf %175, %177 : vector<8x256xf32>
    %c0_125 = arith.constant 0 : index
    %c144_126 = arith.constant 144 : index
    %179 = vector.load %arg6[%c0_125, %c144_126] : memref<8x512xf32, #tpu.memory_space<vmem>>, vector<8x256xf32>
    %c0_127 = arith.constant 0 : index
    %c145_128 = arith.constant 145 : index
    %180 = vector.load %arg6[%c0_127, %c145_128] : memref<8x512xf32, #tpu.memory_space<vmem>>, vector<8x256xf32>
    %181 = vector.extract_strided_slice %2 {offsets = [2, 0], sizes = [1, 256], strides = [1, 1]} : vector<3x256xf32> to vector<1x256xf32>
    %182 = vector.broadcast %181 : vector<1x256xf32> to vector<8x256xf32>
    %183 = arith.mulf %180, %182 : vector<8x256xf32>
    %184 = tpu.concatenate %160, %161, %165, %169, %170, %174, %178, %179, %183 in 0 : vector<8x256xf32>, vector<8x256xf32>, vector<8x256xf32>, vector<8x256xf32>, vector<8x256xf32>, vector<8x256xf32>, vector<8x256xf32>, vector<8x256xf32>, vector<8x256xf32> -> vector<72x256xf32>
    %c0_129 = arith.constant 0 : index
    %c0_130 = arith.constant 0 : index
    %c0_131 = arith.constant 0 : index
    %185 = vector.load %arg2[%c0_129, %c0_130, %c0_131] : memref<4x8x72xf32, #tpu.memory_space<vmem>>, vector<1x8x72xf32>
    %186 = vector.shape_cast %185 : vector<1x8x72xf32> to vector<8x72xf32>
    %cst_132 = arith.constant dense<0.000000e+00> : vector<8x256xf32>
    %187 = tpu.matmul %186, %184, %cst_132 {dimension_numbers = #tpu.dot_dimension_numbers<[1], [0], [0], [1], [0, 0, 1, 1], [], []>} : vector<8x72xf32>, vector<72x256xf32>, vector<8x256xf32> -> vector<8x256xf32>
    %c0_133 = arith.constant 0 : index
    %c0_134 = arith.constant 0 : index
    %c0_135 = arith.constant 0 : index
    %188 = vector.load %arg3[%c0_133, %c0_134, %c0_135] : memref<4x8x1xf32, #tpu.memory_space<vmem>>, vector<1x8x1xf32>
    %189 = vector.shape_cast %188 : vector<1x8x1xf32> to vector<8x1xf32>
    %190 = vector.broadcast %189 : vector<8x1xf32> to vector<8x256xf32>
    %191 = arith.addf %187, %190 : vector<8x256xf32>
    %cst_136 = arith.constant 0.000000e+00 : f32
    %192 = vector.broadcast %cst_136 : f32 to vector<8x256xf32>
    %193 = arith.maximumf %191, %192 : vector<8x256xf32>
    %c0_137 = arith.constant 0 : index
    %c128_138 = arith.constant 128 : index
    %194 = vector.load %arg6[%c0_137, %c128_138] : memref<8x512xf32, #tpu.memory_space<vmem>>, vector<8x256xf32>
    tpu.vector_store %arg6[%c0_137, %c128_138], %193 {strides = array<i32>} : memref<8x512xf32, #tpu.memory_space<vmem>>, vector<8x256xf32>,
    %c0_139 = arith.constant 0 : index
    %c111_140 = arith.constant 111 : index
    %195 = vector.load %arg6[%c0_139, %c111_140] : memref<8x512xf32, #tpu.memory_space<vmem>>, vector<8x256xf32>
    %196 = vector.extract_strided_slice %2 {offsets = [0, 0], sizes = [1, 256], strides = [1, 1]} : vector<3x256xf32> to vector<1x256xf32>
    %197 = vector.broadcast %196 : vector<1x256xf32> to vector<8x256xf32>
    %198 = arith.mulf %195, %197 : vector<8x256xf32>
    %c0_141 = arith.constant 0 : index
    %c112_142 = arith.constant 112 : index
    %199 = vector.load %arg6[%c0_141, %c112_142] : memref<8x512xf32, #tpu.memory_space<vmem>>, vector<8x256xf32>
    %c0_143 = arith.constant 0 : index
    %c113_144 = arith.constant 113 : index
    %200 = vector.load %arg6[%c0_143, %c113_144] : memref<8x512xf32, #tpu.memory_space<vmem>>, vector<8x256xf32>
    %201 = vector.extract_strided_slice %2 {offsets = [2, 0], sizes = [1, 256], strides = [1, 1]} : vector<3x256xf32> to vector<1x256xf32>
    %202 = vector.broadcast %201 : vector<1x256xf32> to vector<8x256xf32>
    %203 = arith.mulf %200, %202 : vector<8x256xf32>
    %c0_145 = arith.constant 0 : index
    %c127_146 = arith.constant 127 : index
    %204 = vector.load %arg6[%c0_145, %c127_146] : memref<8x512xf32, #tpu.memory_space<vmem>>, vector<8x256xf32>
    %205 = vector.extract_strided_slice %2 {offsets = [0, 0], sizes = [1, 256], strides = [1, 1]} : vector<3x256xf32> to vector<1x256xf32>
    %206 = vector.broadcast %205 : vector<1x256xf32> to vector<8x256xf32>
    %207 = arith.mulf %204, %206 : vector<8x256xf32>
    %c0_147 = arith.constant 0 : index
    %c128_148 = arith.constant 128 : index
    %208 = vector.load %arg6[%c0_147, %c128_148] : memref<8x512xf32, #tpu.memory_space<vmem>>, vector<8x256xf32>
    %c0_149 = arith.constant 0 : index
    %c129_150 = arith.constant 129 : index
    %209 = vector.load %arg6[%c0_149, %c129_150] : memref<8x512xf32, #tpu.memory_space<vmem>>, vector<8x256xf32>
    %210 = vector.extract_strided_slice %2 {offsets = [2, 0], sizes = [1, 256], strides = [1, 1]} : vector<3x256xf32> to vector<1x256xf32>
    %211 = vector.broadcast %210 : vector<1x256xf32> to vector<8x256xf32>
    %212 = arith.mulf %209, %211 : vector<8x256xf32>
    %c0_151 = arith.constant 0 : index
    %c143_152 = arith.constant 143 : index
    %213 = vector.load %arg6[%c0_151, %c143_152] : memref<8x512xf32, #tpu.memory_space<vmem>>, vector<8x256xf32>
    %214 = vector.extract_strided_slice %2 {offsets = [0, 0], sizes = [1, 256], strides = [1, 1]} : vector<3x256xf32> to vector<1x256xf32>
    %215 = vector.broadcast %214 : vector<1x256xf32> to vector<8x256xf32>
    %216 = arith.mulf %213, %215 : vector<8x256xf32>
    %c0_153 = arith.constant 0 : index
    %c144_154 = arith.constant 144 : index
    %217 = vector.load %arg6[%c0_153, %c144_154] : memref<8x512xf32, #tpu.memory_space<vmem>>, vector<8x256xf32>
    %c0_155 = arith.constant 0 : index
    %c145_156 = arith.constant 145 : index
    %218 = vector.load %arg6[%c0_155, %c145_156] : memref<8x512xf32, #tpu.memory_space<vmem>>, vector<8x256xf32>
    %219 = vector.extract_strided_slice %2 {offsets = [2, 0], sizes = [1, 256], strides = [1, 1]} : vector<3x256xf32> to vector<1x256xf32>
    %220 = vector.broadcast %219 : vector<1x256xf32> to vector<8x256xf32>
    %221 = arith.mulf %218, %220 : vector<8x256xf32>
    %222 = tpu.concatenate %198, %199, %203, %207, %208, %212, %216, %217, %221 in 0 : vector<8x256xf32>, vector<8x256xf32>, vector<8x256xf32>, vector<8x256xf32>, vector<8x256xf32>, vector<8x256xf32>, vector<8x256xf32>, vector<8x256xf32>, vector<8x256xf32> -> vector<72x256xf32>
    %c1_157 = arith.constant 1 : index
    %c0_158 = arith.constant 0 : index
    %c0_159 = arith.constant 0 : index
    %223 = vector.load %arg2[%c1_157, %c0_158, %c0_159] : memref<4x8x72xf32, #tpu.memory_space<vmem>>, vector<1x8x72xf32>
    %224 = vector.shape_cast %223 : vector<1x8x72xf32> to vector<8x72xf32>
    %cst_160 = arith.constant dense<0.000000e+00> : vector<8x256xf32>
    %225 = tpu.matmul %224, %222, %cst_160 {dimension_numbers = #tpu.dot_dimension_numbers<[1], [0], [0], [1], [0, 0, 1, 1], [], []>} : vector<8x72xf32>, vector<72x256xf32>, vector<8x256xf32> -> vector<8x256xf32>
    %c1_161 = arith.constant 1 : index
    %c0_162 = arith.constant 0 : index
    %c0_163 = arith.constant 0 : index
    %226 = vector.load %arg3[%c1_161, %c0_162, %c0_163] : memref<4x8x1xf32, #tpu.memory_space<vmem>>, vector<1x8x1xf32>
    %227 = vector.shape_cast %226 : vector<1x8x1xf32> to vector<8x1xf32>
    %228 = vector.broadcast %227 : vector<8x1xf32> to vector<8x256xf32>
    %229 = arith.addf %225, %228 : vector<8x256xf32>
    %c0_164 = arith.constant 0 : index
    %c128_165 = arith.constant 128 : index
    %230 = vector.load %arg6[%c0_164, %c128_165] : memref<8x512xf32, #tpu.memory_space<vmem>>, vector<8x256xf32>
    tpu.vector_store %arg6[%c0_164, %c128_165], %229 {strides = array<i32>} : memref<8x512xf32, #tpu.memory_space<vmem>>, vector<8x256xf32>,
    %c0_166 = arith.constant 0 : index
    %c111_167 = arith.constant 111 : index
    %231 = vector.load %arg6[%c0_166, %c111_167] : memref<8x512xf32, #tpu.memory_space<vmem>>, vector<8x256xf32>
    %232 = vector.extract_strided_slice %2 {offsets = [0, 0], sizes = [1, 256], strides = [1, 1]} : vector<3x256xf32> to vector<1x256xf32>
    %233 = vector.broadcast %232 : vector<1x256xf32> to vector<8x256xf32>
    %234 = arith.mulf %231, %233 : vector<8x256xf32>
    %c0_168 = arith.constant 0 : index
    %c112_169 = arith.constant 112 : index
    %235 = vector.load %arg6[%c0_168, %c112_169] : memref<8x512xf32, #tpu.memory_space<vmem>>, vector<8x256xf32>
    %c0_170 = arith.constant 0 : index
    %c113_171 = arith.constant 113 : index
    %236 = vector.load %arg6[%c0_170, %c113_171] : memref<8x512xf32, #tpu.memory_space<vmem>>, vector<8x256xf32>
    %237 = vector.extract_strided_slice %2 {offsets = [2, 0], sizes = [1, 256], strides = [1, 1]} : vector<3x256xf32> to vector<1x256xf32>
    %238 = vector.broadcast %237 : vector<1x256xf32> to vector<8x256xf32>
    %239 = arith.mulf %236, %238 : vector<8x256xf32>
    %c0_172 = arith.constant 0 : index
    %c127_173 = arith.constant 127 : index
    %240 = vector.load %arg6[%c0_172, %c127_173] : memref<8x512xf32, #tpu.memory_space<vmem>>, vector<8x256xf32>
    %241 = vector.extract_strided_slice %2 {offsets = [0, 0], sizes = [1, 256], strides = [1, 1]} : vector<3x256xf32> to vector<1x256xf32>
    %242 = vector.broadcast %241 : vector<1x256xf32> to vector<8x256xf32>
    %243 = arith.mulf %240, %242 : vector<8x256xf32>
    %c0_174 = arith.constant 0 : index
    %c128_175 = arith.constant 128 : index
    %244 = vector.load %arg6[%c0_174, %c128_175] : memref<8x512xf32, #tpu.memory_space<vmem>>, vector<8x256xf32>
    %c0_176 = arith.constant 0 : index
    %c129_177 = arith.constant 129 : index
    %245 = vector.load %arg6[%c0_176, %c129_177] : memref<8x512xf32, #tpu.memory_space<vmem>>, vector<8x256xf32>
    %246 = vector.extract_strided_slice %2 {offsets = [2, 0], sizes = [1, 256], strides = [1, 1]} : vector<3x256xf32> to vector<1x256xf32>
    %247 = vector.broadcast %246 : vector<1x256xf32> to vector<8x256xf32>
    %248 = arith.mulf %245, %247 : vector<8x256xf32>
    %c0_178 = arith.constant 0 : index
    %c143_179 = arith.constant 143 : index
    %249 = vector.load %arg6[%c0_178, %c143_179] : memref<8x512xf32, #tpu.memory_space<vmem>>, vector<8x256xf32>
    %250 = vector.extract_strided_slice %2 {offsets = [0, 0], sizes = [1, 256], strides = [1, 1]} : vector<3x256xf32> to vector<1x256xf32>
    %251 = vector.broadcast %250 : vector<1x256xf32> to vector<8x256xf32>
    %252 = arith.mulf %249, %251 : vector<8x256xf32>
    %c0_180 = arith.constant 0 : index
    %c144_181 = arith.constant 144 : index
    %253 = vector.load %arg6[%c0_180, %c144_181] : memref<8x512xf32, #tpu.memory_space<vmem>>, vector<8x256xf32>
    %c0_182 = arith.constant 0 : index
    %c145_183 = arith.constant 145 : index
    %254 = vector.load %arg6[%c0_182, %c145_183] : memref<8x512xf32, #tpu.memory_space<vmem>>, vector<8x256xf32>
    %255 = vector.extract_strided_slice %2 {offsets = [2, 0], sizes = [1, 256], strides = [1, 1]} : vector<3x256xf32> to vector<1x256xf32>
    %256 = vector.broadcast %255 : vector<1x256xf32> to vector<8x256xf32>
    %257 = arith.mulf %254, %256 : vector<8x256xf32>
    %258 = tpu.concatenate %234, %235, %239, %243, %244, %248, %252, %253, %257 in 0 : vector<8x256xf32>, vector<8x256xf32>, vector<8x256xf32>, vector<8x256xf32>, vector<8x256xf32>, vector<8x256xf32>, vector<8x256xf32>, vector<8x256xf32>, vector<8x256xf32> -> vector<72x256xf32>
    %c2_184 = arith.constant 2 : index
    %c0_185 = arith.constant 0 : index
    %c0_186 = arith.constant 0 : index
    %259 = vector.load %arg2[%c2_184, %c0_185, %c0_186] : memref<4x8x72xf32, #tpu.memory_space<vmem>>, vector<1x8x72xf32>
    %260 = vector.shape_cast %259 : vector<1x8x72xf32> to vector<8x72xf32>
    %cst_187 = arith.constant dense<0.000000e+00> : vector<8x256xf32>
    %261 = tpu.matmul %260, %258, %cst_187 {dimension_numbers = #tpu.dot_dimension_numbers<[1], [0], [0], [1], [0, 0, 1, 1], [], []>} : vector<8x72xf32>, vector<72x256xf32>, vector<8x256xf32> -> vector<8x256xf32>
    %c2_188 = arith.constant 2 : index
    %c0_189 = arith.constant 0 : index
    %c0_190 = arith.constant 0 : index
    %262 = vector.load %arg3[%c2_188, %c0_189, %c0_190] : memref<4x8x1xf32, #tpu.memory_space<vmem>>, vector<1x8x1xf32>
    %263 = vector.shape_cast %262 : vector<1x8x1xf32> to vector<8x1xf32>
    %264 = vector.broadcast %263 : vector<8x1xf32> to vector<8x256xf32>
    %265 = arith.addf %261, %264 : vector<8x256xf32>
    %c0_191 = arith.constant 0 : index
    %c128_192 = arith.constant 128 : index
    %266 = vector.load %arg6[%c0_191, %c128_192] : memref<8x512xf32, #tpu.memory_space<vmem>>, vector<8x256xf32>
    tpu.vector_store %arg6[%c0_191, %c128_192], %265 {strides = array<i32>} : memref<8x512xf32, #tpu.memory_space<vmem>>, vector<8x256xf32>,
    %c0_193 = arith.constant 0 : index
    %c111_194 = arith.constant 111 : index
    %267 = vector.load %arg6[%c0_193, %c111_194] : memref<8x512xf32, #tpu.memory_space<vmem>>, vector<8x256xf32>
    %268 = vector.extract_strided_slice %2 {offsets = [0, 0], sizes = [1, 256], strides = [1, 1]} : vector<3x256xf32> to vector<1x256xf32>
    %269 = vector.broadcast %268 : vector<1x256xf32> to vector<8x256xf32>
    %270 = arith.mulf %267, %269 : vector<8x256xf32>
    %c0_195 = arith.constant 0 : index
    %c112_196 = arith.constant 112 : index
    %271 = vector.load %arg6[%c0_195, %c112_196] : memref<8x512xf32, #tpu.memory_space<vmem>>, vector<8x256xf32>
    %c0_197 = arith.constant 0 : index
    %c113_198 = arith.constant 113 : index
    %272 = vector.load %arg6[%c0_197, %c113_198] : memref<8x512xf32, #tpu.memory_space<vmem>>, vector<8x256xf32>
    %273 = vector.extract_strided_slice %2 {offsets = [2, 0], sizes = [1, 256], strides = [1, 1]} : vector<3x256xf32> to vector<1x256xf32>
    %274 = vector.broadcast %273 : vector<1x256xf32> to vector<8x256xf32>
    %275 = arith.mulf %272, %274 : vector<8x256xf32>
    %c0_199 = arith.constant 0 : index
    %c127_200 = arith.constant 127 : index
    %276 = vector.load %arg6[%c0_199, %c127_200] : memref<8x512xf32, #tpu.memory_space<vmem>>, vector<8x256xf32>
    %277 = vector.extract_strided_slice %2 {offsets = [0, 0], sizes = [1, 256], strides = [1, 1]} : vector<3x256xf32> to vector<1x256xf32>
    %278 = vector.broadcast %277 : vector<1x256xf32> to vector<8x256xf32>
    %279 = arith.mulf %276, %278 : vector<8x256xf32>
    %c0_201 = arith.constant 0 : index
    %c128_202 = arith.constant 128 : index
    %280 = vector.load %arg6[%c0_201, %c128_202] : memref<8x512xf32, #tpu.memory_space<vmem>>, vector<8x256xf32>
    %c0_203 = arith.constant 0 : index
    %c129_204 = arith.constant 129 : index
    %281 = vector.load %arg6[%c0_203, %c129_204] : memref<8x512xf32, #tpu.memory_space<vmem>>, vector<8x256xf32>
    %282 = vector.extract_strided_slice %2 {offsets = [2, 0], sizes = [1, 256], strides = [1, 1]} : vector<3x256xf32> to vector<1x256xf32>
    %283 = vector.broadcast %282 : vector<1x256xf32> to vector<8x256xf32>
    %284 = arith.mulf %281, %283 : vector<8x256xf32>
    %c0_205 = arith.constant 0 : index
    %c143_206 = arith.constant 143 : index
    %285 = vector.load %arg6[%c0_205, %c143_206] : memref<8x512xf32, #tpu.memory_space<vmem>>, vector<8x256xf32>
    %286 = vector.extract_strided_slice %2 {offsets = [0, 0], sizes = [1, 256], strides = [1, 1]} : vector<3x256xf32> to vector<1x256xf32>
    %287 = vector.broadcast %286 : vector<1x256xf32> to vector<8x256xf32>
    %288 = arith.mulf %285, %287 : vector<8x256xf32>
    %c0_207 = arith.constant 0 : index
    %c144_208 = arith.constant 144 : index
    %289 = vector.load %arg6[%c0_207, %c144_208] : memref<8x512xf32, #tpu.memory_space<vmem>>, vector<8x256xf32>
    %c0_209 = arith.constant 0 : index
    %c145_210 = arith.constant 145 : index
    %290 = vector.load %arg6[%c0_209, %c145_210] : memref<8x512xf32, #tpu.memory_space<vmem>>, vector<8x256xf32>
    %291 = vector.extract_strided_slice %2 {offsets = [2, 0], sizes = [1, 256], strides = [1, 1]} : vector<3x256xf32> to vector<1x256xf32>
    %292 = vector.broadcast %291 : vector<1x256xf32> to vector<8x256xf32>
    %293 = arith.mulf %290, %292 : vector<8x256xf32>
    %294 = tpu.concatenate %270, %271, %275, %279, %280, %284, %288, %289, %293 in 0 : vector<8x256xf32>, vector<8x256xf32>, vector<8x256xf32>, vector<8x256xf32>, vector<8x256xf32>, vector<8x256xf32>, vector<8x256xf32>, vector<8x256xf32>, vector<8x256xf32> -> vector<72x256xf32>
    %c3_211 = arith.constant 3 : index
    %c0_212 = arith.constant 0 : index
    %c0_213 = arith.constant 0 : index
    %295 = vector.load %arg2[%c3_211, %c0_212, %c0_213] : memref<4x8x72xf32, #tpu.memory_space<vmem>>, vector<1x8x72xf32>
    %296 = vector.shape_cast %295 : vector<1x8x72xf32> to vector<8x72xf32>
    %cst_214 = arith.constant dense<0.000000e+00> : vector<8x256xf32>
    %297 = tpu.matmul %296, %294, %cst_214 {dimension_numbers = #tpu.dot_dimension_numbers<[1], [0], [0], [1], [0, 0, 1, 1], [], []>} : vector<8x72xf32>, vector<72x256xf32>, vector<8x256xf32> -> vector<8x256xf32>
    %c3_215 = arith.constant 3 : index
    %c0_216 = arith.constant 0 : index
    %c0_217 = arith.constant 0 : index
    %298 = vector.load %arg3[%c3_215, %c0_216, %c0_217] : memref<4x8x1xf32, #tpu.memory_space<vmem>>, vector<1x8x1xf32>
    %299 = vector.shape_cast %298 : vector<1x8x1xf32> to vector<8x1xf32>
    %300 = vector.broadcast %299 : vector<8x1xf32> to vector<8x256xf32>
    %301 = arith.addf %297, %300 : vector<8x256xf32>
    %c1_218 = arith.constant 1 : index
    %c0_219 = arith.constant 0 : index
    %c0_220 = arith.constant 0 : index
    %302 = vector.load %arg5[%c1_218, %c0_219, %c0_220] : memref<2x8x256xf32, #tpu.memory_space<vmem>>, vector<1x8x256xf32>
    %303 = vector.shape_cast %302 : vector<1x8x256xf32> to vector<8x256xf32>
    %304 = vector.shape_cast %301 : vector<8x256xf32> to vector<1x8x256xf32>
    tpu.vector_store %arg5[%c1_218, %c0_219, %c0_220], %304 {strides = array<i32>} : memref<2x8x256xf32, #tpu.memory_space<vmem>>, vector<1x8x256xf32>,
    return
  }
  func.func @transform_0(%arg0: i32) -> (i32, i32, i32) {
    %c0_i32 = arith.constant 0 : i32
    %c0_i32_0 = arith.constant 0 : i32
    %c0_i32_1 = arith.constant 0 : i32
    return %arg0, %c0_i32, %c0_i32_0 : i32, i32, i32
  }
  func.func @transform_1(%arg0: i32) -> (i32, i32, i32) {
    %c0_i32 = arith.constant 0 : i32
    %c0_i32_0 = arith.constant 0 : i32
    %c0_i32_1 = arith.constant 0 : i32
    %c0_i32_2 = arith.constant 0 : i32
    return %c0_i32, %c0_i32_0, %c0_i32_1 : i32, i32, i32
  }
  func.func @transform_2(%arg0: i32) -> (i32, i32, i32) {
    %c0_i32 = arith.constant 0 : i32
    %c0_i32_0 = arith.constant 0 : i32
    %c0_i32_1 = arith.constant 0 : i32
    %c0_i32_2 = arith.constant 0 : i32
    return %c0_i32, %c0_i32_0, %c0_i32_1 : i32, i32, i32
  }
  func.func @transform_3(%arg0: i32) -> (i32, i32) {
    %c0_i32 = arith.constant 0 : i32
    %c0_i32_0 = arith.constant 0 : i32
    %c0_i32_1 = arith.constant 0 : i32
    return %c0_i32, %c0_i32_0 : i32, i32
  }
  func.func @transform_4(%arg0: i32) -> (i32, i32, i32) {
    %c0_i32 = arith.constant 0 : i32
    %c0_i32_0 = arith.constant 0 : i32
    %c0_i32_1 = arith.constant 0 : i32
    return %arg0, %c0_i32, %c0_i32_0 : i32, i32, i32
  }
}

</mosaic_0001>

<bundles_post_ra>
// kernel: tpu_custom_call.1
= control target key start
LH: loop header
LB: loop body
LE: loop exit
PB: predicated region body
PF: predicated region fallthrough
CT: control target
= control target key end

     0   :  { %9 = vsyncpa [#allocation4], 0  ;;  %s4428_s0 = inlined_call_operand.vmem [shape: f32[2,8,256], index: 0, kind: input, shape index: {}]   ;;  %s4429_s1 = inlined_call_operand.hbm [shape: f32[4,8,72], index: 1, kind: input, shape index: {}]   ;;  %s4430_s2 = inlined_call_operand.vmem [shape: f32[4,8,1], index: 2, kind: input, shape index: {}]   ;;  %s4431_s3 = inlined_call_operand.hbm [shape: f32[3,256], index: 3, kind: input, shape index: {}]   ;;  %s4432_s4 = inlined_call_operand.hbm [shape: f32[2,8,256], index: 4, kind: output, shape index: {}]  }
   0x1   :  { %10 = vsyncpa [#allocation7], 0 }
   0x2   :  { %11 = vsyncpa [#allocation5], 0  ;;  %s18_s17 = sshll.u32 %s4429_s1, 4  ;;  %s3225_s18 = smov [#allocation3]   ;;  %s19_s17 = int_to_ptr.hbm [resolvable:$true] %s18_s17 }
   0x3   :  { %s20_s19 = sshll.u32 %s3225_s18, 4  ;;  %s34_s22 = sshll.u32 %s4431_s3, 4  ;;  %s21_s19 = int_to_ptr.vmem [resolvable:$true] %s20_s19  ;;  %s35_s22 = int_to_ptr.hbm [resolvable:$true] %s34_s22 }
   0x4   :  { %s3226_s23 = smov 128   ;;  %s3227_s24 = smov 8  }
   0x5   :  { %26 = dma.hbm_to_vmem [thread:$0]  %s19_s17, 512, %s21_s19, [#allocation4], %s3226_s23, %s3226_s23, %s3227_s24  }
   0x6   :  { %s3228_s25 = smov [#allocation6]  }
   0x7   :  { %s36_s26 = sshll.u32 %s3228_s25, 4  ;;  %s37_s26 = int_to_ptr.vmem [resolvable:$true] %s36_s26 }
   0x8   :  { %39 = dma.hbm_to_vmem [thread:$0]  %s35_s22, 128, %s37_s26, [#allocation7]  }
   0x9   :  { %3219 = dma.done.wait [#allocation4], 512  }
   0xa   :  { %3220 = vsyncadd [#allocation4], 4294966784 }
   0xb   :  { %3221 = dma.done.wait [#allocation7], 128  }
   0xc   :  { %3222 = vsyncadd [#allocation7], 4294967168  ;;  %v52_v0 = vld [vmem:[#allocation6] sm:$0x77]  ;;  %s3229_s1 = smov 17   ;;  %s3230_s3 = smov 15  }
   0xd   :  { %v81_v1 = vperm.slane %v52_v0, 2  ;;  %v61_v2 = vperm.slane %v52_v0, 0  ;;  %v82_v5 = vperm.slane %v52_v0, 6  ;;  %v62_v6 = vperm.slane %v52_v0, 4  ;;  %s3231_s27 = smov 1   ;;  %s3232_s28 = smov 127  }
   0xe   :  { %s3233_s29 = smov 113   ;;  %v3292_v9 = vld [vmem:[%s4428_s0] sm:$0xff]  ;;  %v3297_v10 = vld [vmem:[%s4428_s0 + $0x8] sm:$0xff]  ;;  %s3234_s8 = smov 95   ;;  %v3236_v12 = vmov 0.0   ;;  %vm132_vm0 = vcmask 121856  }
   0xf   :  { %v85_v3 = vperm.slane %v81_v1, 2  ;;  %v3277_v4 = vperm.slane %v61_v2, 0  ;;  %v86_v7 = vperm.slane %v82_v5, 2  ;;  %v3281_v8 = vperm.slane %v62_v6, 0  ;;  %s3235_s9 = smov 111   ;;  %s3237_s10 = smov 94  }
  0x10   :  { %v2224_v11 = vpack.i.bf16 %v3297_v10, %v3292_v9  ;;  %s3238_s11 = smov 96   ;;  %s3239_s12 = smov 110   ;;  %vm93_vm1 = vcmask 924672   ;;  %vm144_vm2 = vcmask 138240   ;;  %vm120_vm3 = vcmask 7168  }
  0x11   :  { %140 = vrot.lane.b32.xlu0 %v85_v3, %s3229_s1  ;;  %128 = vrot.lane.b32.xlu1 %v3277_v4, %s3230_s3  ;;  %s3240_s13 = smov 126   ;;  %s3241_s14 = smov 112   ;;  %vm105_vm4 = vcmask 1039360   ;;  %v2259_v48 = vpack.i.bf16 %v3292_v9, %v3236_v12  ;;  %vm225_vm5 = vcmask 777216   ;;  %vm73_vm6 = vcmask 908288  }
  0x12   :  { %116 = vrot.lane.b32.xlu2 %v85_v3, %s3231_s27  ;;  %v3242_v1 = vmov 0   ;;  %vm237_vm7 = vcmask 769024   ;;  %vm213_vm8 = vcmask 785408   ;;  %vm201_vm9 = vcmask 900096   ;;  %s2165_s7 = sshll.u32 %s4432_s4, 4  ;;  %s2166_s7 = int_to_ptr.hbm [resolvable:$true] %s2165_s7 }
  0x13   :  { %2329 = vset.pattern.permute.xlu2 %v3242_v1  ;;  %2685 = vset.pattern.permute.xlu0 %v3242_v1  ;;  %vm172_vm10 = vcmask 1031168   ;;  %vm184_vm11 = vcmask 916480   ;;  %vm340_vm12 = vcmask 588800  }
  0x14   :  { %2936 = vset.pattern.permute.xlu1 %v3242_v1 }
  0x19   :  { %142 = vrot.lane.b32.xlu0 %v86_v7, %s3229_s1  ;;  %130 = vrot.lane.b32.xlu1 %v3281_v8, %s3230_s3 }
  0x1a   :  { %118 = vrot.lane.b32.xlu2 %v86_v7, %s3231_s27 }
  0x21   :  { %101 = vrot.lane.b32.xlu0 %v3277_v4, %s3232_s28  ;;  %103 = vrot.lane.b32.xlu1 %v3281_v8, %s3232_s28 }
  0x22   :  { %89 = vrot.lane.b32.xlu2 %v85_v3, %s3233_s29 }
  0x29   :  { %91 = vrot.lane.b32.xlu0 %v86_v7, %s3233_s29  ;;  %223 = vrot.lane.b32.xlu1 %v3236_v12, %s3234_s8 }
  0x31   :  { %2225 = vrot.lane.b32.xlu0 %v2224_v11, %s3234_s8 }
  0x39   :  { %2230 = vrot.lane.b32.xlu0 %v2224_v11, %s3235_s9 }
  0x6c   :  { %v3309_v15 = vpop.permute.xlu2 %116 }
  0x6d   :  { %v125_v41 = vmul.f32 %v3309_v15, %v3292_v9 }
  0x74   :  { %v119_v20 = vpop.permute.xlu2 %118 }
  0x75   :  { %v3319_v21 = vmul.f32 0.0, %v119_v20  ;;  %v3358_v40 = vsel %vm120_vm3, %v3309_v15, %v119_v20 }
  0x76   :  { %v126_v42 = vmul.f32 %v3358_v40, %v3297_v10 }
  0x78   :  { %v2244_v43 = vpack.i.bf16 %v126_v42, %v125_v41 }
  0x7c   :  { %v90_v23 = vpop.permute.xlu2 %89 }
  0x7d   :  { %v3330_v27 = vmul.f32 0.0, %v90_v23 }
  0x83   :  { %v3305_v13 = vpop.permute.xlu0 %140  ;;  %v3307_v14 = vpop.permute.xlu1 %128 }
  0x84   :  { %v137_v33 = vmul.f32 %v3307_v14, %v3292_v9  ;;  %v149_v37 = vmul.f32 %v3305_v13, %v3292_v9 }
  0x8b   :  { %v143_v16 = vpop.permute.xlu0 %142  ;;  %v131_v17 = vpop.permute.xlu1 %130 }
  0x8c   :  { %v3311_v18 = vmul.f32 0.0, %v143_v16  ;;  %v3313_v19 = vmul.f32 0.0, %v131_v17  ;;  %v3328_v26 = vsel %vm132_vm0, %v3307_v14, %v131_v17  ;;  %v3341_v31 = vsel %vm144_vm2, %v3305_v13, %v143_v16 }
  0x8d   :  { %v138_v34 = vmul.f32 %v3328_v26, %v3297_v10  ;;  %v150_v36 = vmul.f32 %v3341_v31, %v3297_v10 }
  0x8e   :  { %235 = vrot.lane.b32.xlu2 %v3311_v18, %s3237_s10  ;;  %211 = vrot.lane.b32.xlu0 %v3313_v19, %s3238_s11 }
  0x8f   :  { %v2239_v38 = vpack.i.bf16 %v138_v34, %v137_v33  ;;  %v2234_v39 = vpack.i.bf16 %v150_v36, %v149_v37 }
  0x93   :  { %v102_v22 = vpop.permute.xlu0 %101  ;;  %v3323_v24 = vpop.permute.xlu1 %103 }
  0x94   :  { %v112_v25 = vmul.f32 %v3323_v24, %v3297_v10  ;;  %v3370_v44 = vsel %vm105_vm4, %v102_v22, %v3323_v24  ;;  %v3375_v45 = vmul.f32 0.0, %v102_v22 }
  0x95   :  { %v111_v46 = vmul.f32 %v3370_v44, %v3292_v9 }
  0x96   :  { %199 = vrot.lane.b32.xlu2 %v3319_v21, %s3239_s12 }
  0x97   :  { %v2249_v47 = vpack.i.bf16 %v111_v46, %v3375_v45 }
  0x9b   :  { %v3332_v28 = vpop.permute.xlu0 %91  ;;  %v224_v53 = vpop.permute.xlu1 %223 }
  0x9c   :  { %v100_v29 = vmul.f32 %v3332_v28, %v3297_v10  ;;  %v3337_v30 = vsel %vm93_vm1, %v90_v23, %v3332_v28 }
  0x9d   :  { %v99_v32 = vmul.f32 %v3337_v30, %v3292_v9 }
  0x9e   :  { %170 = vrot.lane.b32.xlu1 %v100_v29, %s3240_s13  ;;  %182 = vrot.lane.b32.xlu2 %v112_v25, %s3241_s14 }
  0x9f   :  { %v2254_v35 = vpack.i.bf16 %v99_v32, %v3330_v27 }
  0xa1   :  { %2255 = vrot.lane.b32.xlu0 %v2254_v35, %s3240_s13 }
  0xa3   :  { %v3386_v49 = vpop.permute.xlu0 %2225 }
  0xa4   :  { %v2228_v50 = vunpack.i.h.bf16 %v3386_v49  ;;  %v2227_v51 = vunpack.i.l.bf16 %v3386_v49 }
  0xa6   :  { %2235 = vrot.lane.b32.xlu1 %v2234_v39, %s3237_s10  ;;  %2240 = vrot.lane.b32.xlu2 %v2239_v38, %s3238_s11  ;;  %v226_v52 = vsel %vm225_vm5, %v2227_v51, %v2228_v50  ;;  %v227_v54 = vsel %vm225_vm5, %v2228_v50, %v224_v53 }
  0xa7   :  { %v2264_v55 = vpack.i.bf16 %v227_v54, %v226_v52 }
  0xa9   :  { %71 = vrot.lane.b32.xlu0 %v3281_v8, %s3235_s9 }
  0xab   :  { %v3395_v56 = vpop.permute.xlu0 %2230 }
  0xac   :  { %v2233_v57 = vunpack.i.h.bf16 %v3395_v56  ;;  %v2232_v58 = vunpack.i.l.bf16 %v3395_v56 }
  0xae   :  { %2245 = vrot.lane.b32.xlu1 %v2244_v43, %s3239_s12  ;;  %69 = vrot.lane.b32.xlu2 %v3277_v4, %s3235_s9  ;;  %v191_v59 = vsel %vm73_vm6, %v2232_v58, %v2233_v57 }
  0xaf   :  { %v2269_v60 = vpack.i.bf16 %v191_v59, %v2232_v58 }
  0xb1   :  { %2270 = vrot.lane.b32.xlu0 %v2269_v60, %s3229_s1 }
  0xb6   :  { %2250 = vrot.lane.b32.xlu1 %v2249_v47, %s3241_s14  ;;  %159 = vrot.lane.b32.xlu2 %v3297_v10, %s3232_s28 }
  0xbe   :  { %2260 = vrot.lane.b32.xlu1 %v2259_v48, %s3232_s28  ;;  %2265 = vrot.lane.b32.xlu2 %v2264_v55, %s3229_s1 }
  0xe8   :  { %v3403_v61 = vpop.permute.xlu2 %235 }
  0xf0   :  { %v200_v62 = vpop.permute.xlu2 %199 }
  0xf8   :  { %v183_v63 = vpop.permute.xlu2 %182 }
 0x100   :  { %v2241_v5 = vpop.permute.xlu2 %2240  ;;  %v212_v6 = vpop.permute.xlu0 %211 }
 0x101   :  { %v2243_v11 = vunpack.i.h.bf16 %v2241_v5  ;;  %v2242_v16 = vunpack.i.l.bf16 %v2241_v5 }
 0x103   :  { %v214_v23 = vsel %vm213_vm8, %v2242_v16, %v2243_v11 }
 0x104   :  { %v2289_v34 = vpack.i.bf16 %v214_v23, %v2242_v16 }
 0x108   :  { %v70_v37 = vpop.permute.xlu2 %69 }
 0x109   :  { %v3423_v52 = vmul.f32 0.0, %v70_v37 }
 0x110   :  { %v171_v0 = vpop.permute.xlu1 %170  ;;  %v160_v55 = vpop.permute.xlu2 %159 }
 0x113   :  { %v2256_v25 = vpop.permute.xlu0 %2255 }
 0x114   :  { %v2258_v35 = vunpack.i.h.bf16 %v2256_v25  ;;  %v2257_v36 = vunpack.i.l.bf16 %v2256_v25 }
 0x116   :  { %v173_v41 = vsel %vm172_vm10, %v2257_v36, %v2258_v35  ;;  %v174_v42 = vsel %vm172_vm10, %v2258_v35, %v171_v0 }
 0x117   :  { %v2319_v48 = vpack.i.bf16 %v174_v42, %v173_v41 }
 0x118   :  { %v2236_v2 = vpop.permute.xlu1 %2235 }
 0x119   :  { %v2238_v3 = vunpack.i.h.bf16 %v2236_v2  ;;  %v2237_v4 = vunpack.i.l.bf16 %v2236_v2 }
 0x11b   :  { %v238_v7 = vsel %vm237_vm7, %v2237_v4, %v2238_v3  ;;  %v3415_v46 = vpop.permute.xlu0 %71 }
 0x11c   :  { %v2279_v8 = vpack.i.bf16 %v238_v7, %v2237_v4  ;;  %v3421_v50 = vsel %vm73_vm6, %v70_v37, %v3415_v46  ;;  %v241_v4 = vld [vmem:[%s4430_s2] sm:$0xff] }
 0x11d   :  { %v79_v53 = vmul.f32 %v3421_v50, %v3292_v9  ;;  %v239_v9 = vsel %vm237_vm7, %v2238_v3, %v3403_v61 }
 0x11e   :  { %2280 = vrot.lane.b32.xlu0 %v2279_v8, %s3229_s1  ;;  %v2284_v5 = vpack.i.bf16 %v2227_v51, %v239_v9  ;;  %v80_v51 = vmul.f32 %v3415_v46, %v3297_v10 }
 0x120   :  { %v2246_v17 = vpop.permute.xlu1 %2245 }
 0x121   :  { %v2248_v20 = vunpack.i.h.bf16 %v2246_v17  ;;  %v2247_v22 = vunpack.i.l.bf16 %v2246_v17 }
 0x123   :  { %v202_v29 = vsel %vm201_vm9, %v2247_v22, %v2248_v20  ;;  %v203_v32 = vsel %vm201_vm9, %v2248_v20, %v200_v62  ;;  %v2271_v3 = vpop.permute.xlu0 %2270 }
 0x124   :  { %v2299_v33 = vpack.i.bf16 %v203_v32, %v202_v29  ;;  %v2273_v41 = vunpack.i.h.bf16 %v2271_v3  ;;  %v2272_v42 = vunpack.i.l.bf16 %v2271_v3 }
 0x126   :  { %2300 = vrot.lane.b32.xlu2 %v2299_v33, %s3229_s1  ;;  %2290 = vrot.lane.b32.xlu0 %v2289_v34, %s3229_s1 }
 0x128   :  { %v2251_v38 = vpop.permute.xlu1 %2250 }
 0x129   :  { %v2253_v39 = vunpack.i.h.bf16 %v2251_v38  ;;  %v2252_v8 = vunpack.i.l.bf16 %v2251_v38 }
 0x12b   :  { %v186_v43 = vsel %vm184_vm11, %v2253_v39, %v183_v63  ;;  %v185_v61 = vsel %vm184_vm11, %v2252_v8, %v2253_v39 }
 0x12c   :  { %v2309_v47 = vpack.i.bf16 %v183_v63, %v186_v43  ;;  %v2324_v63 = vpack.i.bf16 %v79_v53, %v3423_v52  ;;  %v2304_v49 = vpack.i.bf16 %v185_v61, %v2233_v57  ;;  %v2266_v57 = vpop.permute.xlu2 %2265 }
 0x12d   :  { %v2268_v10 = vunpack.i.h.bf16 %v2266_v57  ;;  %v2267_v23 = vunpack.i.l.bf16 %v2266_v57 }
 0x12e   :  { %2310 = vrot.lane.b32.xlu2 %v2309_v47, %s3229_s1  ;;  %2320 = vrot.lane.b32.xlu0 %v2319_v48, %s3229_s1 }
 0x12f   :  { %v319_v38 = vsel %vm144_vm2, %v2267_v23, %v2268_v10 }
 0x130   :  { %v2261_v54 = vpop.permute.xlu1 %2260 }
 0x131   :  { %v2263_v58 = vunpack.i.h.bf16 %v2261_v54  ;;  %v2262_v59 = vunpack.i.l.bf16 %v2261_v54 }
 0x133   :  { %v162_v60 = vsel %vm105_vm4, %v2263_v58, %v160_v55  ;;  %v161_v62 = vsel %vm105_vm4, %v2262_v59, %v2263_v58 }
 0x134   :  { %v2314_v1 = vpack.i.bf16 %v160_v55, %v162_v60  ;;  %v2274_v2 = vpack.i.bf16 %v161_v62, %v171_v0  ;;  %v215_v0 = vsel %vm213_vm8, %v2243_v11, %v212_v6  ;;  %v312_v60 = vsel %vm144_vm2, %v2272_v42, %v2273_v41 }
 0x135   :  { %v2294_v7 = vpack.i.bf16 %v2247_v22, %v215_v0 }
 0x136   :  { %2275 = vrot.lane.b32.xlu1 %v2274_v2, %s3229_s1  ;;  %2315 = vrot.lane.b32.xlu2 %v2314_v1, %s3229_s1 }
 0x137   :  { %2325 = vrot.lane.b32.xlu0 %v2324_v63, %s3229_s1 }
 0x13e   :  { %244 = vperm.xlu2 %2329, %v241_v4   ;;  %2285 = vrot.lane.b32.xlu1 %v2284_v5, %s3229_s1 }
 0x13f   :  { %479 = vrot.lane.b32.xlu0 %v3236_v12, %s3234_s8 }
 0x146   :  { %468 = vrot.lane.b32.xlu2 %v3313_v19, %s3238_s11  ;;  %2295 = vrot.lane.b32.xlu1 %v2294_v7, %s3229_s1 }
 0x14e   :  { %2305 = vrot.lane.b32.xlu1 %v2304_v49, %s3229_s1 }
 0x156   :  { %254 = vrot.lane.b32.xlu1 %v80_v51, %s3229_s1 }
 0x15e   :  { %490 = vrot.lane.b32.xlu1 %v3311_v18, %s3237_s10 }
 0x166   :  { %457 = vrot.lane.b32.xlu1 %v3319_v21, %s3239_s12 }
 0x180   :  { %v2301_v20 = vpop.permute.xlu2 %2300 }
 0x181   :  { %v2303_v48 = vunpack.i.h.bf16 %v2301_v20  ;;  %v2302_v53 = vunpack.i.l.bf16 %v2301_v20 }
 0x183   :  { %v315_v62 = vsel %vm144_vm2, %v2302_v53, %v2303_v48 }
 0x188   :  { %v2311_v39 = vpop.permute.xlu2 %2310 }
 0x189   :  { %v2313_v63 = vunpack.i.h.bf16 %v2311_v39  ;;  %v2312_v1 = vunpack.i.l.bf16 %v2311_v39 }
 0x18b   :  { %v311_v20 = vsel %vm144_vm2, %v2312_v1, %v2313_v63 }
 0x190   :  { %v2281_v6 = vpop.permute.xlu0 %2280  ;;  %v2316_v8 = vpop.permute.xlu2 %2315 }
 0x191   :  { %v2283_v11 = vunpack.i.h.bf16 %v2281_v6  ;;  %v2282_v16 = vunpack.i.l.bf16 %v2281_v6 }
 0x193   :  { %v320_v56 = vsel %vm144_vm2, %v2282_v16, %v2283_v11  ;;  %v2318_v16 = vunpack.i.h.bf16 %v2316_v8 }
 0x194   :  { %351 = vmatpush.msra.mxu0 %v320_v56  ;;  %v2317_v56 = vunpack.i.l.bf16 %v2316_v8 }
 0x198   :  { %v2291_v22 = vpop.permute.xlu0 %2290 }
 0x199   :  { %v2293_v29 = vunpack.i.h.bf16 %v2291_v22  ;;  %v2292_v32 = vunpack.i.l.bf16 %v2291_v22 }
 0x19b   :  { %v316_v37 = vsel %vm144_vm2, %v2292_v32, %v2293_v29 }
 0x1a0   :  { %v2321_v43 = vpop.permute.xlu0 %2320 }
 0x1a1   :  { %v2323_v4 = vunpack.i.h.bf16 %v2321_v43  ;;  %v2322_v5 = vunpack.i.l.bf16 %v2321_v43 }
 0x1a3   :  { %v308_v57 = vsel %vm144_vm2, %v2322_v5, %v2323_v4 }
 0x1a8   :  { %v2276_v17 = vpop.permute.xlu1 %2275 }
 0x1a9   :  { %v2326_v9 = vpop.permute.xlu0 %2325  ;;  %v2278_v61 = vunpack.i.h.bf16 %v2276_v17  ;;  %v2277_v49 = vunpack.i.l.bf16 %v2276_v17 }
 0x1aa   :  { %v2328_v6 = vunpack.i.h.bf16 %v2326_v9 }
 0x1ab   :  { %v306_v22 = vsel %vm144_vm2, %v2278_v61, %v2317_v56  ;;  %v309_v17 = vsel %vm144_vm2, %v2323_v4, %v2277_v49 }
 0x1b0   :  { %v2286_v25 = vpop.permute.xlu1 %2285 }
 0x1b1   :  { %v2288_v33 = vunpack.i.h.bf16 %v2286_v25  ;;  %v2287_v34 = vunpack.i.l.bf16 %v2286_v25  ;;  %v240_v25 = vld [vmem:[#allocation3] sm:$0xff]  ;;  %v480_v49 = vpop.permute.xlu0 %479 }
 0x1b3   :  { %v318_v35 = vsel %vm144_vm2, %v2288_v33, %v2267_v23  ;;  %v321_v36 = vsel %vm144_vm2, %v2283_v11, %v2287_v34  ;;  %v2327_v11 = vunpack.i.l.bf16 %v2326_v9  ;;  %v245_v33 = vpop.permute.xlu2 %244 }
 0x1b4   :  { %352 = vmatpush.msra.mxu0 %v318_v35  ;;  %371 = vmatpush.msra.mxu1 %v321_v36 }
 0x1b5   :  { %v304_v10 = vsel %vm144_vm2, %v2327_v11, %v2328_v6 }
 0x1b6   :  { %353 = vmatpush.msra.mxu0 %v316_v37  ;;  %372 = vmatpush.msra.mxu1 %v319_v38 }
 0x1b8   :  { %v2296_v47 = vpop.permute.xlu1 %2295 }
 0x1b9   :  { %v2298_v54 = vunpack.i.h.bf16 %v2296_v47  ;;  %v2297_v55 = vunpack.i.l.bf16 %v2296_v47 }
 0x1bb   :  { %v314_v58 = vsel %vm144_vm2, %v2298_v54, %v2302_v53  ;;  %v317_v59 = vsel %vm144_vm2, %v2293_v29, %v2297_v55  ;;  %v307_v29 = vsel %vm144_vm2, %v2317_v56, %v2318_v16  ;;  %v3522_v8 = vpop.permute.xlu2 %468 }
 0x1bc   :  { %354 = vmatpush.msra.mxu0 %v314_v58  ;;  %373 = vmatpush.msra.mxu1 %v317_v59 }
 0x1be   :  { %355 = vmatpush.msra.mxu0 %v312_v60  ;;  %374 = vmatpush.msra.mxu1 %v315_v62 }
 0x1c0   :  { %v2306_v2 = vpop.permute.xlu1 %2305 }
 0x1c1   :  { %v2308_v0 = vunpack.i.h.bf16 %v2306_v2  ;;  %v2307_v7 = vunpack.i.l.bf16 %v2306_v2 }
 0x1c3   :  { %v310_v51 = vsel %vm144_vm2, %v2308_v0, %v2312_v1  ;;  %v313_v3 = vsel %vm144_vm2, %v2273_v41, %v2307_v7 }
 0x1c4   :  { %356 = vmatpush.msra.mxu0 %v310_v51  ;;  %375 = vmatpush.msra.mxu1 %v313_v3 }
 0x1c6   :  { %357 = vmatpush.msra.mxu0 %v308_v57  ;;  %376 = vmatpush.msra.mxu1 %v311_v20 }
 0x1c8   :  { %v255_v23 = vpop.permute.xlu1 %254  ;;  %358 = vmatpush.msra.mxu0 %v306_v22  ;;  %377 = vmatpush.msra.mxu1 %v309_v17 }
 0x1c9   :  { %v305_v32 = vsel %vm144_vm2, %v2328_v6, %v255_v23 }
 0x1ca   :  { %359 = vmatpush.msra.mxu0 %v304_v10  ;;  %378 = vmatpush.msra.mxu1 %v307_v29 }
 0x1cb   :  { %2179 = vmatmul.msk.f32.vlgmr.msra.gmra.mxu0 %vm340_vm12, %v240_v25 }
 0x1cc   :  { %379 = vmatpush.msra.mxu1 %v305_v32 }
 0x1cd   :  { %2180 = vmatmul.msk.f32.vlgmr.msra.gmra.mxu1 %vm340_vm12, %v240_v25 }
 0x1d0   :  { %v491_v56 = vpop.permute.xlu1 %490 }
 0x1d8   :  { %v458_v23 = vpop.permute.xlu1 %457 }
 0x248   :  { %v361_v34 = vpop.f32.mrf.mxu0 }
 0x249   :  { %v362_v35 = vadd.f32 %v361_v34, %v245_v33 }
 0x24a   :  { %v381_v36 = vpop.f32.mrf.mxu1 }
 0x24b   :  { %v3478_v37 = vmax.f32 %v362_v35, 0.0  ;;  %v382_v38 = vadd.f32 %v381_v36, %v245_v33 }
 0x24d   :  { %v3480_v39 = vmax.f32 %v382_v38, 0.0  ;;  %v409_v41 = vmul.f32 %v3478_v37, %v3305_v13  ;;  %v406_v47 = vmul.f32 %v3478_v37, %v3307_v14  ;;  %v403_v59 = vmul.f32 %v3478_v37, %v3309_v15 }
 0x24e   :  { %v395_v63 = vmul.f32 %v3478_v37, %v3337_v30  ;;  %v398_v1 = vmul.f32 %v3478_v37, %v3370_v44  ;;  %v2375_v9 = vpack.i.bf16 %v3478_v37, %v3236_v12 }
 0x24f   :  { %v2330_v42 = vpack.i.bf16 %v3480_v39, %v3478_v37  ;;  %v410_v43 = vmul.f32 %v3480_v39, %v3341_v31  ;;  %v407_v48 = vmul.f32 %v3480_v39, %v3328_v26  ;;  %v399_v55 = vmul.f32 %v3480_v39, %v3323_v24 }
 0x250   :  { %v404_v58 = vmul.f32 %v3480_v39, %v3358_v40  ;;  %v2365_v2 = vpack.i.bf16 %v395_v63, %v3330_v27  ;;  %v2355_v4 = vpack.i.bf16 %v398_v1, %v3375_v45  ;;  %v396_v5 = vmul.f32 %v3480_v39, %v3332_v28 }
 0x251   :  { %2331 = vrot.lane.b32.xlu2 %v2330_v42, %s3234_s8  ;;  %v2340_v53 = vpack.i.bf16 %v410_v43, %v409_v41  ;;  %v2345_v54 = vpack.i.bf16 %v407_v48, %v406_v47  ;;  %v2360_v60 = vpack.i.bf16 %v3375_v45, %v399_v55  ;;  %v2380_v0 = vpack.i.bf16 0.0, %v3480_v39 }
 0x252   :  { %v2350_v62 = vpack.i.bf16 %v404_v58, %v403_v59  ;;  %v2370_v7 = vpack.i.bf16 %v3330_v27, %v396_v5 }
 0x253   :  { %2341 = vrot.lane.b32.xlu0 %v2340_v53, %s3237_s10  ;;  %2346 = vrot.lane.b32.xlu1 %v2345_v54, %s3238_s11 }
 0x259   :  { %2336 = vrot.lane.b32.xlu2 %v2330_v42, %s3235_s9 }
 0x25b   :  { %2361 = vrot.lane.b32.xlu1 %v2360_v60, %s3241_s14  ;;  %2351 = vrot.lane.b32.xlu0 %v2350_v62, %s3239_s12 }
 0x261   :  { %2366 = vrot.lane.b32.xlu2 %v2365_v2, %s3240_s13 }
 0x263   :  { %2376 = vrot.lane.b32.xlu1 %v2375_v9, %s3232_s28  ;;  %2356 = vrot.lane.b32.xlu0 %v2355_v4, %s3241_s14 }
 0x269   :  { %2381 = vrot.lane.b32.xlu2 %v2380_v0, %s3232_s28 }
 0x26b   :  { %2371 = vrot.lane.b32.xlu0 %v2370_v7, %s3240_s13 }
 0x2ab   :  { %v3524_v61 = vpop.permute.xlu2 %2331 }
 0x2ac   :  { %v2334_v51 = vunpack.i.h.bf16 %v3524_v61  ;;  %v2333_v3 = vunpack.i.l.bf16 %v3524_v61 }
 0x2ae   :  { %v481_v6 = vsel %vm225_vm5, %v2333_v3, %v2334_v51  ;;  %v482_v11 = vsel %vm225_vm5, %v2334_v51, %v480_v49 }
 0x2af   :  { %v2385_v16 = vpack.i.bf16 %v482_v11, %v481_v6 }
 0x2b1   :  { %2386 = vrot.lane.b32.xlu2 %v2385_v16, %s3229_s1 }
 0x2b3   :  { %v3531_v57 = vpop.permute.xlu2 %2336 }
 0x2b4   :  { %v2339_v20 = vunpack.i.h.bf16 %v3531_v57  ;;  %v2338_v22 = vunpack.i.l.bf16 %v3531_v57 }
 0x2b6   :  { %v449_v17 = vsel %vm73_vm6, %v2338_v22, %v2339_v20 }
 0x2b7   :  { %v2390_v10 = vpack.i.bf16 %v449_v17, %v2338_v22 }
 0x2b9   :  { %2391 = vrot.lane.b32.xlu0 %v2390_v10, %s3229_s1 }
 0x2bb   :  { %v2367_v53 = vpop.permute.xlu2 %2366 }
 0x2bc   :  { %v2369_v7 = vunpack.i.h.bf16 %v2367_v53  ;;  %v2368_v61 = vunpack.i.l.bf16 %v2367_v53 }
 0x2be   :  { %v432_v17 = vsel %vm172_vm10, %v2368_v61, %v2369_v7 }
 0x2c3   :  { %v3550_v9 = vpop.permute.xlu2 %2381 }
 0x2c4   :  { %v2383_v49 = vunpack.i.l.bf16 %v3550_v9 }
 0x2c5   :  { %v2342_v25 = vpop.permute.xlu0 %2341  ;;  %v2347_v29 = vpop.permute.xlu1 %2346 }
 0x2c6   :  { %v2344_v32 = vunpack.i.h.bf16 %v2342_v25  ;;  %v2343_v33 = vunpack.i.l.bf16 %v2342_v25  ;;  %v2349_v36 = vunpack.i.h.bf16 %v2347_v29  ;;  %v2348_v38 = vunpack.i.l.bf16 %v2347_v29 }
 0x2c8   :  { %v492_v34 = vsel %vm237_vm7, %v2343_v33, %v2344_v32  ;;  %v470_v48 = vsel %vm213_vm8, %v2348_v38, %v2349_v36  ;;  %v493_v29 = vsel %vm237_vm7, %v2344_v32, %v491_v56 }
 0x2c9   :  { %v2400_v35 = vpack.i.bf16 %v492_v34, %v2343_v33  ;;  %v2410_v58 = vpack.i.bf16 %v470_v48, %v2348_v38  ;;  %v392_v33 = vmul.f32 %v3478_v37, %v3421_v50  ;;  %v2405_v34 = vpack.i.bf16 %v2333_v3, %v493_v29 }
 0x2ca   :  { %v471_v3 = vsel %vm213_vm8, %v2349_v36, %v3522_v8  ;;  %v3595_v36 = vld [vmem:[%s4428_s0 + $0x18] sm:$0xff] }
 0x2cb   :  { %2401 = vrot.lane.b32.xlu0 %v2400_v35, %s3229_s1  ;;  %v2181_v35 = vld [vmem:[%s4430_s2 + $0x8] sm:$0xff]  ;;  %v2445_v38 = vpack.i.bf16 %v392_v33, %v3423_v52 }
 0x2cd   :  { %v3541_v41 = vpop.permute.xlu1 %2361  ;;  %v2352_v42 = vpop.permute.xlu0 %2351 }
 0x2ce   :  { %v2354_v43 = vunpack.i.h.bf16 %v2352_v42  ;;  %v2353_v47 = vunpack.i.l.bf16 %v2352_v42  ;;  %v2363_v62 = vunpack.i.l.bf16 %v3541_v41  ;;  %v3576_v42 = vld [vmem:[%s4428_s0 + $0x10] sm:$0xff] }
 0x2cf   :  { %v1170_v37 = vmul.f32 %v3576_v42, %v3307_v14  ;;  %v1173_v56 = vmul.f32 %v3576_v42, %v3305_v13  ;;  %v1167_v8 = vmul.f32 %v3576_v42, %v3309_v15  ;;  %v1159_v61 = vmul.f32 %v3576_v42, %v3337_v30 }
 0x2d0   :  { %v459_v54 = vsel %vm201_vm9, %v2353_v47, %v2354_v43  ;;  %v460_v55 = vsel %vm201_vm9, %v2354_v43, %v458_v23  ;;  %v2415_v32 = vpack.i.bf16 %v2353_v47, %v471_v3  ;;  %v2475_v47 = vpack.i.bf16 0.0, %v3595_v36 }
 0x2d1   :  { %v2420_v59 = vpack.i.bf16 %v460_v55, %v459_v54  ;;  %v2450_v48 = vpack.i.bf16 %v1173_v56, %v3311_v18  ;;  %v2460_v53 = vpack.i.bf16 %v1170_v37, %v3313_v19 }
 0x2d3   :  { %2411 = vrot.lane.b32.xlu0 %v2410_v58, %s3229_s1  ;;  %2421 = vrot.lane.b32.xlu2 %v2420_v59, %s3229_s1  ;;  %v2465_v58 = vpack.i.bf16 %v1167_v8, %v3319_v21  ;;  %v1171_v59 = vmul.f32 %v3595_v36, %v3328_v26 }
 0x2d5   :  { %v2357_v60 = vpop.permute.xlu0 %2356  ;;  %v2377_v1 = vpop.permute.xlu1 %2376  ;;  %v2480_v57 = vpack.i.bf16 %v3313_v19, %v1171_v59 }
 0x2d6   :  { %v2359_v63 = vunpack.i.h.bf16 %v2357_v60  ;;  %v2379_v5 = vunpack.i.h.bf16 %v2377_v1  ;;  %v2378_v0 = vunpack.i.l.bf16 %v2377_v1  ;;  %v2358_v43 = vunpack.i.l.bf16 %v2357_v60 }
 0x2d7   :  { %v1168_v60 = vmul.f32 %v3595_v36, %v3358_v40  ;;  %v3619_v1 = vpack.i.bf16 %v3576_v42, %v3236_v12 }
 0x2d8   :  { %v444_v2 = vsel %vm184_vm11, %v2359_v63, %v2363_v62  ;;  %v422_v11 = vsel %vm105_vm4, %v2379_v5, %v2383_v49  ;;  %v421_v16 = vsel %vm105_vm4, %v2378_v0, %v2379_v5  ;;  %v443_v54 = vsel %vm184_vm11, %v2358_v43, %v2359_v63 }
 0x2d9   :  { %v2430_v4 = vpack.i.bf16 %v2363_v62, %v444_v2  ;;  %v2435_v23 = vpack.i.bf16 %v2383_v49, %v422_v11  ;;  %v2425_v55 = vpack.i.bf16 %v443_v54, %v2339_v20  ;;  %v393_v62 = vmul.f32 %v3480_v39, %v3415_v46 }
 0x2da   :  { %v2485_v20 = vpack.i.bf16 %v3319_v21, %v1168_v60  ;;  %v1162_v63 = vmul.f32 %v3576_v42, %v3370_v44  ;;  %v1163_v39 = vmul.f32 %v3595_v36, %v3323_v24  ;;  %v1160_v0 = vmul.f32 %v3595_v36, %v3332_v28 }
 0x2db   :  { %2431 = vrot.lane.b32.xlu2 %v2430_v4, %s3229_s1  ;;  %v1174_v4 = vmul.f32 %v3595_v36, %v3341_v31  ;;  %v2500_v49 = vpack.i.bf16 %v1159_v61, %v3330_v27 }
 0x2dc   :  { %v2495_v2 = vpack.i.bf16 %v1162_v63, %v3375_v45 }
 0x2dd   :  { %v3554_v51 = vpop.permute.xlu0 %2371  ;;  %v2470_v5 = vpack.i.bf16 %v3311_v18, %v1174_v4 }
 0x2de   :  { %v2373_v6 = vunpack.i.l.bf16 %v3554_v51 }
 0x2e0   :  { %v2395_v22 = vpack.i.bf16 %v421_v16, %v2373_v6  ;;  %v433_v10 = vsel %vm172_vm10, %v2369_v7, %v2373_v6  ;;  %v2490_v7 = vpack.i.bf16 %v3595_v36, %v3576_v42 }
 0x2e1   :  { %v2440_v25 = vpack.i.bf16 %v433_v10, %v432_v17 }
 0x2e2   :  { %2396 = vrot.lane.b32.xlu1 %v2395_v22, %s3229_s1 }
 0x2e3   :  { %2436 = vrot.lane.b32.xlu2 %v2435_v23, %s3229_s1  ;;  %2441 = vrot.lane.b32.xlu0 %v2440_v25, %s3229_s1 }
 0x2ea   :  { %2406 = vrot.lane.b32.xlu1 %v2405_v34, %s3229_s1 }
 0x2eb   :  { %500 = vperm.xlu2 %2329, %v2181_v35   ;;  %2446 = vrot.lane.b32.xlu0 %v2445_v38, %s3229_s1 }
 0x2f2   :  { %2416 = vrot.lane.b32.xlu1 %v2415_v32, %s3229_s1 }
 0x2f3   :  { %2451 = vrot.lane.b32.xlu2 %v2450_v48, %s3237_s10  ;;  %2461 = vrot.lane.b32.xlu0 %v2460_v53, %s3238_s11 }
 0x2fa   :  { %2426 = vrot.lane.b32.xlu1 %v2425_v55, %s3229_s1 }
 0x2fb   :  { %2466 = vrot.lane.b32.xlu2 %v2465_v58, %s3239_s12  ;;  %2476 = vrot.lane.b32.xlu0 %v2475_v47, %s3234_s8 }
 0x302   :  { %510 = vrot.lane.b32.xlu1 %v393_v62, %s3229_s1 }
 0x303   :  { %2481 = vrot.lane.b32.xlu2 %v2480_v57, %s3238_s11  ;;  %2486 = vrot.lane.b32.xlu0 %v2485_v20, %s3239_s12 }
 0x30a   :  { %2456 = vrot.lane.b32.xlu1 %v3619_v1, %s3234_s8 }
 0x30b   :  { %2496 = vrot.lane.b32.xlu2 %v2495_v2, %s3241_s14  ;;  %1205 = vrot.lane.b32.xlu0 %v1163_v39, %s3241_s14  ;;  %v2387_v10 = vpop.permute.xlu2 %2386 }
 0x30c   :  { %v2389_v33 = vunpack.i.h.bf16 %v2387_v10  ;;  %v2388_v34 = vunpack.i.l.bf16 %v2387_v10 }
 0x30e   :  { %v575_v53 = vsel %vm144_vm2, %v2388_v34, %v2389_v33 }
 0x312   :  { %2471 = vrot.lane.b32.xlu1 %v2470_v5, %s3237_s10 }
 0x313   :  { %1194 = vrot.lane.b32.xlu2 %v1160_v0, %s3240_s13  ;;  %2506 = vrot.lane.b32.xlu0 %v3619_v1, %s3232_s28 }
 0x31a   :  { %2491 = vrot.lane.b32.xlu1 %v2490_v7, %s3235_s9 }
 0x322   :  { %2501 = vrot.lane.b32.xlu1 %v2500_v49, %s3240_s13 }
 0x32a   :  { %1183 = vrot.lane.b32.xlu1 %v3595_v36, %s3232_s28 }
 0x32b   :  { %v2392_v6 = vpop.permute.xlu0 %2391 }
 0x32c   :  { %v2394_v8 = vunpack.i.h.bf16 %v2392_v6  ;;  %v2393_v47 = vunpack.i.l.bf16 %v2392_v6 }
 0x32d   :  { %v2422_v25 = vpop.permute.xlu2 %2421 }
 0x32e   :  { %v2424_v59 = vunpack.i.h.bf16 %v2422_v25  ;;  %v2423_v60 = vunpack.i.l.bf16 %v2422_v25  ;;  %v568_v2 = vsel %vm144_vm2, %v2393_v47, %v2394_v8 }
 0x330   :  { %v571_v39 = vsel %vm144_vm2, %v2423_v60, %v2424_v59 }
 0x335   :  { %v2432_v54 = vpop.permute.xlu2 %2431 }
 0x336   :  { %v2434_v4 = vunpack.i.h.bf16 %v2432_v54  ;;  %v2433_v5 = vunpack.i.l.bf16 %v2432_v54 }
 0x338   :  { %v567_v33 = vsel %vm144_vm2, %v2433_v5, %v2434_v4 }
 0x33d   :  { %v2402_v11 = vpop.permute.xlu0 %2401  ;;  %v2437_v7 = vpop.permute.xlu2 %2436 }
 0x33e   :  { %v2404_v16 = vunpack.i.h.bf16 %v2402_v11  ;;  %v2403_v22 = vunpack.i.l.bf16 %v2402_v11 }
 0x340   :  { %v576_v17 = vsel %vm144_vm2, %v2403_v22, %v2404_v16 }
 0x341   :  { %606 = vmatpush.msra.mxu2 %v576_v17 }
 0x345   :  { %v2412_v29 = vpop.permute.xlu0 %2411  ;;  %v501_v54 = vpop.permute.xlu2 %500 }
 0x346   :  { %v2414_v38 = vunpack.i.h.bf16 %v2412_v29  ;;  %v2413_v37 = vunpack.i.l.bf16 %v2412_v29  ;;  %v2439_v29 = vunpack.i.h.bf16 %v2437_v7 }
 0x348   :  { %v572_v48 = vsel %vm144_vm2, %v2413_v37, %v2414_v38 }
 0x34d   :  { %v3668_v47 = vpop.permute.xlu2 %2451 }
 0x354   :  { %v2397_v23 = vpop.permute.xlu1 %2396 }
 0x355   :  { %v2442_v55 = vpop.permute.xlu0 %2441  ;;  %v2399_v22 = vunpack.i.h.bf16 %v2397_v23  ;;  %v2398_v17 = vunpack.i.l.bf16 %v2397_v23 }
 0x356   :  { %v2444_v61 = vunpack.i.h.bf16 %v2442_v55  ;;  %v2443_v49 = vunpack.i.l.bf16 %v2442_v55 }
 0x358   :  { %v564_v37 = vsel %vm144_vm2, %v2443_v49, %v2444_v61  ;;  %v565_v23 = vsel %vm144_vm2, %v2444_v61, %v2398_v17 }
 0x35c   :  { %v2407_v35 = vpop.permute.xlu1 %2406 }
 0x35d   :  { %v2409_v3 = vunpack.i.h.bf16 %v2407_v35  ;;  %v2408_v56 = vunpack.i.l.bf16 %v2407_v35 }
 0x35f   :  { %v574_v32 = vsel %vm144_vm2, %v2409_v3, %v2388_v34  ;;  %v577_v43 = vsel %vm144_vm2, %v2404_v16, %v2408_v56  ;;  %v2447_v16 = vpop.permute.xlu0 %2446  ;;  %v2438_v34 = vunpack.i.l.bf16 %v2437_v7 }
 0x360   :  { %607 = vmatpush.msra.mxu2 %v574_v32  ;;  %626 = vmatpush.msra.mxu3 %v577_v43  ;;  %v2449_v35 = vunpack.i.h.bf16 %v2447_v16  ;;  %v495_v32 = vld [vmem:[#allocation3 + $0x8] sm:$0xff] }
 0x361   :  { %v562_v3 = vsel %vm144_vm2, %v2399_v22, %v2438_v34 }
 0x362   :  { %608 = vmatpush.msra.mxu2 %v572_v48  ;;  %627 = vmatpush.msra.mxu3 %v575_v53  ;;  %v563_v48 = vsel %vm144_vm2, %v2438_v34, %v2439_v29 }
 0x364   :  { %v2417_v58 = vpop.permute.xlu1 %2416 }
 0x365   :  { %v2419_v62 = vunpack.i.h.bf16 %v2417_v58  ;;  %v2418_v57 = vunpack.i.l.bf16 %v2417_v58  ;;  %v2454_v58 = vunpack.i.h.bf16 %v3668_v47 }
 0x367   :  { %v570_v20 = vsel %vm144_vm2, %v2419_v62, %v2423_v60  ;;  %v573_v63 = vsel %vm144_vm2, %v2414_v38, %v2418_v57  ;;  %v2448_v38 = vunpack.i.l.bf16 %v2447_v16 }
 0x368   :  { %609 = vmatpush.msra.mxu2 %v570_v20  ;;  %628 = vmatpush.msra.mxu3 %v573_v63  ;;  %v3676_v63 = vpop.permute.xlu0 %2461 }
 0x369   :  { %v560_v43 = vsel %vm144_vm2, %v2448_v38, %v2449_v35  ;;  %v3700_v38 = vpop.permute.xlu2 %2466 }
 0x36a   :  { %610 = vmatpush.msra.mxu2 %v568_v2  ;;  %629 = vmatpush.msra.mxu3 %v571_v39 }
 0x36c   :  { %v2427_v0 = vpop.permute.xlu1 %2426 }
 0x36d   :  { %v2429_v6 = vunpack.i.h.bf16 %v2427_v0  ;;  %v2428_v11 = vunpack.i.l.bf16 %v2427_v0 }
 0x36f   :  { %v566_v10 = vsel %vm144_vm2, %v2429_v6, %v2433_v5  ;;  %v569_v25 = vsel %vm144_vm2, %v2394_v8, %v2428_v11 }
 0x370   :  { %611 = vmatpush.msra.mxu2 %v566_v10  ;;  %630 = vmatpush.msra.mxu3 %v569_v25  ;;  %v2477_v2 = vpop.permute.xlu0 %2476 }
 0x371   :  { %v2479_v1 = vunpack.i.h.bf16 %v2477_v2  ;;  %v2478_v39 = vunpack.i.l.bf16 %v2477_v2 }
 0x372   :  { %612 = vmatpush.msra.mxu2 %v564_v37  ;;  %631 = vmatpush.msra.mxu3 %v567_v33 }
 0x373   :  { %v1246_v0 = vsel %vm225_vm5, %v2478_v39, %v2479_v1 }
 0x374   :  { %v511_v56 = vpop.permute.xlu1 %510  ;;  %613 = vmatpush.msra.mxu2 %v562_v3  ;;  %632 = vmatpush.msra.mxu3 %v565_v23 }
 0x375   :  { %v561_v53 = vsel %vm144_vm2, %v2449_v35, %v511_v56 }
 0x376   :  { %614 = vmatpush.msra.mxu2 %v560_v43  ;;  %633 = vmatpush.msra.mxu3 %v563_v48 }
 0x377   :  { %2182 = vmatmul.msk.f32.vlgmr.msra.gmra.mxu2 %vm340_vm12, %v495_v32 }
 0x378   :  { %634 = vmatpush.msra.mxu3 %v561_v53  ;;  %v2482_v53 = vpop.permute.xlu2 %2481 }
 0x379   :  { %2183 = vmatmul.msk.f32.vlgmr.msra.gmra.mxu3 %vm340_vm12, %v495_v32 }
 0x37c   :  { %v3664_v8 = vpop.permute.xlu1 %2456 }
 0x37d   :  { %v2459_v4 = vunpack.i.h.bf16 %v3664_v8 }
 0x37f   :  { %v1245_v5 = vsel %vm225_vm5, %v2459_v4, %v2478_v39 }
 0x380   :  { %v2515_v7 = vpack.i.bf16 %v1246_v0, %v1245_v5  ;;  %v2469_v0 = vunpack.i.h.bf16 %v3700_v38 }
 0x384   :  { %v2472_v55 = vpop.permute.xlu1 %2471 }
 0x385   :  { %v2474_v59 = vunpack.i.h.bf16 %v2472_v55  ;;  %v2473_v60 = vunpack.i.l.bf16 %v2472_v55 }
 0x387   :  { %v1256_v62 = vsel %vm237_vm7, %v2454_v58, %v2473_v60  ;;  %v1257_v57 = vsel %vm237_vm7, %v2473_v60, %v2474_v59  ;;  %v2464_v59 = vunpack.i.h.bf16 %v3676_v63  ;;  %v2484_v60 = vunpack.i.h.bf16 %v2482_v53 }
 0x388   :  { %v2510_v20 = vpack.i.bf16 %v1257_v57, %v1256_v62  ;;  %v2483_v62 = vunpack.i.l.bf16 %v2482_v53 }
 0x38a   :  { %2511 = vrot.lane.b32.xlu1 %v2510_v20, %s3229_s1  ;;  %v1234_v57 = vsel %vm213_vm8, %v2464_v59, %v2483_v62  ;;  %v2487_v20 = vpop.permute.xlu0 %2486  ;;  %v1235_v2 = vsel %vm213_vm8, %v2483_v62, %v2484_v60  ;;  %v2468_v62 = vunpack.i.l.bf16 %v3700_v38 }
 0x38b   :  { %v2560_v1 = vpack.i.bf16 %v1235_v2, %v1234_v57  ;;  %v2489_v39 = vunpack.i.h.bf16 %v2487_v20  ;;  %v2488_v5 = vunpack.i.l.bf16 %v2487_v20 }
 0x392   :  { %2516 = vrot.lane.b32.xlu1 %v2515_v7, %s3229_s1  ;;  %v1223_v7 = vsel %vm201_vm9, %v2469_v0, %v2488_v5 }
 0x3fa   :  { %v616_v61 = vpop.f32.mrf.mxu2 }
 0x3fb   :  { %v617_v49 = vadd.f32 %v616_v61, %v501_v54  ;;  %v1224_v61 = vsel %vm201_vm9, %v2488_v5, %v2489_v39 }
 0x3fc   :  { %v636_v6 = vpop.f32.mrf.mxu3 }
 0x3fd   :  { %v3684_v11 = vadd.f32 %v636_v6, %v501_v54  ;;  %v662_v16 = vmul.f32 %v617_v49, %v3305_v13  ;;  %v659_v10 = vmul.f32 %v617_v49, %v3307_v14  ;;  %v656_v37 = vmul.f32 %v617_v49, %v3309_v15  ;;  %v3725_v6 = vpop.permute.xlu1 %2491 }
 0x3fe   :  { %v651_v3 = vmul.f32 %v617_v49, %v3370_v44  ;;  %v645_v43 = vmul.f32 %v617_v49, %v3421_v50  ;;  %v648_v48 = vmul.f32 %v617_v49, %v3337_v30 }
 0x3ff   :  { %v2520_v22 = vpack.i.bf16 %v3684_v11, %v617_v49  ;;  %v663_v17 = vmul.f32 %v3684_v11, %v3341_v31  ;;  %v660_v25 = vmul.f32 %v3684_v11, %v3328_v26  ;;  %v657_v34 = vmul.f32 %v3684_v11, %v3358_v40 }
 0x400   :  { %v652_v35 = vmul.f32 %v3684_v11, %v3323_v24  ;;  %v649_v32 = vmul.f32 %v3684_v11, %v3332_v28  ;;  %v2570_v55 = vpack.i.bf16 %v645_v43, %v3423_v52  ;;  %v2565_v49 = vpack.i.bf16 %v1224_v61, %v1223_v7 }
 0x401   :  { %2521 = vrot.lane.b32.xlu0 %v2520_v22, %s3232_s28  ;;  %v2535_v29 = vpack.i.bf16 %v663_v17, %v662_v16  ;;  %v2540_v33 = vpack.i.bf16 %v660_v25, %v659_v10  ;;  %v2545_v23 = vpack.i.bf16 %v657_v34, %v656_v37  ;;  %v3731_v17 = vpop.permute.xlu0 %1205 }
 0x402   :  { %v2550_v56 = vpack.i.bf16 %v652_v35, %v651_v3  ;;  %v2555_v54 = vpack.i.bf16 %v649_v32, %v648_v48  ;;  %v2458_v32 = vunpack.i.l.bf16 %v3664_v8  ;;  %v1157_v8 = vmul.f32 %v3595_v36, %v3415_v46 }
 0x403   :  { %2536 = vrot.lane.b32.xlu1 %v2535_v29, %s3237_s10  ;;  %2541 = vrot.lane.b32.xlu2 %v2540_v33, %s3238_s11  ;;  %v3739_v33 = vpop.permute.xlu2 %2496 }
 0x405   :  { %v3727_v16 = vpop.permute.xlu1 %2501 }
 0x409   :  { %2526 = vrot.lane.b32.xlu0 %v2520_v22, %s3234_s8  ;;  %v3735_v25 = vpop.permute.xlu0 %2506 }
 0x40b   :  { %2546 = vrot.lane.b32.xlu1 %v2545_v23, %s3239_s12  ;;  %2551 = vrot.lane.b32.xlu2 %v2550_v56, %s3241_s14  ;;  %v1195_v56 = vpop.permute.xlu2 %1194 }
 0x411   :  { %2531 = vrot.lane.b32.xlu0 %v2520_v22, %s3235_s9  ;;  %v3729_v22 = vpop.permute.xlu1 %1183 }
 0x413   :  { %2556 = vrot.lane.b32.xlu1 %v2555_v54, %s3240_s13  ;;  %2571 = vrot.lane.b32.xlu2 %v2570_v55, %s3229_s1 }
 0x419   :  { %v3733_v10 = vpop.permute.xlu1 %2511 }
 0x41b   :  { %2561 = vrot.lane.b32.xlu1 %v2560_v1, %s3229_s1 }
 0x421   :  { %v3737_v29 = vpop.permute.xlu1 %2516 }
 0x423   :  { %2566 = vrot.lane.b32.xlu1 %v2565_v49, %s3229_s1 }
 0x45d   :  { %v3758_v1 = vpop.permute.xlu2 %2541 }
 0x473   :  { %v2522_v34 = vpop.permute.xlu0 %2521 }
 0x475   :  { %v3741_v35 = vpop.permute.xlu1 %2536 }
 0x47b   :  { %v3743_v37 = vpop.permute.xlu0 %2526 }
 0x47c   :  { %v2529_v3 = vunpack.i.h.bf16 %v3743_v37  ;;  %v2528_v23 = vunpack.i.l.bf16 %v3743_v37 }
 0x47d   :  { %v3748_v43 = vpop.permute.xlu1 %2546 }
 0x47e   :  { %v734_v48 = vsel %vm225_vm5, %v2528_v23, %v2529_v3  ;;  %v735_v53 = vsel %vm225_vm5, %v2529_v3, %v2458_v32  ;;  %v2549_v55 = vunpack.i.h.bf16 %v3748_v43  ;;  %v2548_v60 = vunpack.i.l.bf16 %v3748_v43 }
 0x47f   :  { %v2585_v54 = vpack.i.bf16 %v735_v53, %v734_v48  ;;  %v2524_v3 = vunpack.i.h.bf16 %v2522_v34  ;;  %v2523_v32 = vunpack.i.l.bf16 %v2522_v34  ;;  %v2494_v48 = vunpack.i.h.bf16 %v3725_v6 }
 0x480   :  { %v712_v39 = vsel %vm201_vm9, %v2548_v60, %v2549_v55  ;;  %v713_v5 = vsel %vm201_vm9, %v2549_v55, %v2468_v62  ;;  %v2384_v53 = vunpack.i.h.bf16 %v3550_v9  ;;  %v2503_v43 = vunpack.i.l.bf16 %v3727_v16 }
 0x481   :  { %2586 = vrot.lane.b32.xlu1 %v2585_v54, %s3229_s1  ;;  %v2635_v38 = vpack.i.bf16 %v713_v5, %v712_v39  ;;  %v2493_v54 = vunpack.i.l.bf16 %v3725_v6  ;;  %v675_v55 = vsel %vm105_vm4, %v2523_v32, %v2524_v3  ;;  %v2580_v34 = vpack.i.bf16 %v2469_v0, %v2524_v3 }
 0x482   :  { %v2538_v39 = vunpack.i.l.bf16 %v3741_v35  ;;  %v2504_v5 = vunpack.i.h.bf16 %v3727_v16  ;;  %v2675_v16 = vpack.i.bf16 %v3423_v52, %v3729_v22 }
 0x483   :  { %v2532_v57 = vpop.permute.xlu0 %2531  ;;  %v1213_v62 = vsel %vm73_vm6, %v2493_v54, %v2494_v48 }
 0x484   :  { %v2534_v20 = vunpack.i.h.bf16 %v2532_v57  ;;  %v2533_v2 = vunpack.i.l.bf16 %v2532_v57  ;;  %v2552_v57 = vpop.permute.xlu2 %2551  ;;  %v2640_v9 = vpack.i.bf16 %v2494_v48, %v1213_v62  ;;  %v1197_v0 = vsel %vm172_vm10, %v2504_v5, %v1195_v56 }
 0x485   :  { %v2554_v6 = vunpack.i.h.bf16 %v2552_v57  ;;  %v2557_v3 = vpop.permute.xlu1 %2556  ;;  %v2364_v62 = vunpack.i.h.bf16 %v3541_v41  ;;  %v2374_v41 = vunpack.i.h.bf16 %v3554_v51  ;;  %v2498_v51 = vunpack.i.l.bf16 %v3739_v33 }
 0x486   :  { %v2575_v7 = vpack.i.bf16 %v2454_v58, %v2534_v20  ;;  %v702_v61 = vsel %vm73_vm6, %v2533_v2, %v2534_v20  ;;  %v674_v58 = vsel %vm105_vm4, %v2384_v53, %v2523_v32  ;;  %v2543_v32 = vunpack.i.l.bf16 %v3758_v1 }
 0x487   :  { %v2590_v49 = vpack.i.bf16 %v702_v61, %v2533_v2  ;;  %v2595_v20 = vpack.i.bf16 %v675_v55, %v674_v58  ;;  %v2539_v2 = vunpack.i.h.bf16 %v3741_v35  ;;  %v2600_v61 = vpack.i.bf16 %v2459_v4, %v2554_v6 }
 0x488   :  { %2576 = vrot.lane.b32.xlu0 %v2575_v7, %s3229_s1  ;;  %v2544_v35 = vunpack.i.h.bf16 %v3758_v1  ;;  %v2559_v48 = vunpack.i.h.bf16 %v2557_v3  ;;  %v1156_v53 = vmul.f32 %v3576_v42, %v3421_v50  ;;  %v2553_v55 = vunpack.i.l.bf16 %v2552_v57 }
 0x489   :  { %2591 = vrot.lane.b32.xlu2 %v2590_v49, %s3229_s1  ;;  %2636 = vrot.lane.b32.xlu1 %v2635_v38, %s3229_s1  ;;  %v745_v7 = vsel %vm237_vm7, %v2538_v39, %v2539_v2  ;;  %v2665_v38 = vpack.i.bf16 %v1195_v56, %v1197_v0  ;;  %v2453_v42 = vunpack.i.l.bf16 %v3668_v47 }
 0x48a   :  { %v2610_v49 = vpack.i.bf16 %v745_v7, %v2538_v39  ;;  %v723_v4 = vsel %vm213_vm8, %v2543_v32, %v2544_v35  ;;  %v2605_v58 = vpack.i.bf16 %v2464_v59, %v2559_v48  ;;  %v2680_v56 = vpack.i.bf16 %v1157_v8, %v1156_v53 }
 0x48b   :  { %v2620_v1 = vpack.i.bf16 %v723_v4, %v2543_v32  ;;  %v696_v36 = vsel %vm184_vm11, %v2364_v62, %v2553_v55  ;;  %v2558_v39 = vunpack.i.l.bf16 %v2557_v3  ;;  %v2509_v3 = vunpack.i.h.bf16 %v3735_v25 }
 0x48d   :  { %v685_v47 = vsel %vm172_vm10, %v2374_v41, %v2558_v39  ;;  %v686_v7 = vsel %vm172_vm10, %v2558_v39, %v2559_v48 }
 0x490   :  { %2581 = vrot.lane.b32.xlu0 %v2580_v34, %s3229_s1  ;;  %v697_v34 = vsel %vm184_vm11, %v2553_v55, %v2554_v6 }
 0x491   :  { %2596 = vrot.lane.b32.xlu2 %v2595_v20, %s3229_s1  ;;  %2641 = vrot.lane.b32.xlu1 %v2640_v9, %s3229_s1  ;;  %v746_v20 = vsel %vm237_vm7, %v2539_v2, %v2453_v42  ;;  %v2645_v57 = vpack.i.bf16 %v697_v34, %v696_v36  ;;  %v2463_v9 = vunpack.i.l.bf16 %v3676_v63  ;;  %v2499_v2 = vunpack.i.h.bf16 %v3739_v33 }
 0x492   :  { %v2615_v59 = vpack.i.bf16 %v2528_v23, %v746_v20  ;;  %v2650_v23 = vpack.i.bf16 %v686_v7, %v685_v47  ;;  %v646_v63 = vmul.f32 %v3684_v11, %v3415_v46  ;;  %v1196_v33 = vsel %vm172_vm10, %v2503_v43, %v2504_v5  ;;  %v3844_v5 = vpop.permute.xlu2 %2571 }
 0x493   :  { %v724_v6 = vsel %vm213_vm8, %v2544_v35, %v2463_v9  ;;  %v1208_v0 = vsel %vm184_vm11, %v2499_v2, %v3731_v17  ;;  %v2508_v35 = vunpack.i.l.bf16 %v3735_v25  ;;  %v2660_v32 = vpack.i.bf16 %v1196_v33, %v3731_v17  ;;  %v2184_v25 = vld [vmem:[%s4430_s2 + $0x10] sm:$0xff] }
 0x494   :  { %v2625_v37 = vpack.i.bf16 %v2548_v60, %v724_v6 }
 0x495   :  { %v1185_v11 = vsel %vm105_vm4, %v2508_v35, %v2509_v3 }
 0x498   :  { %2601 = vrot.lane.b32.xlu0 %v2600_v61, %s3229_s1  ;;  %v2630_v61 = vpack.i.bf16 %v2493_v54, %v646_v63  ;;  %v1186_v54 = vsel %vm105_vm4, %v2509_v3, %v3729_v22 }
 0x499   :  { %2611 = vrot.lane.b32.xlu2 %v2610_v49, %s3229_s1  ;;  %2666 = vrot.lane.b32.xlu1 %v2665_v38, %s3229_s1  ;;  %v1207_v49 = vsel %vm184_vm11, %v2498_v51, %v2499_v2  ;;  %v2670_v38 = vpack.i.bf16 %v1186_v54, %v1185_v11 }
 0x49a   :  { %v2655_v60 = vpack.i.bf16 %v1208_v0, %v1207_v49 }
 0x4a0   :  { %2606 = vrot.lane.b32.xlu0 %v2605_v58, %s3229_s1 }
 0x4a1   :  { %2621 = vrot.lane.b32.xlu2 %v2620_v1, %s3229_s1  ;;  %2681 = vrot.lane.b32.xlu1 %v2680_v56, %s3229_s1  ;;  %v3853_v1 = vpop.permute.xlu1 %2561 }
 0x4a8   :  { %2616 = vrot.lane.b32.xlu0 %v2615_v59, %s3229_s1 }
 0x4a9   :  { %2646 = vrot.lane.b32.xlu2 %v2645_v57, %s3229_s1  ;;  %v3859_v62 = vpop.permute.xlu1 %2566 }
 0x4b0   :  { %2626 = vrot.lane.b32.xlu0 %v2625_v37, %s3229_s1 }
 0x4b1   :  { %2651 = vrot.lane.b32.xlu2 %v2650_v23, %s3229_s1 }
 0x4b8   :  { %2631 = vrot.lane.b32.xlu0 %v2630_v61, %s3229_s1 }
 0x4b9   :  { %2656 = vrot.lane.b32.xlu2 %v2655_v60, %s3229_s1 }
 0x4c0   :  { %2661 = vrot.lane.b32.xlu0 %v2660_v32, %s3229_s1 }
 0x4c1   :  { %2671 = vrot.lane.b32.xlu2 %v2670_v38, %s3229_s1 }
 0x4c8   :  { %2676 = vrot.lane.b32.xlu0 %v2675_v16, %s3229_s1  ;;  %v1259_v16 = vld [vmem:[%s4430_s2] sm:$0xff] }
 0x4c9   :  { %753 = vperm.xlu2 %2329, %v2184_v25  }
 0x4d0   :  { %1262 = vperm.xlu0 %2685, %v1259_v16   ;;  %v2569_v16 = vunpack.i.h.bf16 %v3859_v62 }
 0x4e3   :  { %v3846_v48 = vpop.permute.xlu2 %2591 }
 0x4e4   :  { %v2594_v63 = vunpack.i.h.bf16 %v3846_v48  ;;  %v2593_v0 = vunpack.i.l.bf16 %v3846_v48 }
 0x4e6   :  { %v821_v25 = vsel %vm144_vm2, %v2593_v0, %v2594_v63  ;;  %v748_v0 = vld [vmem:[#allocation3 + $0x10] sm:$0xff] }
 0x4eb   :  { %v3848_v17 = vpop.permute.xlu2 %2596 }
 0x4f3   :  { %v2612_v53 = vpop.permute.xlu2 %2611  ;;  %v2587_v34 = vpop.permute.xlu1 %2586 }
 0x4f4   :  { %v2614_v8 = vunpack.i.h.bf16 %v2612_v53  ;;  %v2613_v4 = vunpack.i.l.bf16 %v2612_v53  ;;  %v2589_v20 = vunpack.i.h.bf16 %v2587_v34  ;;  %v2588_v59 = vunpack.i.l.bf16 %v2587_v34 }
 0x4f5   :  { %v2598_v34 = vunpack.i.l.bf16 %v3848_v17 }
 0x4f6   :  { %v829_v58 = vsel %vm144_vm2, %v2613_v4, %v2614_v8  ;;  %v828_v51 = vsel %vm144_vm2, %v2588_v59, %v2589_v20 }
 0x4f7   :  { %859 = vmatpush.msrb.mxu0 %v829_v58  ;;  %v2599_v58 = vunpack.i.h.bf16 %v3848_v17 }
 0x4fa   :  { %v3851_v22 = vpop.permute.xlu0 %2576 }
 0x4fb   :  { %v2622_v42 = vpop.permute.xlu2 %2621  ;;  %v2637_v23 = vpop.permute.xlu1 %2636  ;;  %v2578_v35 = vunpack.i.l.bf16 %v3851_v22  ;;  %v2579_v17 = vunpack.i.h.bf16 %v3851_v22 }
 0x4fc   :  { %v2624_v41 = vunpack.i.h.bf16 %v2622_v42  ;;  %v2623_v9 = vunpack.i.l.bf16 %v2622_v42  ;;  %v2639_v49 = vunpack.i.h.bf16 %v2637_v23  ;;  %v2638_v43 = vunpack.i.l.bf16 %v2637_v23 }
 0x4fd   :  { %v815_v23 = vsel %vm144_vm2, %v2598_v34, %v2599_v58 }
 0x4fe   :  { %v825_v2 = vsel %vm144_vm2, %v2623_v9, %v2624_v41  ;;  %v824_v4 = vsel %vm144_vm2, %v2638_v43, %v2639_v49  ;;  %v2573_v9 = vunpack.i.l.bf16 %v3844_v5 }
 0x502   :  { %v3855_v55 = vpop.permute.xlu0 %2581 }
 0x503   :  { %v2647_v57 = vpop.permute.xlu2 %2646  ;;  %v3879_v42 = vpop.permute.xlu1 %2641 }
 0x504   :  { %v2649_v11 = vunpack.i.h.bf16 %v2647_v57  ;;  %v2648_v54 = vunpack.i.l.bf16 %v2647_v57  ;;  %v822_v57 = vsel %vm144_vm2, %v2594_v63, %v2578_v35  ;;  %v2513_v63 = vunpack.i.l.bf16 %v3733_v10 }
 0x50a   :  { %v3857_v56 = vpop.permute.xlu0 %2601 }
 0x50b   :  { %v2652_v33 = vpop.permute.xlu2 %2651  ;;  %v2603_v48 = vunpack.i.l.bf16 %v3857_v56 }
 0x50c   :  { %v2654_v53 = vunpack.i.h.bf16 %v2652_v33 }
 0x512   :  { %v3861_v36 = vpop.permute.xlu0 %2606 }
 0x513   :  { %v2608_v20 = vunpack.i.l.bf16 %v3861_v36 }
 0x51a   :  { %v2617_v39 = vpop.permute.xlu0 %2616 }
 0x51b   :  { %v2619_v47 = vunpack.i.h.bf16 %v2617_v39  ;;  %v2618_v7 = vunpack.i.l.bf16 %v2617_v39  ;;  %v2574_v39 = vunpack.i.h.bf16 %v3844_v5  ;;  %v3895_v5 = vpop.permute.xlu2 %2656 }
 0x51d   :  { %v827_v6 = vsel %vm144_vm2, %v2619_v47, %v2588_v59  ;;  %v830_v37 = vsel %vm144_vm2, %v2614_v8, %v2618_v7  ;;  %v2653_v8 = vunpack.i.l.bf16 %v2652_v33  ;;  %v819_v59 = vsel %vm144_vm2, %v2648_v54, %v2649_v11  ;;  %v2667_v33 = vpop.permute.xlu1 %2666 }
 0x51e   :  { %860 = vmatpush.msrb.mxu0 %v827_v6  ;;  %879 = vmatpush.msrb.mxu1 %v830_v37  ;;  %v2583_v47 = vunpack.i.l.bf16 %v3855_v55  ;;  %v820_v6 = vsel %vm144_vm2, %v2649_v11, %v2603_v48  ;;  %v813_v49 = vsel %vm144_vm2, %v2573_v9, %v2574_v39  ;;  %v2564_v54 = vunpack.i.h.bf16 %v3853_v1 }
 0x51f   :  { %v817_v7 = vsel %vm144_vm2, %v2653_v8, %v2654_v53  ;;  %v2644_v8 = vunpack.i.h.bf16 %v3879_v42 }
 0x520   :  { %861 = vmatpush.msrb.mxu0 %v825_v2  ;;  %880 = vmatpush.msrb.mxu1 %v828_v51  ;;  %v818_v2 = vsel %vm144_vm2, %v2654_v53, %v2608_v20  ;;  %v2514_v51 = vunpack.i.h.bf16 %v3733_v10  ;;  %v816_v22 = vsel %vm144_vm2, %v2599_v58, %v2583_v47  ;;  %v1338_v10 = vsel %vm144_vm2, %v2579_v17, %v2513_v63 }
 0x521   :  { %v2668_v47 = vunpack.i.l.bf16 %v2667_v33 }
 0x522   :  { %v2627_v61 = vpop.permute.xlu0 %2626  ;;  %v1339_v11 = vsel %vm144_vm2, %v2513_v63, %v2514_v51 }
 0x523   :  { %v2629_v60 = vunpack.i.h.bf16 %v2627_v61  ;;  %v2628_v3 = vunpack.i.l.bf16 %v2627_v61  ;;  %v2604_v61 = vunpack.i.h.bf16 %v3857_v56  ;;  %v2672_v20 = vpop.permute.xlu2 %2671 }
 0x525   :  { %v823_v32 = vsel %vm144_vm2, %v2629_v60, %v2638_v43  ;;  %v826_v38 = vsel %vm144_vm2, %v2624_v41, %v2628_v3  ;;  %v2519_v43 = vunpack.i.h.bf16 %v3737_v29  ;;  %v2518_v60 = vunpack.i.l.bf16 %v3737_v29 }
 0x526   :  { %862 = vmatpush.msrb.mxu0 %v823_v32  ;;  %881 = vmatpush.msrb.mxu1 %v826_v38  ;;  %v2609_v3 = vunpack.i.h.bf16 %v3861_v36  ;;  %v2563_v29 = vunpack.i.l.bf16 %v3853_v1  ;;  %v2584_v32 = vunpack.i.h.bf16 %v3855_v55  ;;  %v2643_v1 = vunpack.i.l.bf16 %v3879_v42 }
 0x527   :  { %v1336_v36 = vsel %vm144_vm2, %v2604_v61, %v2518_v60  ;;  %v1337_v38 = vsel %vm144_vm2, %v2518_v60, %v2519_v43  ;;  %v2659_v55 = vunpack.i.h.bf16 %v3895_v5  ;;  %v2669_v42 = vunpack.i.h.bf16 %v2667_v33 }
 0x528   :  { %863 = vmatpush.msrb.mxu0 %v821_v25  ;;  %882 = vmatpush.msrb.mxu1 %v824_v4  ;;  %v2568_v25 = vunpack.i.l.bf16 %v3859_v62  ;;  %v1334_v53 = vsel %vm144_vm2, %v2609_v3, %v2563_v29  ;;  %v2658_v4 = vunpack.i.l.bf16 %v3895_v5  ;;  %v1335_v34 = vsel %vm144_vm2, %v2563_v29, %v2564_v54 }
 0x529   :  { %v1331_v9 = vsel %vm144_vm2, %v2643_v1, %v2644_v8 }
 0x52a   :  { %v2632_v41 = vpop.permute.xlu0 %2631  ;;  %864 = vmatpush.msrb.mxu0 %v819_v59  ;;  %883 = vmatpush.msrb.mxu1 %v822_v57  ;;  %v1332_v58 = vsel %vm144_vm2, %v2584_v32, %v2568_v25  ;;  %v1328_v17 = vsel %vm144_vm2, %v2658_v4, %v2659_v55 }
 0x52b   :  { %v2633_v37 = vunpack.i.l.bf16 %v2632_v41  ;;  %v2634_v48 = vunpack.i.h.bf16 %v2632_v41 }
 0x52c   :  { %865 = vmatpush.msrb.mxu0 %v817_v7  ;;  %884 = vmatpush.msrb.mxu1 %v820_v6  ;;  %v2674_v7 = vunpack.i.h.bf16 %v2672_v20  ;;  %v2673_v6 = vunpack.i.l.bf16 %v2672_v20 }
 0x52d   :  { %v814_v35 = vsel %vm144_vm2, %v2574_v39, %v2633_v37  ;;  %v1330_v57 = vsel %vm144_vm2, %v2634_v48, %v2643_v1  ;;  %v1333_v39 = vsel %vm144_vm2, %v2568_v25, %v2569_v16  ;;  %v2682_v37 = vpop.permute.xlu1 %2681 }
 0x52e   :  { %866 = vmatpush.msrb.mxu0 %v815_v23  ;;  %885 = vmatpush.msrb.mxu1 %v818_v2  ;;  %v2684_v5 = vunpack.i.h.bf16 %v2682_v37  ;;  %v1324_v61 = vsel %vm144_vm2, %v2673_v6, %v2674_v7 }
 0x530   :  { %867 = vmatpush.msrb.mxu0 %v813_v49  ;;  %886 = vmatpush.msrb.mxu1 %v816_v22  ;;  %v1327_v49 = vsel %vm144_vm2, %v2668_v47, %v2669_v42  ;;  %v1258_v22 = vld [vmem:[#allocation3] sm:$0xff] }
 0x531   :  { %2185 = vmatmul.msk.f32.vlgmr.msrb.gmra.mxu0 %vm340_vm12, %v748_v0 }
 0x532   :  { %1368 = vmatpush.msra.mxu0 %v1338_v10  ;;  %v2662_v56 = vpop.permute.xlu0 %2661  ;;  %887 = vmatpush.msrb.mxu1 %v814_v35  ;;  %v754_v10 = vpop.permute.xlu2 %753 }
 0x533   :  { %2186 = vmatmul.msk.f32.vlgmr.msrb.gmra.mxu1 %vm340_vm12, %v748_v0  ;;  %v2664_v62 = vunpack.i.h.bf16 %v2662_v56  ;;  %v2663_v59 = vunpack.i.l.bf16 %v2662_v56  ;;  %v2683_v0 = vunpack.i.l.bf16 %v2682_v37 }
 0x534   :  { %1369 = vmatpush.msra.mxu0 %v1336_v36  ;;  %1388 = vmatpush.msra.mxu1 %v1339_v11 }
 0x535   :  { %v1326_v51 = vsel %vm144_vm2, %v2664_v62, %v2668_v47  ;;  %v1329_v63 = vsel %vm144_vm2, %v2659_v55, %v2663_v59  ;;  %v1323_v3 = vsel %vm144_vm2, %v2683_v0, %v2684_v5 }
 0x536   :  { %1370 = vmatpush.msra.mxu0 %v1334_v53  ;;  %1389 = vmatpush.msra.mxu1 %v1337_v38 }
 0x538   :  { %1371 = vmatpush.msra.mxu0 %v1332_v58  ;;  %1390 = vmatpush.msra.mxu1 %v1335_v34 }
 0x53a   :  { %1372 = vmatpush.msra.mxu0 %v1330_v57  ;;  %1391 = vmatpush.msra.mxu1 %v1333_v39  ;;  %v2677_v41 = vpop.permute.xlu0 %2676 }
 0x53b   :  { %v2679_v23 = vunpack.i.h.bf16 %v2677_v41  ;;  %v2678_v2 = vunpack.i.l.bf16 %v2677_v41 }
 0x53c   :  { %1373 = vmatpush.msra.mxu0 %v1328_v17  ;;  %1392 = vmatpush.msra.mxu1 %v1331_v9 }
 0x53d   :  { %v1322_v43 = vsel %vm144_vm2, %v2679_v23, %v2683_v0  ;;  %v1325_v60 = vsel %vm144_vm2, %v2674_v7, %v2678_v2 }
 0x53e   :  { %1374 = vmatpush.msra.mxu0 %v1326_v51  ;;  %1393 = vmatpush.msra.mxu1 %v1329_v63 }
 0x540   :  { %1375 = vmatpush.msra.mxu0 %v1324_v61  ;;  %1394 = vmatpush.msra.mxu1 %v1327_v49 }
 0x542   :  { %1376 = vmatpush.msra.mxu0 %v1322_v43  ;;  %1395 = vmatpush.msra.mxu1 %v1325_v60  ;;  %v1263_v8 = vpop.permute.xlu0 %1262 }
 0x543   :  { %2192 = vmatmul.msk.f32.vlgmr.msra.gmra.mxu0 %vm340_vm12, %v1258_v22 }
 0x544   :  { %1396 = vmatpush.msra.mxu1 %v1323_v3 }
 0x545   :  { %2193 = vmatmul.msk.f32.vlgmr.msra.gmra.mxu1 %vm340_vm12, %v1258_v22 }
 0x5ae   :  { %v869_v35 = vpop.f32.mrf.mxu0 }
 0x5af   :  { %v870_v33 = vadd.f32 %v869_v35, %v754_v10 }
 0x5b0   :  { %v889_v56 = vpop.f32.mrf.mxu1 }
 0x5b1   :  { %v3935_v11 = vadd.f32 %v889_v56, %v754_v10  ;;  %v2696_v54 = vpack.i.bf16 %v870_v33, %v3236_v12  ;;  %v909_v32 = vmul.f32 %v870_v33, %v3309_v15  ;;  %v912_v25 = vmul.f32 %v870_v33, %v3307_v14 }
 0x5b2   :  { %v904_v53 = vmul.f32 %v870_v33, %v3370_v44  ;;  %v901_v39 = vmul.f32 %v870_v33, %v3337_v30  ;;  %v915_v9 = vmul.f32 %v870_v33, %v3305_v13  ;;  %v898_v60 = vmul.f32 %v870_v33, %v3421_v50 }
 0x5b3   :  { %2697 = vrot.lane.b32.xlu0 %v2696_v54, %s3232_s28  ;;  %v2686_v29 = vpack.i.bf16 %v3935_v11, %v870_v33  ;;  %v910_v36 = vmul.f32 %v3935_v11, %v3358_v40  ;;  %v913_v16 = vmul.f32 %v3935_v11, %v3328_v26  ;;  %v2701_v62 = vpack.i.bf16 0.0, %v3935_v11 }
 0x5b4   :  { %v2721_v4 = vpack.i.bf16 %v904_v53, %v3375_v45  ;;  %v916_v42 = vmul.f32 %v3935_v11, %v3341_v31  ;;  %v2731_v41 = vpack.i.bf16 %v901_v39, %v3330_v27  ;;  %v905_v2 = vmul.f32 %v3935_v11, %v3323_v24 }
 0x5b5   :  { %2687 = vrot.lane.b32.xlu1 %v2686_v29, %s3234_s8  ;;  %v2716_v38 = vpack.i.bf16 %v910_v36, %v909_v32  ;;  %v2711_v48 = vpack.i.bf16 %v913_v16, %v912_v25  ;;  %v902_v0 = vmul.f32 %v3935_v11, %v3332_v28  ;;  %v2741_v35 = vpack.i.bf16 %v898_v60, %v3423_v52 }
 0x5b6   :  { %v2706_v6 = vpack.i.bf16 %v916_v42, %v915_v9  ;;  %v2726_v63 = vpack.i.bf16 %v3375_v45, %v905_v2 }
 0x5b7   :  { %2717 = vrot.lane.b32.xlu2 %v2716_v38, %s3239_s12  ;;  %v2736_v49 = vpack.i.bf16 %v3330_v27, %v902_v0 }
 0x5bb   :  { %2712 = vrot.lane.b32.xlu0 %v2711_v48, %s3238_s11 }
 0x5bd   :  { %2692 = vrot.lane.b32.xlu1 %v2686_v29, %s3235_s9 }
 0x5c0   :  { %v1378_v1 = vpop.f32.mrf.mxu0 }
 0x5c1   :  { %v1379_v55 = vadd.f32 %v1378_v1, %v1263_v8 }
 0x5c2   :  { %v1398_v58 = vpop.f32.mrf.mxu1 }
 0x5c3   :  { %v1401_v34 = vmax.f32 %v1379_v55, 0.0  ;;  %v1399_v20 = vadd.f32 %v1398_v58, %v1263_v8  ;;  %2722 = vrot.lane.b32.xlu0 %v2721_v4, %s3241_s14 }
 0x5c5   :  { %v1402_v59 = vmax.f32 %v1399_v20, 0.0  ;;  %2702 = vrot.lane.b32.xlu1 %v2701_v62, %s3232_s28  ;;  %v2746_v57 = vpack.i.bf16 %v1401_v34, %v3236_v12  ;;  %v3963_v47 = vmul.f32 %v1401_v34, %v3421_v50  ;;  %v1426_v51 = vmul.f32 %v1401_v34, %v3305_v13 }
 0x5c6   :  { %v1420_v43 = vmul.f32 %v1401_v34, %v3309_v15  ;;  %v1423_v54 = vmul.f32 %v1401_v34, %v3307_v14  ;;  %v1415_v38 = vmul.f32 %v1401_v34, %v3370_v44  ;;  %v1412_v48 = vmul.f32 %v1401_v34, %v3337_v30 }
 0x5c7   :  { %2747 = vrot.lane.b32.xlu2 %v2746_v57, %s3234_s8  ;;  %v3966_v7 = vmul.f32 %v1402_v59, %v3415_v46  ;;  %v2751_v17 = vpack.i.bf16 0.0, %v1402_v59  ;;  %v2756_v23 = vpack.i.bf16 %v1402_v59, %v1401_v34  ;;  %v2766_v5 = vpack.i.bf16 %v1426_v51, %v3311_v18 }
 0x5c8   :  { %v1427_v61 = vmul.f32 %v1402_v59, %v3341_v31  ;;  %v2776_v3 = vpack.i.bf16 %v1420_v43, %v3319_v21  ;;  %v1424_v10 = vmul.f32 %v1402_v59, %v3328_v26  ;;  %v1421_v29 = vmul.f32 %v1402_v59, %v3358_v40 }
 0x5c9   :  { %v2931_v37 = vpack.i.bf16 %v3966_v7, %v3963_v47  ;;  %v2771_v33 = vpack.i.bf16 %v1423_v54, %v3313_v19  ;;  %v1416_v36 = vmul.f32 %v1402_v59, %v3323_v24  ;;  %v1413_v16 = vmul.f32 %v1402_v59, %v3332_v28 }
 0x5ca   :  { %v2781_v22 = vpack.i.bf16 %v3311_v18, %v1427_v61  ;;  %v2786_v56 = vpack.i.bf16 %v3313_v19, %v1424_v10  ;;  %v2791_v32 = vpack.i.bf16 %v3319_v21, %v1421_v29 }
 0x5cb   :  { %2732 = vrot.lane.b32.xlu0 %v2731_v41, %s3240_s13  ;;  %v2796_v25 = vpack.i.bf16 %v1416_v36, %v1415_v38  ;;  %v2801_v53 = vpack.i.bf16 %v1413_v16, %v1412_v48 }
 0x5cd   :  { %2707 = vrot.lane.b32.xlu1 %v2706_v6, %s3237_s10 }
 0x5cf   :  { %2752 = vrot.lane.b32.xlu2 %v2751_v17, %s3234_s8 }
 0x5d3   :  { %2757 = vrot.lane.b32.xlu0 %v2756_v23, %s3235_s9 }
 0x5d5   :  { %2727 = vrot.lane.b32.xlu1 %v2726_v63, %s3241_s14 }
 0x5d7   :  { %2767 = vrot.lane.b32.xlu2 %v2766_v5, %s3237_s10 }
 0x5db   :  { %2762 = vrot.lane.b32.xlu0 %v2756_v23, %s3232_s28 }
 0x5dd   :  { %2737 = vrot.lane.b32.xlu1 %v2736_v49, %s3240_s13 }
 0x5df   :  { %2782 = vrot.lane.b32.xlu2 %v2781_v22, %s3237_s10 }
 0x5e3   :  { %2777 = vrot.lane.b32.xlu0 %v2776_v3, %s3239_s12 }
 0x5e5   :  { %2742 = vrot.lane.b32.xlu1 %v2741_v35, %s3229_s1 }
 0x5e7   :  { %2787 = vrot.lane.b32.xlu2 %v2786_v56, %s3238_s11 }
 0x5ed   :  { %2772 = vrot.lane.b32.xlu1 %v2771_v33, %s3238_s11 }
 0x5ef   :  { %2792 = vrot.lane.b32.xlu2 %v2791_v32, %s3239_s12 }
 0x5f5   :  { %2797 = vrot.lane.b32.xlu1 %v2796_v25, %s3241_s14 }
 0x5f7   :  { %2802 = vrot.lane.b32.xlu2 %v2801_v53, %s3240_s13 }
 0x611   :  { %v4010_v8 = vpop.permute.xlu2 %2717 }
 0x621   :  { %v4012_v1 = vpop.permute.xlu2 %2747 }
 0x622   :  { %v2749_v4 = vunpack.i.l.bf16 %v4012_v1 }
 0x625   :  { %v2698_v55 = vpop.permute.xlu0 %2697 }
 0x626   :  { %v2700_v51 = vunpack.i.h.bf16 %v2698_v55  ;;  %v2699_v63 = vunpack.i.l.bf16 %v2698_v55 }
 0x627   :  { %v2688_v58 = vpop.permute.xlu1 %2687 }
 0x628   :  { %v2690_v20 = vunpack.i.h.bf16 %v2688_v58  ;;  %v2689_v62 = vunpack.i.l.bf16 %v2688_v58  ;;  %v927_v61 = vsel %vm105_vm4, %v2699_v63, %v2700_v51 }
 0x629   :  { %v2753_v17 = vpop.permute.xlu2 %2752 }
 0x62a   :  { %v987_v59 = vsel %vm225_vm5, %v2689_v62, %v2690_v20  ;;  %v988_v57 = vsel %vm225_vm5, %v2690_v20, %v2749_v4 }
 0x62b   :  { %v2806_v34 = vpack.i.bf16 %v988_v57, %v987_v59 }
 0x62d   :  { %v4017_v39 = vpop.permute.xlu0 %2712  ;;  %2807 = vrot.lane.b32.xlu0 %v2806_v34, %s3229_s1 }
 0x62e   :  { %v2715_v36 = vunpack.i.h.bf16 %v4017_v39  ;;  %v2714_v38 = vunpack.i.l.bf16 %v4017_v39  ;;  %v2720_v39 = vunpack.i.h.bf16 %v4010_v8 }
 0x62f   :  { %v4020_v42 = vpop.permute.xlu1 %2692 }
 0x630   :  { %v2695_v41 = vunpack.i.h.bf16 %v4020_v42  ;;  %v2694_v9 = vunpack.i.l.bf16 %v4020_v42  ;;  %v976_v48 = vsel %vm213_vm8, %v2714_v38, %v2715_v36 }
 0x631   :  { %v4035_v43 = vpop.permute.xlu2 %2767  ;;  %v2831_v53 = vpack.i.bf16 %v976_v48, %v2714_v38 }
 0x632   :  { %v955_v6 = vsel %vm73_vm6, %v2694_v9, %v2695_v41  ;;  %v2769_v10 = vunpack.i.l.bf16 %v4035_v43 }
 0x633   :  { %v2811_v23 = vpack.i.bf16 %v955_v6, %v2694_v9  ;;  %v2719_v9 = vunpack.i.l.bf16 %v4010_v8 }
 0x635   :  { %v2723_v2 = vpop.permute.xlu0 %2722  ;;  %2812 = vrot.lane.b32.xlu1 %v2811_v23, %s3229_s1 }
 0x636   :  { %v2725_v58 = vunpack.i.h.bf16 %v2723_v2  ;;  %v2724_v20 = vunpack.i.l.bf16 %v2723_v2 }
 0x637   :  { %v4028_v5 = vpop.permute.xlu1 %2702 }
 0x638   :  { %v2704_v0 = vunpack.i.l.bf16 %v4028_v5  ;;  %v949_v57 = vsel %vm184_vm11, %v2724_v20, %v2725_v58 }
 0x63a   :  { %v928_v49 = vsel %vm105_vm4, %v2700_v51, %v2704_v0 }
 0x63b   :  { %v2816_v22 = vpack.i.bf16 %v928_v49, %v927_v61  ;;  %v965_v49 = vsel %vm201_vm9, %v2719_v9, %v2720_v39 }
 0x63d   :  { %v2733_v60 = vpop.permute.xlu0 %2732  ;;  %2817 = vrot.lane.b32.xlu1 %v2816_v22, %s3229_s1 }
 0x63e   :  { %v2735_v51 = vunpack.i.h.bf16 %v2733_v60  ;;  %v2734_v63 = vunpack.i.l.bf16 %v2733_v60 }
 0x63f   :  { %v2708_v3 = vpop.permute.xlu1 %2707 }
 0x640   :  { %v2710_v35 = vunpack.i.h.bf16 %v2708_v3  ;;  %v2709_v56 = vunpack.i.l.bf16 %v2708_v3 }
 0x642   :  { %v998_v54 = vsel %vm237_vm7, %v2709_v56, %v2710_v35  ;;  %v999_v29 = vsel %vm237_vm7, %v2710_v35, %v2769_v10  ;;  %v2750_v10 = vunpack.i.h.bf16 %v4012_v1  ;;  %v2755_v35 = vunpack.i.h.bf16 %v2753_v17 }
 0x643   :  { %v2821_v33 = vpack.i.bf16 %v998_v54, %v2709_v56  ;;  %v2826_v32 = vpack.i.bf16 %v2689_v62, %v999_v29  ;;  %v2754_v56 = vunpack.i.l.bf16 %v2753_v17  ;;  %v938_v54 = vsel %vm172_vm10, %v2734_v63, %v2735_v51 }
 0x645   :  { %2827 = vrot.lane.b32.xlu2 %v2826_v32, %s3229_s1  ;;  %v4044_v16 = vpop.permute.xlu0 %2757  ;;  %2822 = vrot.lane.b32.xlu1 %v2821_v33, %s3229_s1  ;;  %v1498_v29 = vsel %vm225_vm5, %v2750_v10, %v2754_v56  ;;  %v1499_v33 = vsel %vm225_vm5, %v2754_v56, %v2755_v35  ;;  %v2705_v56 = vunpack.i.h.bf16 %v4028_v5 }
 0x646   :  { %v2866_v48 = vpack.i.bf16 %v1499_v33, %v1498_v29  ;;  %v2760_v1 = vunpack.i.h.bf16 %v4044_v16  ;;  %v2759_v17 = vunpack.i.l.bf16 %v4044_v16 }
 0x647   :  { %v2728_v25 = vpop.permute.xlu1 %2727 }
 0x648   :  { %v2729_v55 = vunpack.i.l.bf16 %v2728_v25 }
 0x64a   :  { %v950_v59 = vsel %vm184_vm11, %v2725_v58, %v2729_v55 }
 0x64b   :  { %v2846_v34 = vpack.i.bf16 %v950_v59, %v949_v57  ;;  %v1466_v59 = vsel %vm73_vm6, %v2759_v17, %v2760_v1 }
 0x64c   :  { %v2871_v63 = vpack.i.bf16 %v2760_v1, %v1466_v59 }
 0x64d   :  { %v4048_v4 = vpop.permute.xlu0 %2762  ;;  %2832 = vrot.lane.b32.xlu1 %v2831_v53, %s3229_s1  ;;  %v2783_v53 = vpop.permute.xlu2 %2782 }
 0x64e   :  { %v2764_v35 = vunpack.i.l.bf16 %v4048_v4 }
 0x64f   :  { %v4051_v62 = vpop.permute.xlu1 %2737 }
 0x650   :  { %v2739_v6 = vunpack.i.l.bf16 %v4051_v62 }
 0x652   :  { %v939_v22 = vsel %vm172_vm10, %v2735_v51, %v2739_v6 }
 0x653   :  { %v2851_v60 = vpack.i.bf16 %v939_v22, %v938_v54  ;;  %v2856_v22 = vpack.i.bf16 %v2750_v10, %v2729_v55  ;;  %v1438_v55 = vsel %vm105_vm4, %v2705_v56, %v2764_v35 }
 0x655   :  { %v4058_v23 = vpop.permute.xlu0 %2777  ;;  %2847 = vrot.lane.b32.xlu1 %v2846_v34, %s3229_s1  ;;  %v2730_v34 = vunpack.i.h.bf16 %v2728_v25  ;;  %v2765_v25 = vunpack.i.h.bf16 %v4048_v4 }
 0x656   :  { %v2779_v2 = vunpack.i.l.bf16 %v4058_v23 }
 0x657   :  { %v4062_v61 = vpop.permute.xlu1 %2742  ;;  %v1439_v10 = vsel %vm105_vm4, %v2764_v35, %v2765_v25 }
 0x658   :  { %v966_v8 = vsel %vm201_vm9, %v2720_v39, %v2779_v2  ;;  %v2785_v2 = vunpack.i.h.bf16 %v2783_v53 }
 0x659   :  { %v2841_v3 = vpack.i.bf16 %v966_v8, %v965_v49  ;;  %v2784_v49 = vunpack.i.l.bf16 %v2783_v53 }
 0x65b   :  { %2842 = vrot.lane.b32.xlu0 %v2841_v3, %s3229_s1  ;;  %v2770_v3 = vunpack.i.h.bf16 %v4035_v43  ;;  %v899_v43 = vmul.f32 %v3935_v11, %v3415_v46  ;;  %v2780_v11 = vunpack.i.h.bf16 %v4058_v23 }
 0x65d   :  { %2852 = vrot.lane.b32.xlu1 %v2851_v60, %s3229_s1  ;;  %v1509_v54 = vsel %vm237_vm7, %v2770_v3, %v2784_v49  ;;  %v1510_v60 = vsel %vm237_vm7, %v2784_v49, %v2785_v2  ;;  %v2861_v33 = vpack.i.bf16 %v2759_v17, %v899_v43  ;;  %v2876_v17 = vpack.i.bf16 %v2770_v3, %v2695_v41 }
 0x65e   :  { %v2891_v29 = vpack.i.bf16 %v1510_v60, %v1509_v54  ;;  %v2921_v3 = vpack.i.bf16 %v3423_v52, %v2765_v25 }
 0x65f   :  { %v4075_v32 = vpop.permute.xlu1 %2772 }
 0x660   :  { %v2774_v38 = vunpack.i.l.bf16 %v4075_v32  ;;  %v2775_v4 = vunpack.i.h.bf16 %v4075_v32  ;;  %v2194_v32 = vld [vmem:[%s4430_s2 + $0x8] sm:$0xff] }
 0x662   :  { %v977_v58 = vsel %vm213_vm8, %v2715_v36, %v2774_v38  ;;  %v2911_v38 = vpack.i.bf16 %v1439_v10, %v1438_v55 }
 0x663   :  { %v2836_v20 = vpack.i.bf16 %v2719_v9, %v977_v58  ;;  %2867 = vrot.lane.b32.xlu0 %v2866_v48, %s3229_s1  ;;  %v2788_v9 = vpop.permute.xlu2 %2787 }
 0x664   :  { %v2790_v48 = vunpack.i.h.bf16 %v2788_v9  ;;  %v2789_v53 = vunpack.i.l.bf16 %v2788_v9  ;;  %v2886_v9 = vpack.i.bf16 %v2780_v11, %v2704_v0 }
 0x665   :  { %2837 = vrot.lane.b32.xlu2 %v2836_v20, %s3229_s1 }
 0x666   :  { %v1487_v58 = vsel %vm213_vm8, %v2775_v4, %v2789_v53  ;;  %v1488_v20 = vsel %vm213_vm8, %v2789_v53, %v2790_v48 }
 0x667   :  { %v4084_v57 = vpop.permute.xlu1 %2797  ;;  %v2896_v59 = vpack.i.bf16 %v1488_v20, %v1487_v58 }
 0x668   :  { %v2800_v39 = vunpack.i.h.bf16 %v4084_v57  ;;  %v2799_v51 = vunpack.i.l.bf16 %v4084_v57 }
 0x66a   :  { %v1460_v16 = vsel %vm184_vm11, %v2730_v34, %v2799_v51  ;;  %v1461_v36 = vsel %vm184_vm11, %v2799_v51, %v2800_v39 }
 0x66b   :  { %v2906_v8 = vpack.i.bf16 %v1461_v36, %v1460_v16  ;;  %2872 = vrot.lane.b32.xlu0 %v2871_v63, %s3229_s1  ;;  %v2793_v1 = vpop.permute.xlu2 %2792  ;;  %v2881_v36 = vpack.i.bf16 %v2775_v4, %v2739_v6 }
 0x66c   :  { %v2795_v57 = vunpack.i.h.bf16 %v2793_v1  ;;  %v2794_v34 = vunpack.i.l.bf16 %v2793_v1 }
 0x66d   :  { %2907 = vrot.lane.b32.xlu1 %v2906_v8, %s3229_s1  ;;  %2857 = vrot.lane.b32.xlu2 %v2856_v22, %s3229_s1  ;;  %v2740_v22 = vunpack.i.h.bf16 %v4051_v62 }
 0x66e   :  { %v1476_v51 = vsel %vm201_vm9, %v2780_v11, %v2794_v34  ;;  %v1477_v2 = vsel %vm201_vm9, %v2794_v34, %v2795_v57 }
 0x66f   :  { %v2901_v23 = vpack.i.bf16 %v1477_v2, %v1476_v51 }
 0x673   :  { %2892 = vrot.lane.b32.xlu0 %v2891_v29, %s3229_s1  ;;  %v2803_v63 = vpop.permute.xlu2 %2802 }
 0x674   :  { %v2805_v49 = vunpack.i.h.bf16 %v2803_v63  ;;  %v2804_v16 = vunpack.i.l.bf16 %v2803_v63 }
 0x675   :  { %2912 = vrot.lane.b32.xlu1 %v2911_v38, %s3229_s1  ;;  %2862 = vrot.lane.b32.xlu2 %v2861_v33, %s3229_s1 }
 0x676   :  { %v1450_v42 = vsel %vm172_vm10, %v2804_v16, %v2805_v49  ;;  %v1449_v6 = vsel %vm172_vm10, %v2740_v22, %v2804_v16 }
 0x677   :  { %v2926_v41 = vpack.i.bf16 %v2805_v49, %v1450_v42  ;;  %v2916_v8 = vpack.i.bf16 %v1449_v6, %v2800_v39 }
 0x67b   :  { %2897 = vrot.lane.b32.xlu0 %v2896_v59, %s3229_s1 }
 0x67d   :  { %1515 = vperm.xlu1 %2936, %v2194_v32   ;;  %2877 = vrot.lane.b32.xlu2 %v2876_v17, %s3229_s1 }
 0x683   :  { %2902 = vrot.lane.b32.xlu0 %v2901_v23, %s3229_s1 }
 0x685   :  { %1736 = vrot.lane.b32.xlu1 %v3313_v19, %s3238_s11  ;;  %2882 = vrot.lane.b32.xlu2 %v2881_v36, %s3229_s1 }
 0x68b   :  { %2927 = vrot.lane.b32.xlu0 %v2926_v41, %s3229_s1 }
 0x68d   :  { %2887 = vrot.lane.b32.xlu2 %v2886_v9, %s3229_s1 }
 0x693   :  { %2932 = vrot.lane.b32.xlu0 %v2931_v37, %s3229_s1 }
 0x695   :  { %2917 = vrot.lane.b32.xlu2 %v2916_v8, %s3229_s1 }
 0x69b   :  { %1758 = vrot.lane.b32.xlu0 %v3311_v18, %s3237_s10 }
 0x69d   :  { %2922 = vrot.lane.b32.xlu2 %v2921_v3, %s3229_s1  ;;  %v2745_v3 = vunpack.i.h.bf16 %v4062_v61 }
 0x69f   :  { %v2828_v47 = vpop.permute.xlu2 %2827  ;;  %v2808_v7 = vpop.permute.xlu0 %2807 }
 0x6a0   :  { %v2830_v37 = vunpack.i.h.bf16 %v2828_v47  ;;  %v2829_v62 = vunpack.i.l.bf16 %v2828_v47  ;;  %v2810_v25 = vunpack.i.h.bf16 %v2808_v7  ;;  %v2809_v35 = vunpack.i.l.bf16 %v2808_v7 }
 0x6a2   :  { %v1080_v10 = vsel %vm144_vm2, %v2830_v37, %v2809_v35  ;;  %v1081_v29 = vsel %vm144_vm2, %v2809_v35, %v2810_v25 }
 0x6a3   :  { %1725 = vrot.lane.b32.xlu0 %v3319_v21, %s3239_s12 }
 0x6a5   :  { %1747 = vrot.lane.b32.xlu2 %v3236_v12, %s3234_s8 }
 0x6a7   :  { %v4145_v5 = vpop.permute.xlu1 %2812 }
 0x6a8   :  { %v2815_v17 = vunpack.i.h.bf16 %v4145_v5  ;;  %v2814_v57 = vunpack.i.l.bf16 %v4145_v5  ;;  %v2744_v5 = vunpack.i.l.bf16 %v4062_v61 }
 0x6aa   :  { %v1074_v41 = vsel %vm144_vm2, %v2814_v57, %v2815_v17 }
 0x6af   :  { %v4147_v0 = vpop.permute.xlu1 %2817 }
 0x6b0   :  { %v2820_v9 = vunpack.i.h.bf16 %v4147_v0  ;;  %v2819_v22 = vunpack.i.l.bf16 %v4147_v0  ;;  %v1066_v0 = vsel %vm144_vm2, %v2744_v5, %v2745_v3 }
 0x6b7   :  { %v2823_v39 = vpop.permute.xlu1 %2822 }
 0x6b8   :  { %v2825_v56 = vunpack.i.h.bf16 %v2823_v39  ;;  %v2824_v54 = vunpack.i.l.bf16 %v2823_v39  ;;  %v1068_v39 = vsel %vm144_vm2, %v2819_v22, %v2820_v9 }
 0x6ba   :  { %v1082_v60 = vsel %vm144_vm2, %v2824_v54, %v2825_v56  ;;  %v1083_v55 = vsel %vm144_vm2, %v2825_v56, %v2829_v62 }
 0x6bb   :  { %1112 = vmatpush.msrb.mxu2 %v1082_v60  ;;  %1132 = vmatpush.msrb.mxu3 %v1083_v55  ;;  %v4172_v60 = vld [vmem:[#allocation3 + $0x18] sm:$0xff] }
 0x6bd   :  { %1113 = vmatpush.msrb.mxu2 %v1080_v10  ;;  %1133 = vmatpush.msrb.mxu3 %v1081_v29 }
 0x6bf   :  { %v2833_v43 = vpop.permute.xlu1 %2832  ;;  %v2838_v4 = vpop.permute.xlu2 %2837 }
 0x6c0   :  { %v2835_v33 = vunpack.i.h.bf16 %v2833_v43  ;;  %v2834_v38 = vunpack.i.l.bf16 %v2833_v43  ;;  %v2839_v48 = vunpack.i.l.bf16 %v2838_v4  ;;  %v2840_v34 = vunpack.i.h.bf16 %v2838_v4 }
 0x6c2   :  { %v1078_v53 = vsel %vm144_vm2, %v2834_v38, %v2835_v33  ;;  %v1079_v1 = vsel %vm144_vm2, %v2835_v33, %v2839_v48 }
 0x6c3   :  { %1114 = vmatpush.msrb.mxu2 %v1078_v53  ;;  %1134 = vmatpush.msrb.mxu3 %v1079_v1 }
 0x6c7   :  { %v2848_v58 = vpop.permute.xlu1 %2847  ;;  %v2858_v20 = vpop.permute.xlu2 %2857 }
 0x6c8   :  { %v2850_v2 = vunpack.i.h.bf16 %v2848_v58  ;;  %v2849_v23 = vunpack.i.l.bf16 %v2848_v58  ;;  %v2859_v37 = vunpack.i.l.bf16 %v2858_v20  ;;  %v2860_v53 = vunpack.i.h.bf16 %v2858_v20 }
 0x6ca   :  { %v1072_v8 = vsel %vm144_vm2, %v2849_v23, %v2850_v2  ;;  %v1073_v35 = vsel %vm144_vm2, %v2850_v2, %v2859_v37 }
 0x6cd   :  { %v2843_v59 = vpop.permute.xlu0 %2842 }
 0x6ce   :  { %v2845_v11 = vunpack.i.h.bf16 %v2843_v59  ;;  %v2844_v32 = vunpack.i.l.bf16 %v2843_v59 }
 0x6cf   :  { %v4157_v51 = vpop.permute.xlu2 %2862  ;;  %v2853_v63 = vpop.permute.xlu1 %2852 }
 0x6d0   :  { %v1076_v49 = vsel %vm144_vm2, %v2840_v34, %v2844_v32  ;;  %v1077_v16 = vsel %vm144_vm2, %v2844_v32, %v2845_v11  ;;  %v2855_v36 = vunpack.i.h.bf16 %v2853_v63  ;;  %v2854_v42 = vunpack.i.l.bf16 %v2853_v63 }
 0x6d1   :  { %1115 = vmatpush.msrb.mxu2 %v1076_v49  ;;  %1135 = vmatpush.msrb.mxu3 %v1077_v16  ;;  %v2864_v38 = vunpack.i.l.bf16 %v4157_v51  ;;  %v2865_v5 = vunpack.i.h.bf16 %v4157_v51 }
 0x6d2   :  { %v1070_v7 = vsel %vm144_vm2, %v2854_v42, %v2855_v36 }
 0x6d3   :  { %1116 = vmatpush.msrb.mxu2 %v1074_v41 }
 0x6d5   :  { %v2868_v6 = vpop.permute.xlu0 %2867  ;;  %1117 = vmatpush.msrb.mxu2 %v1072_v8 }
 0x6d6   :  { %v2869_v43 = vunpack.i.l.bf16 %v2868_v6  ;;  %v2870_v11 = vunpack.i.h.bf16 %v2868_v6 }
 0x6d7   :  { %v2878_v47 = vpop.permute.xlu2 %2877  ;;  %1118 = vmatpush.msrb.mxu2 %v1070_v7 }
 0x6d8   :  { %v2879_v62 = vunpack.i.l.bf16 %v2878_v47  ;;  %v2880_v4 = vunpack.i.h.bf16 %v2878_v47  ;;  %v1589_v32 = vsel %vm144_vm2, %v2860_v53, %v2869_v43  ;;  %v1590_v23 = vsel %vm144_vm2, %v2869_v43, %v2870_v11 }
 0x6d9   :  { %1119 = vmatpush.msrb.mxu2 %v1068_v39 }
 0x6da   :  { %v1075_v25 = vsel %vm144_vm2, %v2815_v17, %v2879_v62  ;;  %v1067_v17 = vsel %vm144_vm2, %v2745_v3, %v2864_v38 }
 0x6db   :  { %1136 = vmatpush.msrb.mxu3 %v1075_v25  ;;  %1120 = vmatpush.msrb.mxu2 %v1066_v0 }
 0x6dc   :  { %2188 = vmatmul.msk.f32.vlgmr.msrb.gmra.mxu2 %vm340_vm12, %v4172_v60 }
 0x6dd   :  { %v2873_v56 = vpop.permute.xlu0 %2872  ;;  %1137 = vmatpush.msrb.mxu3 %v1073_v35 }
 0x6de   :  { %v2875_v41 = vunpack.i.h.bf16 %v2873_v56  ;;  %v2874_v22 = vunpack.i.l.bf16 %v2873_v56 }
 0x6df   :  { %v2883_v61 = vpop.permute.xlu2 %2882  ;;  %v2908_v49 = vpop.permute.xlu1 %2907 }
 0x6e0   :  { %v2884_v54 = vunpack.i.l.bf16 %v2883_v61  ;;  %v2885_v63 = vunpack.i.h.bf16 %v2883_v61  ;;  %v2910_v47 = vunpack.i.h.bf16 %v2908_v49  ;;  %v2909_v7 = vunpack.i.l.bf16 %v2908_v49 }
 0x6e1   :  { %v1583_v0 = vsel %vm144_vm2, %v2865_v5, %v2874_v22  ;;  %v1584_v35 = vsel %vm144_vm2, %v2874_v22, %v2875_v41 }
 0x6e2   :  { %v1071_v55 = vsel %vm144_vm2, %v2855_v36, %v2884_v54  ;;  %v1581_v61 = vsel %vm144_vm2, %v2909_v7, %v2910_v47 }
 0x6e3   :  { %1138 = vmatpush.msrb.mxu3 %v1071_v55 }
 0x6e5   :  { %v2893_v10 = vpop.permute.xlu0 %2892 }
 0x6e6   :  { %v2894_v29 = vunpack.i.l.bf16 %v2893_v10  ;;  %v2895_v1 = vunpack.i.h.bf16 %v2893_v10 }
 0x6e7   :  { %v2888_v33 = vpop.permute.xlu2 %2887  ;;  %v2913_v25 = vpop.permute.xlu1 %2912 }
 0x6e8   :  { %v2889_v48 = vunpack.i.l.bf16 %v2888_v33  ;;  %v1591_v58 = vsel %vm144_vm2, %v2880_v4, %v2894_v29  ;;  %v1592_v34 = vsel %vm144_vm2, %v2894_v29, %v2895_v1  ;;  %v2890_v6 = vunpack.i.h.bf16 %v2888_v33 }
 0x6e9   :  { %1621 = vmatpush.msra.mxu2 %v1591_v58  ;;  %v2915_v54 = vunpack.i.h.bf16 %v2913_v25  ;;  %v2914_v55 = vunpack.i.l.bf16 %v2913_v25 }
 0x6ea   :  { %v1069_v59 = vsel %vm144_vm2, %v2820_v9, %v2889_v48 }
 0x6eb   :  { %1139 = vmatpush.msrb.mxu3 %v1069_v59  ;;  %1622 = vmatpush.msra.mxu2 %v1589_v32  ;;  %v1577_v53 = vsel %vm144_vm2, %v2914_v55, %v2915_v54 }
 0x6ed   :  { %v2898_v57 = vpop.permute.xlu0 %2897  ;;  %1140 = vmatpush.msrb.mxu3 %v1067_v17  ;;  %v1511_v17 = vld [vmem:[#allocation3 + $0x8] sm:$0xff] }
 0x6ee   :  { %v2900_v2 = vunpack.i.h.bf16 %v2898_v57  ;;  %v2899_v20 = vunpack.i.l.bf16 %v2898_v57  ;;  %2189 = vmatmul.msk.f32.vlgmr.msrb.gmra.mxu3 %vm340_vm12, %v4172_v60 }
 0x6ef   :  { %1641 = vmatpush.msra.mxu3 %v1592_v34  ;;  %v2918_v42 = vpop.permute.xlu2 %2917 }
 0x6f0   :  { %v1587_v16 = vsel %vm144_vm2, %v2885_v63, %v2899_v20  ;;  %v1588_v36 = vsel %vm144_vm2, %v2899_v20, %v2900_v2  ;;  %v2919_v37 = vunpack.i.l.bf16 %v2918_v42  ;;  %v2920_v29 = vunpack.i.h.bf16 %v2918_v42  ;;  %v1516_v20 = vpop.permute.xlu1 %1515 }
 0x6f1   :  { %1642 = vmatpush.msra.mxu3 %v1590_v23  ;;  %1623 = vmatpush.msra.mxu2 %v1587_v16 }
 0x6f2   :  { %v1582_v51 = vsel %vm144_vm2, %v2910_v47, %v2919_v37 }
 0x6f3   :  { %1643 = vmatpush.msra.mxu3 %v1588_v36 }
 0x6f5   :  { %v2903_v9 = vpop.permute.xlu0 %2902 }
 0x6f6   :  { %v2905_v8 = vunpack.i.h.bf16 %v2903_v9  ;;  %v2904_v3 = vunpack.i.l.bf16 %v2903_v9 }
 0x6f7   :  { %v2923_v56 = vpop.permute.xlu2 %2922 }
 0x6f8   :  { %v1585_v62 = vsel %vm144_vm2, %v2890_v6, %v2904_v3  ;;  %v1586_v39 = vsel %vm144_vm2, %v2904_v3, %v2905_v8  ;;  %v2924_v43 = vunpack.i.l.bf16 %v2923_v56  ;;  %v2925_v59 = vunpack.i.h.bf16 %v2923_v56 }
 0x6f9   :  { %1624 = vmatpush.msra.mxu2 %v1585_v62  ;;  %1644 = vmatpush.msra.mxu3 %v1586_v39 }
 0x6fa   :  { %v1578_v1 = vsel %vm144_vm2, %v2915_v54, %v2924_v43  ;;  %v1737_v54 = vpop.permute.xlu1 %1736 }
 0x6fb   :  { %1625 = vmatpush.msra.mxu2 %v1583_v0  ;;  %1645 = vmatpush.msra.mxu3 %v1584_v35 }
 0x6fd   :  { %v2928_v10 = vpop.permute.xlu0 %2927  ;;  %1626 = vmatpush.msra.mxu2 %v1581_v61  ;;  %1646 = vmatpush.msra.mxu3 %v1582_v51 }
 0x6fe   :  { %v2930_v4 = vunpack.i.h.bf16 %v2928_v10  ;;  %v2929_v33 = vunpack.i.l.bf16 %v2928_v10 }
 0x6ff   :  { %v1748_v61 = vpop.permute.xlu2 %1747 }
 0x700   :  { %v1579_v38 = vsel %vm144_vm2, %v2920_v29, %v2929_v33  ;;  %v1580_v48 = vsel %vm144_vm2, %v2929_v33, %v2930_v4 }
 0x701   :  { %1627 = vmatpush.msra.mxu2 %v1579_v38  ;;  %1647 = vmatpush.msra.mxu3 %v1580_v48 }
 0x703   :  { %1628 = vmatpush.msra.mxu2 %v1577_v53  ;;  %1648 = vmatpush.msra.mxu3 %v1578_v1 }
 0x705   :  { %v2933_v58 = vpop.permute.xlu0 %2932 }
 0x706   :  { %v2935_v11 = vunpack.i.h.bf16 %v2933_v58  ;;  %v2934_v32 = vunpack.i.l.bf16 %v2933_v58 }
 0x708   :  { %v1575_v57 = vsel %vm144_vm2, %v2925_v59, %v2934_v32  ;;  %v1576_v34 = vsel %vm144_vm2, %v2934_v32, %v2935_v11 }
 0x709   :  { %1629 = vmatpush.msra.mxu2 %v1575_v57  ;;  %1649 = vmatpush.msra.mxu3 %v1576_v34 }
 0x70a   :  { %2195 = vmatmul.msk.f32.vlgmr.msra.gmra.mxu2 %vm340_vm12, %v1511_v17  ;;  %2196 = vmatmul.msk.f32.vlgmr.msra.gmra.mxu3 %vm340_vm12, %v1511_v17 }
 0x70d   :  { %v1759_v51 = vpop.permute.xlu0 %1758 }
 0x715   :  { %v1726_v10 = vpop.permute.xlu0 %1725 }
 0x75f   :  { %v4203_v63 = vpop.f32.mrf.mxu2 }
 0x771   :  { %v4205_v2 = vpop.f32.mrf.mxu3 }
 0x78d   :  { %v1631_v23 = vpop.f32.mrf.mxu2  ;;  %v1651_v49 = vpop.f32.mrf.mxu3 }
 0x78e   :  { %v4207_v16 = vadd.f32 %v1631_v23, %v1516_v20  ;;  %v4209_v36 = vadd.f32 %v1651_v49, %v1516_v20 }
 0x790   :  { %v2937_v42 = vpack.i.bf16 %v4209_v36, %v4207_v16  ;;  %v1677_v41 = vmul.f32 %v4207_v16, %v3305_v13  ;;  %v1678_v9 = vmul.f32 %v4209_v36, %v3341_v31  ;;  %v1674_v22 = vmul.f32 %v4207_v16, %v3307_v14 }
 0x791   :  { %v1675_v6 = vmul.f32 %v4209_v36, %v3328_v26  ;;  %v1671_v5 = vmul.f32 %v4207_v16, %v3309_v15  ;;  %v1672_v47 = vmul.f32 %v4209_v36, %v3358_v40  ;;  %v1667_v37 = vmul.f32 %v4209_v36, %v3323_v24 }
 0x792   :  { %2938 = vrot.lane.b32.xlu1 %v2937_v42, %s3234_s8  ;;  %v2947_v8 = vpack.i.bf16 %v1678_v9, %v1677_v41  ;;  %v1663_v62 = vmul.f32 %v4207_v16, %v3337_v30  ;;  %v1666_v39 = vmul.f32 %v4207_v16, %v3370_v44  ;;  %v2972_v35 = vpack.i.bf16 %v4207_v16, %v3236_v12 }
 0x793   :  { %v2952_v3 = vpack.i.bf16 %v1675_v6, %v1674_v22  ;;  %v2957_v7 = vpack.i.bf16 %v1672_v47, %v1671_v5  ;;  %v1664_v56 = vmul.f32 %v4209_v36, %v3332_v28 }
 0x794   :  { %2948 = vrot.lane.b32.xlu2 %v2947_v8, %s3237_s10  ;;  %v2967_v25 = vpack.i.bf16 %v1663_v62, %v3330_v27  ;;  %v2962_v0 = vpack.i.bf16 %v1666_v39, %v3375_v45 }
 0x795   :  { %2953 = vrot.lane.b32.xlu0 %v2952_v3, %s3238_s11 }
 0x79a   :  { %2943 = vrot.lane.b32.xlu1 %v2937_v42, %s3235_s9 }
 0x79c   :  { %2958 = vrot.lane.b32.xlu2 %v2957_v7, %s3239_s12 }
 0x79d   :  { %1709 = vrot.lane.b32.xlu0 %v1667_v37, %s3241_s14 }
 0x7a2   :  { %2968 = vrot.lane.b32.xlu1 %v2967_v25, %s3240_s13 }
 0x7a4   :  { %2963 = vrot.lane.b32.xlu2 %v2962_v0, %s3241_s14 }
 0x7a5   :  { %2973 = vrot.lane.b32.xlu0 %v2972_v35, %s3232_s28 }
 0x7aa   :  { %1687 = vrot.lane.b32.xlu1 %v4209_v36, %s3232_s28 }
 0x7ac   :  { %1698 = vrot.lane.b32.xlu2 %v1664_v56, %s3240_s13 }
 0x7ee   :  { %v2949_v55 = vpop.permute.xlu2 %2948 }
 0x7ef   :  { %v2951_v9 = vunpack.i.h.bf16 %v2949_v55  ;;  %v2950_v22 = vunpack.i.l.bf16 %v2949_v55 }
 0x7f1   :  { %v1760_v3 = vsel %vm237_vm7, %v2950_v22, %v2951_v9 }
 0x7f2   :  { %v2992_v7 = vpack.i.bf16 %v1760_v3, %v2950_v22 }
 0x7f6   :  { %v2959_v33 = vpop.permute.xlu2 %2958 }
 0x7f7   :  { %v2961_v58 = vunpack.i.h.bf16 %v2959_v33  ;;  %v2960_v59 = vunpack.i.l.bf16 %v2959_v33 }
 0x7f9   :  { %v1728_v32 = vsel %vm201_vm9, %v2961_v58, %v1726_v10  ;;  %v1727_v17 = vsel %vm201_vm9, %v2960_v59, %v2961_v58 }
 0x7fa   :  { %v3012_v49 = vpack.i.bf16 %v1728_v32, %v1727_v17  ;;  %v2197_v32 = vld [vmem:[%s4430_s2 + $0x10] sm:$0xff] }
 0x7fe   :  { %v2964_v42 = vpop.permute.xlu2 %2963 }
 0x7ff   :  { %v2966_v6 = vunpack.i.h.bf16 %v2964_v42 }
 0x804   :  { %v2939_v29 = vpop.permute.xlu1 %2938 }
 0x805   :  { %v2941_v43 = vunpack.i.h.bf16 %v2939_v29  ;;  %v2940_v4 = vunpack.i.l.bf16 %v2939_v29 }
 0x806   :  { %v1699_v35 = vpop.permute.xlu2 %1698 }
 0x807   :  { %v1750_v38 = vsel %vm225_vm5, %v2941_v43, %v1748_v61  ;;  %v1749_v48 = vsel %vm225_vm5, %v2940_v4, %v2941_v43  ;;  %v2954_v53 = vpop.permute.xlu0 %2953 }
 0x808   :  { %v2977_v1 = vpack.i.bf16 %v1750_v38, %v1749_v48  ;;  %v2956_v25 = vunpack.i.h.bf16 %v2954_v53  ;;  %v2955_v0 = vunpack.i.l.bf16 %v2954_v53  ;;  %v1761_v53 = vsel %vm237_vm7, %v2951_v9, %v1759_v51 }
 0x80a   :  { %2978 = vrot.lane.b32.xlu1 %v2977_v1, %s3229_s1  ;;  %v1738_v10 = vsel %vm213_vm8, %v2955_v0, %v2956_v25  ;;  %v2997_v1 = vpack.i.bf16 %v2940_v4, %v1761_v53  ;;  %v1739_v17 = vsel %vm213_vm8, %v2956_v25, %v1737_v54  ;;  %v1660_v4 = vmul.f32 %v4207_v16, %v3421_v50 }
 0x80b   :  { %v3002_v43 = vpack.i.bf16 %v1738_v10, %v2955_v0  ;;  %v3007_v51 = vpack.i.bf16 %v2960_v59, %v1739_v17  ;;  %v1661_v16 = vmul.f32 %v4209_v36, %v3415_v46 }
 0x80c   :  { %v2944_v11 = vpop.permute.xlu1 %2943 }
 0x80d   :  { %v2946_v57 = vunpack.i.h.bf16 %v2944_v11  ;;  %v2945_v34 = vunpack.i.l.bf16 %v2944_v11 }
 0x80f   :  { %v1717_v20 = vsel %vm73_vm6, %v2945_v34, %v2946_v57  ;;  %v1710_v23 = vpop.permute.xlu0 %1709 }
 0x810   :  { %v2982_v41 = vpack.i.bf16 %v1717_v20, %v2945_v34  ;;  %v1712_v5 = vsel %vm184_vm11, %v2966_v6, %v1710_v23  ;;  %v2965_v20 = vunpack.i.l.bf16 %v2964_v42 }
 0x811   :  { %v3022_v37 = vpack.i.bf16 %v1710_v23, %v1712_v5  ;;  %v3037_v23 = vpack.i.bf16 %v1660_v4, %v3423_v52 }
 0x812   :  { %2983 = vrot.lane.b32.xlu2 %v2982_v41, %s3229_s1  ;;  %3013 = vrot.lane.b32.xlu1 %v3012_v49, %s3229_s1  ;;  %v1711_v49 = vsel %vm184_vm11, %v2965_v20, %v2966_v6 }
 0x813   :  { %v3017_v54 = vpack.i.bf16 %v1711_v49, %v2946_v57 }
 0x814   :  { %v2969_v8 = vpop.permute.xlu1 %2968 }
 0x815   :  { %v2971_v38 = vunpack.i.h.bf16 %v2969_v8  ;;  %v2970_v48 = vunpack.i.l.bf16 %v2969_v8 }
 0x817   :  { %v2974_v47 = vpop.permute.xlu0 %2973  ;;  %v1701_v58 = vsel %vm172_vm10, %v2971_v38, %v1699_v35  ;;  %v1700_v11 = vsel %vm172_vm10, %v2970_v48, %v2971_v38 }
 0x818   :  { %v2976_v62 = vunpack.i.h.bf16 %v2974_v47  ;;  %v2975_v39 = vunpack.i.l.bf16 %v2974_v47  ;;  %v3032_v34 = vpack.i.bf16 %v1701_v58, %v1700_v11 }
 0x81a   :  { %v1689_v56 = vsel %vm105_vm4, %v2975_v39, %v2976_v62  ;;  %2993 = vrot.lane.b32.xlu2 %v2992_v7, %s3229_s1  ;;  %3023 = vrot.lane.b32.xlu1 %v3022_v37, %s3229_s1 }
 0x81b   :  { %v2987_v61 = vpack.i.bf16 %v1689_v56, %v1699_v35 }
 0x81c   :  { %v1688_v55 = vpop.permute.xlu1 %1687 }
 0x81d   :  { %2988 = vrot.lane.b32.xlu0 %v2987_v61, %s3229_s1  ;;  %v1690_v29 = vsel %vm105_vm4, %v2976_v62, %v1688_v55 }
 0x81e   :  { %v3027_v33 = vpack.i.bf16 %v1688_v55, %v1690_v29 }
 0x822   :  { %3003 = vrot.lane.b32.xlu2 %v3002_v43, %s3229_s1  ;;  %3028 = vrot.lane.b32.xlu1 %v3027_v33, %s3229_s1 }
 0x825   :  { %2998 = vrot.lane.b32.xlu0 %v2997_v1, %s3229_s1 }
 0x82a   :  { %1766 = vperm.xlu1 %2936, %v2197_v32   ;;  %3033 = vrot.lane.b32.xlu2 %v3032_v34, %s3229_s1 }
 0x82d   :  { %3008 = vrot.lane.b32.xlu0 %v3007_v51, %s3229_s1 }
 0x832   :  { %1987 = vrot.lane.b32.xlu1 %v3313_v19, %s3238_s11  ;;  %3038 = vrot.lane.b32.xlu2 %v3037_v23, %s3229_s1 }
 0x835   :  { %3018 = vrot.lane.b32.xlu0 %v3017_v54, %s3229_s1 }
 0x83a   :  { %1998 = vrot.lane.b32.xlu2 %v3236_v12, %s3234_s8 }
 0x83d   :  { %1776 = vrot.lane.b32.xlu0 %v1661_v16, %s3229_s1 }
 0x845   :  { %2009 = vrot.lane.b32.xlu0 %v3311_v18, %s3237_s10 }
 0x84d   :  { %1976 = vrot.lane.b32.xlu0 %v3319_v21, %s3239_s12 }
 0x86c   :  { %v2984_v19 = vpop.permute.xlu2 %2983 }
 0x86d   :  { %v2986_v56 = vunpack.i.h.bf16 %v2984_v19  ;;  %v2985_v61 = vunpack.i.l.bf16 %v2984_v19 }
 0x86f   :  { %v1834_v53 = vsel %vm144_vm2, %v2985_v61, %v2986_v56 }
 0x874   :  { %v2994_v59 = vpop.permute.xlu2 %2993 }
 0x875   :  { %v2996_v42 = vunpack.i.h.bf16 %v2994_v59  ;;  %v2995_v57 = vunpack.i.l.bf16 %v2994_v59 }
 0x877   :  { %v1842_v41 = vsel %vm144_vm2, %v2995_v57, %v2996_v42 }
 0x878   :  { %1872 = vmatpush.msrb.mxu0 %v1842_v41 }
 0x87c   :  { %v2979_v9 = vpop.permute.xlu1 %2978  ;;  %v3004_v8 = vpop.permute.xlu2 %3003 }
 0x87d   :  { %v3006_v36 = vunpack.i.h.bf16 %v3004_v8  ;;  %v3005_v3 = vunpack.i.l.bf16 %v3004_v8  ;;  %v2981_v47 = vunpack.i.h.bf16 %v2979_v9  ;;  %v2980_v7 = vunpack.i.l.bf16 %v2979_v9 }
 0x87f   :  { %v1838_v39 = vsel %vm144_vm2, %v3005_v3, %v3006_v36  ;;  %v1841_v25 = vsel %vm144_vm2, %v2980_v7, %v2981_v47 }
 0x884   :  { %v3014_v6 = vpop.permute.xlu1 %3013  ;;  %v3034_v35 = vpop.permute.xlu2 %3033 }
 0x885   :  { %v3016_v10 = vunpack.i.h.bf16 %v3014_v6  ;;  %v3015_v29 = vunpack.i.l.bf16 %v3014_v6  ;;  %v3036_v58 = vunpack.i.h.bf16 %v3034_v35  ;;  %v3035_v11 = vunpack.i.l.bf16 %v3034_v35 }
 0x887   :  { %v1837_v1 = vsel %vm144_vm2, %v3015_v29, %v3016_v10 }
 0x88c   :  { %v3024_v0 = vpop.permute.xlu1 %3023  ;;  %v3039_v4 = vpop.permute.xlu2 %3038 }
 0x88d   :  { %v3026_v34 = vunpack.i.h.bf16 %v3024_v0  ;;  %v3025_v51 = vunpack.i.l.bf16 %v3024_v0  ;;  %v3041_v59 = vunpack.i.h.bf16 %v3039_v4  ;;  %v3040_v57 = vunpack.i.l.bf16 %v3039_v4 }
 0x88f   :  { %v2989_v22 = vpop.permute.xlu0 %2988  ;;  %v1833_v6 = vsel %vm144_vm2, %v3025_v51, %v3026_v34  ;;  %v1826_v47 = vsel %vm144_vm2, %v3040_v57, %v3041_v59 }
 0x890   :  { %v2990_v49 = vunpack.i.l.bf16 %v2989_v22  ;;  %v2991_v41 = vunpack.i.h.bf16 %v2989_v22 }
 0x894   :  { %v3029_v32 = vpop.permute.xlu1 %3028 }
 0x895   :  { %v3030_v54 = vunpack.i.l.bf16 %v3029_v32  ;;  %v3031_v9 = vunpack.i.h.bf16 %v3029_v32 }
 0x897   :  { %v2999_v5 = vpop.permute.xlu0 %2998  ;;  %v1828_v8 = vsel %vm144_vm2, %v2991_v41, %v3030_v54 }
 0x898   :  { %v3001_v18 = vunpack.i.h.bf16 %v2999_v5  ;;  %v3000_v37 = vunpack.i.l.bf16 %v2999_v5  ;;  %v1762_v5 = vld [vmem:[#allocation3 + $0x10] sm:$0xff] }
 0x89a   :  { %v1840_v21 = vsel %vm144_vm2, %v3001_v18, %v2980_v7  ;;  %v1843_v62 = vsel %vm144_vm2, %v2996_v42, %v3000_v37  ;;  %v1830_v42 = vsel %vm144_vm2, %v3035_v11, %v3036_v58  ;;  %v1829_v7 = vsel %vm144_vm2, %v3030_v54, %v3031_v9 }
 0x89b   :  { %1873 = vmatpush.msrb.mxu0 %v1840_v21  ;;  %1892 = vmatpush.msrb.mxu1 %v1843_v62 }
 0x89c   :  { %v1767_v18 = vpop.permute.xlu1 %1766 }
 0x89d   :  { %1874 = vmatpush.msrb.mxu0 %v1838_v39  ;;  %1893 = vmatpush.msrb.mxu1 %v1841_v25 }
 0x89f   :  { %v3009_v55 = vpop.permute.xlu0 %3008 }
 0x8a0   :  { %v3011_v43 = vunpack.i.h.bf16 %v3009_v55  ;;  %v3010_v33 = vunpack.i.l.bf16 %v3009_v55 }
 0x8a2   :  { %v1836_v38 = vsel %vm144_vm2, %v3011_v43, %v3015_v29  ;;  %v1839_v48 = vsel %vm144_vm2, %v3006_v36, %v3010_v33  ;;  %v1831_v36 = vsel %vm144_vm2, %v3036_v58, %v2990_v49 }
 0x8a3   :  { %1875 = vmatpush.msrb.mxu0 %v1836_v38  ;;  %1894 = vmatpush.msrb.mxu1 %v1839_v48 }
 0x8a4   :  { %v1988_v38 = vpop.permute.xlu1 %1987 }
 0x8a5   :  { %1876 = vmatpush.msrb.mxu0 %v1834_v53  ;;  %1895 = vmatpush.msrb.mxu1 %v1837_v1 }
 0x8a7   :  { %v3019_v17 = vpop.permute.xlu0 %3018 }
 0x8a8   :  { %v3021_v20 = vunpack.i.h.bf16 %v3019_v17  ;;  %v3020_v23 = vunpack.i.l.bf16 %v3019_v17 }
 0x8aa   :  { %v1832_v16 = vsel %vm144_vm2, %v3021_v20, %v3025_v51  ;;  %v1835_v19 = vsel %vm144_vm2, %v2986_v56, %v3020_v23 }
 0x8ab   :  { %1877 = vmatpush.msrb.mxu0 %v1832_v16  ;;  %1896 = vmatpush.msrb.mxu1 %v1835_v19 }
 0x8ad   :  { %1878 = vmatpush.msrb.mxu0 %v1830_v42  ;;  %1897 = vmatpush.msrb.mxu1 %v1833_v6 }
 0x8af   :  { %v1777_v3 = vpop.permute.xlu0 %1776  ;;  %1879 = vmatpush.msrb.mxu0 %v1828_v8  ;;  %1898 = vmatpush.msrb.mxu1 %v1831_v36 }
 0x8b0   :  { %v1827_v22 = vsel %vm144_vm2, %v3041_v59, %v1777_v3 }
 0x8b1   :  { %1880 = vmatpush.msrb.mxu0 %v1826_v47  ;;  %1899 = vmatpush.msrb.mxu1 %v1829_v7 }
 0x8b2   :  { %2198 = vmatmul.msk.f32.vlgmr.msrb.gmra.mxu0 %vm340_vm12, %v1762_v5 }
 0x8b3   :  { %1900 = vmatpush.msrb.mxu1 %v1827_v22 }
 0x8b4   :  { %2199 = vmatmul.msk.f32.vlgmr.msrb.gmra.mxu1 %vm340_vm12, %v1762_v5 }
 0x92f   :  { %v1882_v37 = vpop.f32.mrf.mxu0 }
 0x930   :  { %v4314_v21 = vadd.f32 %v1882_v37, %v1767_v18 }
 0x931   :  { %v1902_v62 = vpop.f32.mrf.mxu1 }
 0x932   :  { %v4316_v39 = vadd.f32 %v1902_v62, %v1767_v18  ;;  %v1928_v25 = vmul.f32 %v4314_v21, %v3305_v13  ;;  %v1925_v56 = vmul.f32 %v4314_v21, %v3307_v14  ;;  %v1914_v29 = vmul.f32 %v4314_v21, %v3337_v30 }
 0x933   :  { %v1917_v43 = vmul.f32 %v4314_v21, %v3370_v44  ;;  %v2010_v44 = vpop.permute.xlu0 %2009 }
 0x934   :  { %v3042_v0 = vpack.i.bf16 %v4316_v39, %v4314_v21  ;;  %v1929_v35 = vmul.f32 %v4316_v39, %v3341_v31  ;;  %v1926_v61 = vmul.f32 %v4316_v39, %v3328_v26  ;;  %v1923_v13 = vmul.f32 %v4316_v39, %v3358_v40 }
 0x935   :  { %v1922_v31 = vmul.f32 %v4314_v21, %v3309_v15  ;;  %v1918_v14 = vmul.f32 %v4316_v39, %v3323_v24  ;;  %v3072_v40 = vpack.i.bf16 %v1914_v29, %v3330_v27  ;;  %v3077_v15 = vpack.i.bf16 %v4314_v21, %v3236_v12  ;;  %v1999_v27 = vpop.permute.xlu2 %1998 }
 0x936   :  { %3043 = vrot.lane.b32.xlu1 %v3042_v0, %s3234_s8  ;;  %v3052_v55 = vpack.i.bf16 %v1929_v35, %v1928_v25  ;;  %v3057_v10 = vpack.i.bf16 %v1926_v61, %v1925_v56  ;;  %v3067_v24 = vpack.i.bf16 %v1917_v43, %v3375_v45  ;;  %v1915_v30 = vmul.f32 %v4316_v39, %v3332_v28  ;;  %s3244_s8 = smov 256  }
 0x937   :  { %v3062_v26 = vpack.i.bf16 %v1923_v13, %v1922_v31 }
 0x938   :  { %3053 = vrot.lane.b32.xlu2 %v3052_v55, %s3237_s10  ;;  %3058 = vrot.lane.b32.xlu0 %v3057_v10, %s3238_s11 }
 0x93b   :  { %v1977_v48 = vpop.permute.xlu0 %1976 }
 0x93e   :  { %3048 = vrot.lane.b32.xlu1 %v3042_v0, %s3235_s9  ;;  %s3245_s9 = smov 16  }
 0x940   :  { %1960 = vrot.lane.b32.xlu0 %v1918_v14, %s3241_s14  ;;  %3063 = vrot.lane.b32.xlu2 %v3062_v26, %s3239_s12 }
 0x946   :  { %3073 = vrot.lane.b32.xlu1 %v3072_v40, %s3240_s13 }
 0x948   :  { %3078 = vrot.lane.b32.xlu0 %v3077_v15, %s3232_s28  ;;  %3068 = vrot.lane.b32.xlu2 %v3067_v24, %s3241_s14  ;;  %v2187_v15 = vld [vmem:[%s4430_s2 + $0x18] sm:$0xff]  ;;  %s3243_s2 = smov [#allocation8]  }
 0x94e   :  { %1938 = vrot.lane.b32.xlu1 %v4316_v39, %s3232_s28 }
 0x950   :  { %1949 = vrot.lane.b32.xlu2 %v1915_v30, %s3240_s13 }
 0x992   :  { %v3054_v33 = vpop.permute.xlu2 %3053 }
 0x993   :  { %v3056_v57 = vunpack.i.h.bf16 %v3054_v33  ;;  %v3055_v41 = vunpack.i.l.bf16 %v3054_v33 }
 0x995   :  { %v2011_v8 = vsel %vm237_vm7, %v3055_v41, %v3056_v57  ;;  %v2012_v13 = vsel %vm237_vm7, %v3056_v57, %v2010_v44 }
 0x996   :  { %v3097_v7 = vpack.i.bf16 %v2011_v8, %v3055_v41 }
 0x99a   :  { %v3064_v53 = vpop.permute.xlu2 %3063 }
 0x99b   :  { %v3066_v34 = vunpack.i.h.bf16 %v3064_v53  ;;  %v3065_v51 = vunpack.i.l.bf16 %v3064_v53 }
 0x99d   :  { %v1979_v4 = vsel %vm201_vm9, %v3066_v34, %v1977_v48  ;;  %v1978_v20 = vsel %vm201_vm9, %v3065_v51, %v3066_v34 }
 0x99e   :  { %v3117_v59 = vpack.i.bf16 %v1979_v4, %v1978_v20 }
 0x9a2   :  { %v3069_v16 = vpop.permute.xlu2 %3068 }
 0x9a3   :  { %v3071_v9 = vunpack.i.h.bf16 %v3069_v16  ;;  %v3070_v44 = vunpack.i.l.bf16 %v3069_v16 }
 0x9a5   :  { %v1962_v48 = vsel %vm184_vm11, %v3070_v44, %v3071_v9 }
 0x9a8   :  { %v3044_v12 = vpop.permute.xlu1 %3043 }
 0x9a9   :  { %v3046_v45 = vunpack.i.h.bf16 %v3044_v12  ;;  %v3045_v1 = vunpack.i.l.bf16 %v3044_v12  ;;  %v1912_v12 = vmul.f32 %v4316_v39, %v3415_v46 }
 0x9aa   :  { %v3059_v58 = vpop.permute.xlu0 %3058  ;;  %v1950_v62 = vpop.permute.xlu2 %1949 }
 0x9ab   :  { %v2001_v11 = vsel %vm225_vm5, %v3046_v45, %v1999_v27  ;;  %v2000_v32 = vsel %vm225_vm5, %v3045_v1, %v3046_v45  ;;  %v3061_v18 = vunpack.i.h.bf16 %v3059_v58  ;;  %v3060_v37 = vunpack.i.l.bf16 %v3059_v58 }
 0x9ac   :  { %v3082_v17 = vpack.i.bf16 %v2001_v11, %v2000_v32  ;;  %v3102_v26 = vpack.i.bf16 %v3045_v1, %v2012_v13  ;;  %v1911_v27 = vmul.f32 %v4314_v21, %v3421_v50 }
 0x9ad   :  { %v1989_v56 = vsel %vm213_vm8, %v3060_v37, %v3061_v18  ;;  %v1990_v40 = vsel %vm213_vm8, %v3061_v18, %v1988_v38 }
 0x9ae   :  { %3083 = vrot.lane.b32.xlu1 %v3082_v17, %s3229_s1  ;;  %v3107_v55 = vpack.i.bf16 %v1989_v56, %v3060_v37  ;;  %v3112_v30 = vpack.i.bf16 %v3065_v51, %v1990_v40  ;;  %v3142_v33 = vpack.i.bf16 %v1911_v27, %v3423_v52 }
 0x9b0   :  { %v3049_v28 = vpop.permute.xlu1 %3048 }
 0x9b1   :  { %v3051_v23 = vunpack.i.h.bf16 %v3049_v28  ;;  %v3050_v49 = vunpack.i.l.bf16 %v3049_v28 }
 0x9b2   :  { %v1961_v54 = vpop.permute.xlu0 %1960 }
 0x9b3   :  { %v1968_v19 = vsel %vm73_vm6, %v3050_v49, %v3051_v23  ;;  %v1963_v36 = vsel %vm184_vm11, %v3071_v9, %v1961_v54  ;;  %v3122_v38 = vpack.i.bf16 %v1962_v48, %v3051_v23 }
 0x9b4   :  { %v3087_v42 = vpack.i.bf16 %v1968_v19, %v3050_v49  ;;  %v3127_v22 = vpack.i.bf16 %v1961_v54, %v1963_v36 }
 0x9b6   :  { %3088 = vrot.lane.b32.xlu2 %v3087_v42, %s3229_s1  ;;  %3118 = vrot.lane.b32.xlu1 %v3117_v59, %s3229_s1 }
 0x9b8   :  { %v3074_v6 = vpop.permute.xlu1 %3073 }
 0x9b9   :  { %v3076_v31 = vunpack.i.h.bf16 %v3074_v6  ;;  %v3075_v14 = vunpack.i.l.bf16 %v3074_v6 }
 0x9ba   :  { %v3079_v3 = vpop.permute.xlu0 %3078 }
 0x9bb   :  { %v3081_v5 = vunpack.i.h.bf16 %v3079_v3  ;;  %v3080_v47 = vunpack.i.l.bf16 %v3079_v3  ;;  %v1952_v29 = vsel %vm172_vm10, %v3076_v31, %v1950_v62  ;;  %v1951_v43 = vsel %vm172_vm10, %v3075_v14, %v3076_v31 }
 0x9bc   :  { %v3137_v24 = vpack.i.bf16 %v1952_v29, %v1951_v43 }
 0x9bd   :  { %v1940_v25 = vsel %vm105_vm4, %v3080_v47, %v3081_v5 }
 0x9be   :  { %v3092_v0 = vpack.i.bf16 %v1940_v25, %v1950_v62  ;;  %3098 = vrot.lane.b32.xlu2 %v3097_v7, %s3229_s1  ;;  %3128 = vrot.lane.b32.xlu1 %v3127_v22, %s3229_s1 }
 0x9c0   :  { %3093 = vrot.lane.b32.xlu0 %v3092_v0, %s3229_s1  ;;  %v1939_v35 = vpop.permute.xlu1 %1938 }
 0x9c1   :  { %v1941_v61 = vsel %vm105_vm4, %v3081_v5, %v1939_v35 }
 0x9c2   :  { %v3132_v10 = vpack.i.bf16 %v1939_v35, %v1941_v61 }
 0x9c6   :  { %3108 = vrot.lane.b32.xlu2 %v3107_v55, %s3229_s1  ;;  %3133 = vrot.lane.b32.xlu1 %v3132_v10, %s3229_s1 }
 0x9c8   :  { %3103 = vrot.lane.b32.xlu0 %v3102_v26, %s3229_s1 }
 0x9ce   :  { %1006 = vperm.xlu1 %2936, %v2187_v15   ;;  %3138 = vrot.lane.b32.xlu2 %v3137_v24, %s3229_s1 }
 0x9d0   :  { %3113 = vrot.lane.b32.xlu0 %v3112_v30, %s3229_s1 }
 0x9d6   :  { %3143 = vrot.lane.b32.xlu2 %v3142_v33, %s3229_s1 }
 0x9d8   :  { %3123 = vrot.lane.b32.xlu0 %v3122_v38, %s3229_s1 }
 0x9de   :  { %2017 = vperm.xlu2 %2329, %v2187_v15  }
 0x9e0   :  { %2027 = vrot.lane.b32.xlu0 %v1912_v12, %s3229_s1  ;;  %s2163_s1 = sshll.u32 %s3243_s2, 4  ;;  %s2164_s1 = int_to_ptr.vmem [resolvable:$true] %s2163_s1 }
 0xa10   :  { %v3089_v53 = vpop.permute.xlu2 %3088 }
 0xa11   :  { %v3091_v9 = vunpack.i.h.bf16 %v3089_v53  ;;  %v3090_v6 = vunpack.i.l.bf16 %v3089_v53 }
 0xa13   :  { %v2085_v18 = vsel %vm144_vm2, %v3090_v6, %v3091_v9 }
 0xa18   :  { %v3099_v45 = vpop.permute.xlu2 %3098 }
 0xa19   :  { %v3101_v1 = vunpack.i.h.bf16 %v3099_v45  ;;  %v3100_v50 = vunpack.i.l.bf16 %v3099_v45 }
 0xa1b   :  { %v2093_v21 = vsel %vm144_vm2, %v3100_v50, %v3101_v1 }
 0xa1c   :  { %2123 = vmatpush.msrb.mxu2 %v2093_v21 }
 0xa20   :  { %v3084_v52 = vpop.permute.xlu1 %3083  ;;  %v3109_v17 = vpop.permute.xlu2 %3108 }
 0xa21   :  { %v3111_v51 = vunpack.i.h.bf16 %v3109_v17  ;;  %v3110_v28 = vunpack.i.l.bf16 %v3109_v17  ;;  %v3086_v39 = vunpack.i.h.bf16 %v3084_v52  ;;  %v3085_v4 = vunpack.i.l.bf16 %v3084_v52 }
 0xa23   :  { %v2089_v16 = vsel %vm144_vm2, %v3110_v28, %v3111_v51  ;;  %v2092_v19 = vsel %vm144_vm2, %v3085_v4, %v3086_v39 }
 0xa28   :  { %v3119_v58 = vpop.permute.xlu1 %3118  ;;  %v3139_v42 = vpop.permute.xlu2 %3138 }
 0xa29   :  { %v3121_v36 = vunpack.i.h.bf16 %v3119_v58  ;;  %v3120_v3 = vunpack.i.l.bf16 %v3119_v58  ;;  %v3140_v37 = vunpack.i.l.bf16 %v3139_v42 }
 0xa30   :  { %v3129_v11 = vpop.permute.xlu1 %3128  ;;  %v3144_v35 = vpop.permute.xlu2 %3143 }
 0xa31   :  { %v3131_v25 = vunpack.i.h.bf16 %v3129_v11  ;;  %v3130_v0 = vunpack.i.l.bf16 %v3129_v11  ;;  %v3146_v14 = vunpack.i.h.bf16 %v3144_v35  ;;  %v3145_v29 = vunpack.i.l.bf16 %v3144_v35 }
 0xa32   :  { %v4394_v32 = vpop.permute.xlu0 %3093 }
 0xa33   :  { %v3095_v55 = vunpack.i.l.bf16 %v4394_v32  ;;  %v3096_v43 = vunpack.i.h.bf16 %v4394_v32  ;;  %v2084_v15 = vsel %vm144_vm2, %v3130_v0, %v3131_v25  ;;  %v2077_v44 = vsel %vm144_vm2, %v3145_v29, %v3146_v14 }
 0xa38   :  { %v4396_v34 = vpop.permute.xlu1 %3133  ;;  %v2018_v38 = vpop.permute.xlu2 %2017 }
 0xa39   :  { %v3135_v10 = vunpack.i.l.bf16 %v4396_v34  ;;  %v3136_v40 = vunpack.i.h.bf16 %v4396_v34 }
 0xa3a   :  { %v3104_v46 = vpop.permute.xlu0 %3103 }
 0xa3b   :  { %v3106_v20 = vunpack.i.h.bf16 %v3104_v46  ;;  %v3105_v23 = vunpack.i.l.bf16 %v3104_v46  ;;  %v2079_v24 = vsel %vm144_vm2, %v3096_v43, %v3135_v10  ;;  %v2080_v33 = vsel %vm144_vm2, %v3135_v10, %v3136_v40 }
 0xa3d   :  { %v2091_v49 = vsel %vm144_vm2, %v3106_v20, %v3085_v4  ;;  %v2094_v54 = vsel %vm144_vm2, %v3101_v1, %v3105_v23 }
 0xa3e   :  { %2124 = vmatpush.msrb.mxu2 %v2091_v49  ;;  %2143 = vmatpush.msrb.mxu3 %v2094_v54 }
 0xa40   :  { %v1007_v59 = vpop.permute.xlu1 %1006  ;;  %2125 = vmatpush.msrb.mxu2 %v2089_v16  ;;  %2144 = vmatpush.msrb.mxu3 %v2092_v19 }
 0xa41   :  { %v1123_v57 = vadd.f32 %v4203_v63, %v1007_v59  ;;  %v1143_v41 = vadd.f32 %v4205_v2, %v1007_v59  ;;  %v2088_v63 = vsel %vm144_vm2, %v3120_v3, %v3121_v36  ;;  %v3141_v2 = vunpack.i.h.bf16 %v3139_v42 }
 0xa42   :  { %v3114_v8 = vpop.permute.xlu0 %3113 }
 0xa43   :  { %1145 = vst [vmem:[#allocation8] sm:$0xff] %v1123_v57  ;;  %v3116_v5 = vunpack.i.h.bf16 %v3114_v8  ;;  %v3115_v47 = vunpack.i.l.bf16 %v3114_v8  ;;  %v2081_v26 = vsel %vm144_vm2, %v3140_v37, %v3141_v2  ;;  %v2082_v30 = vsel %vm144_vm2, %v3141_v2, %v3095_v55 }
 0xa44   :  { %1146 = vst [vmem:[#allocation8 + $0x8] sm:$0xff] %v1143_v41 }
 0xa45   :  { %v2087_v7 = vsel %vm144_vm2, %v3116_v5, %v3120_v3  ;;  %v2090_v22 = vsel %vm144_vm2, %v3111_v51, %v3115_v47 }
 0xa46   :  { %2126 = vmatpush.msrb.mxu2 %v2087_v7  ;;  %2145 = vmatpush.msrb.mxu3 %v2090_v22 }
 0xa48   :  { %2127 = vmatpush.msrb.mxu2 %v2085_v18  ;;  %2146 = vmatpush.msrb.mxu3 %v2088_v63 }
 0xa4a   :  { %v3124_v62 = vpop.permute.xlu0 %3123 }
 0xa4b   :  { %v3126_v56 = vunpack.i.h.bf16 %v3124_v62  ;;  %v3125_v61 = vunpack.i.l.bf16 %v3124_v62 }
 0xa4d   :  { %v2083_v13 = vsel %vm144_vm2, %v3126_v56, %v3130_v0  ;;  %v2086_v31 = vsel %vm144_vm2, %v3091_v9, %v3125_v61 }
 0xa4e   :  { %2128 = vmatpush.msrb.mxu2 %v2083_v13  ;;  %2147 = vmatpush.msrb.mxu3 %v2086_v31 }
 0xa50   :  { %2129 = vmatpush.msrb.mxu2 %v2081_v26  ;;  %2148 = vmatpush.msrb.mxu3 %v2084_v15 }
 0xa52   :  { %v2028_v27 = vpop.permute.xlu0 %2027  ;;  %2130 = vmatpush.msrb.mxu2 %v2079_v24  ;;  %2149 = vmatpush.msrb.mxu3 %v2082_v30 }
 0xa53   :  { %v2078_v48 = vsel %vm144_vm2, %v3146_v14, %v2028_v27 }
 0xa54   :  { %2131 = vmatpush.msrb.mxu2 %v2077_v44  ;;  %2150 = vmatpush.msrb.mxu3 %v2080_v33 }
 0xa55   :  { %2201 = vmatmul.msk.f32.vlgmr.msrb.gmra.mxu2 %vm340_vm12, %v4172_v60 }
 0xa56   :  { %2151 = vmatpush.msrb.mxu3 %v2078_v48 }
 0xa57   :  { %2202 = vmatmul.msk.f32.vlgmr.msrb.gmra.mxu3 %vm340_vm12, %v4172_v60 }
 0xad8   :  { %v2133_v12 = vpop.f32.mrf.mxu2 }
 0xad9   :  { %v2134_v53 = vadd.f32 %v2133_v12, %v2018_v38 }
 0xada   :  { %v2153_v45 = vpop.f32.mrf.mxu3 }
 0xadb   :  { %2157 = vst [vmem:[#allocation8 + $0x10] sm:$0xff] %v2134_v53  ;;  %v2154_v1 = vadd.f32 %v2153_v45, %v2018_v38 }
 0xadd   :  { %2158 = vst [vmem:[#allocation8 + $0x18] sm:$0xff] %v2154_v1 }
 0xade   :  { %2171 = dma.vmem_to_hbm [thread:$0]  %s2164_s1, 512, %s2166_s7, [#allocation5], %s3244_s8, %s3244_s8, %s3245_s9  }
 0xadf   :  { %3223 = dma.done.wait [#allocation5], 512  }
 0xae0   :  { %3224 = vsyncadd [#allocation5], 4294966784 }
 0xae1   :  { %2176 = vsyncpa [#allocation4], 1 }
 0xae2   :  { %2177 = vsyncpa [#allocation7], 1 }
 0xae3   :  { %2178 = vsyncpa [#allocation5], 1 }

</bundles_post_ra>
